<compile_context>
chip_gen: v7x
topology: tpu7x:2x2x1
jax: 0.10.0
libtpu: 0.0.40
codegen_flags: <defaults>
</compile_context>

<pallas_src>
import jax
import jax.numpy as jnp
from jax.experimental import pallas as pl
from jax.experimental.pallas import tpu as pltpu

IMG = 32                          # original module uses 128
VMEM_LIMIT = 48 * 1024 * 1024     # < v7x's 64 MiB physical VMEM, roomy on v5e/v6e


def _tpu_generation():
    try:
        kind = jax.devices()[0].device_kind.lower()
    except Exception:
        return ""
    for g in ("v7", "v6", "v5", "v4"):
        if g in kind:
            return g
    return ""


_IS_V7X = _tpu_generation() == "v7"
# v5e/v6e: 128 MiB VMEM -> stream the head weights in huge K tiles (fewer grid
# steps).  v7x: only 64 MiB VMEM -> cap the tile (its 3.2 TB/s HBM keeps the
# stream short anyway).
_HEAD_TK_TARGET = 2048 if _IS_V7X else 8192


# ---------------------------------------------------------------------------
# Pallas kernels
# ---------------------------------------------------------------------------
def _conv_pool_kernel_1k(a_ref, b_ref, bias_ref, o_ref):
    """Single-K-step conv: o = maxpool2x2(relu(conv + bias)).

    a_ref: (4, tm, tk) bf16  -- 4 pool-window taps of im2col rows
    b_ref: (tk, tn)    bf16  -- conv weights reshaped K x Cout
    bias : (1, tn)     f32
    o_ref: (tm, tn)    bf16  -- pooled output rows
    One MXU matmul over the sublane-collapsed (4*tm, tk) A block.
    """
    nt, tm, tk = a_ref.shape
    tn = b_ref.shape[1]
    a = a_ref[...].reshape(nt * tm, tk)
    acc = jnp.dot(a, b_ref[...], preferred_element_type=jnp.float32)
    acc = acc.reshape(nt, tm, tn)
    r = acc[0]
    for t in range(1, nt):
        r = jnp.maximum(r, acc[t])
    o_ref[...] = jnp.maximum(r + bias_ref[...], 0.0).astype(o_ref.dtype)


def _conv_pool_kernel(a_ref, b_ref, bias_ref, o_ref, acc_ref):
    """Multi-K-step variant with a single resident (4*tm, tn) f32 accumulator."""
    k = pl.program_id(2)

    @pl.when(k == 0)
    def _():
        acc_ref[...] = jnp.zeros_like(acc_ref)

    nt, tm, tk = a_ref.shape
    a = a_ref[...].reshape(nt * tm, tk)
    acc_ref[...] += jnp.dot(a, b_ref[...], preferred_element_type=jnp.float32)

    @pl.when(k == pl.num_programs(2) - 1)
    def _():
        tn = b_ref.shape[1]
        acc = acc_ref[...].reshape(nt, tm, tn)
        r = acc[0]
        for t in range(1, nt):
            r = jnp.maximum(r, acc[t])
        o_ref[...] = jnp.maximum(r + bias_ref[...], 0.0).astype(o_ref.dtype)


def _conv_pool_head_kernel(a_ref, w_ref, bc_ref, wl1_ref, bl1_ref, wl2_ref,
                           bl2_ref, o_ref):
    """Fused conv2 + bias + ReLU + maxpool2x2 + linear1 + ReLU + linear2 + sigmoid.

    a_ref  : (4, S*N, K2) bf16  im2col rows, grouped by pool tap, rows = (spatial, sample)
    w_ref  : (K2, C2)     bf16
    bc_ref : (1, C2)      f32
    wl1_ref: (S, C2, N1)  bf16  linear1 weights, split per pooled spatial site
    bl1_ref: (1, N1)      f32
    wl2_ref: (N1, N2pad)  bf16  lane-dense (zero-padded) linear2 weights
    bl2_ref: (1, N2pad)   f32
    o_ref  : (N, N2pad)   f32
    """
    nt, m2, kdim = a_ref.shape
    spatial, c2, n1 = wl1_ref.shape
    batch = m2 // spatial

    # conv2 as one MXU matmul over all 4 pool taps.
    a = a_ref[...].reshape(nt * m2, kdim)
    acc = jnp.dot(a, w_ref[...], preferred_element_type=jnp.float32)
    acc = acc.reshape(nt, m2, c2)
    r = acc[0]
    for t in range(1, nt):
        r = jnp.maximum(r, acc[t])
    pooled = jnp.maximum(r + bc_ref[...], 0.0).astype(jnp.bfloat16)  # rows = (s, n)

    # linear1 as a sum over pooled spatial sites (avoids an in-kernel
    # sublane->lane flatten); rows for site s are a contiguous slice.
    h = jnp.zeros((batch, n1), jnp.float32)
    for s in range(spatial):
        h = h + jnp.dot(pooled[s * batch:(s + 1) * batch, :], wl1_ref[s],
                        preferred_element_type=jnp.float32)
    h = jnp.maximum(h + bl1_ref[...], 0.0).astype(jnp.bfloat16)

    logits = jnp.dot(h, wl2_ref[...],
                     preferred_element_type=jnp.float32) + bl2_ref[...]
    o_ref[...] = jax.nn.sigmoid(logits).astype(o_ref.dtype)


def _mlp_head_kernel_1k(x_ref, w1_ref, b1_ref, w2_ref, b2_ref, o_ref):
    """Fused linear1 + ReLU + linear2 + sigmoid, single K step."""
    h = jnp.dot(x_ref[...], w1_ref[...], preferred_element_type=jnp.float32)
    h = jnp.maximum(h + b1_ref[...], 0.0)
    logits = jnp.dot(h.astype(jnp.bfloat16), w2_ref[...],
                     preferred_element_type=jnp.float32) + b2_ref[...]
    o_ref[...] = jax.nn.sigmoid(logits).astype(o_ref.dtype)


def _mlp_head_kernel(x_ref, w1_ref, b1_ref, w2_ref, b2_ref, o_ref, acc_ref):
    """Fused linear1 + ReLU + linear2 + sigmoid, K tiled over the grid."""
    k = pl.program_id(0)

    @pl.when(k == 0)
    def _():
        acc_ref[...] = jnp.zeros_like(acc_ref)

    acc_ref[...] += jnp.dot(x_ref[...], w1_ref[...],
                            preferred_element_type=jnp.float32)

    @pl.when(k == pl.num_programs(0) - 1)
    def _():
        h = jnp.maximum(acc_ref[...] + b1_ref[...], 0.0)
        logits = jnp.dot(h.astype(jnp.bfloat16), w2_ref[...],
                         preferred_element_type=jnp.float32) + b2_ref[...]
        o_ref[...] = jax.nn.sigmoid(logits).astype(o_ref.dtype)


# ---------------------------------------------------------------------------
# Tiling helper: largest divisor <= target that satisfies lane/sublane
# alignment; falls back to the full dim (always a legal block).
# ---------------------------------------------------------------------------
def _pick_tile(dim, target, align):
    for c in range(min(dim, target), 0, -1):
        if dim % c == 0 and c % align == 0:
            return c
    return dim


# ---------------------------------------------------------------------------
# Wrappers
# ---------------------------------------------------------------------------
def conv_relu_pool(x, w, b, *, tm_target=2048, tn_target=512, tk_target=2048):
    """Fused conv(3x3, stride 2, pad 1) + bias + ReLU + maxpool(2x2).

    x: (N, H, W, Cin) NHWC bf16, w: (3, 3, Cin, Cout) bf16, b: (Cout,) f32.
    Returns (N, H//4, W//4, Cout) bf16.
    """
    n, h, wd, cin = x.shape
    kh, kw, _, cout = w.shape
    assert h % 4 == 0 and wd % 4 == 0, "need even conv output for 2x2 pooling"
    oh, ow = h // 2, wd // 2
    ph, pw = oh // 2, ow // 2
    kdim = kh * kw * cin

    # TODO(synk): move im2col in-kernel (BlockSpec over the padded NHWC input,
    # 9 accumulated taps) so the 9x patch tensor + tap transpose never hit HBM,
    # and fold the NCHW->NHWC / f32->bf16 cast of the raw input into that gather.
    xp = jnp.pad(x, ((0, 0), (1, 1), (1, 1), (0, 0)))
    patches = jnp.concatenate(
        [xp[:, dh:dh + 2 * oh:2, dw:dw + 2 * ow:2, :]
         for dh in range(kh) for dw in range(kw)], axis=-1)        # (N, OH, OW, K)
    # Group rows by 2x2 pool window: tap index becomes the leading dim.
    a = patches.reshape(n, ph, 2, pw, 2, kdim).transpose(2, 4, 0, 1, 3, 5)
    a = a.reshape(4, n * ph * pw, kdim).astype(jnp.bfloat16)

    bmat = w.reshape(kdim, cout)                                   # bf16
    bias2d = b.reshape(1, cout).astype(jnp.float32)

    m = n * ph * pw
    tm_t = tm_target
    if _IS_V7X and m >= 16:
        tm_t = min(tm_t, m // 2)      # keep >=2 parallel M blocks for the 2 TCs
    tm = _pick_tile(m, tm_t, 8)
    tn = _pick_tile(cout, tn_target, 128)
    tk = _pick_tile(kdim, tk_target, 128)
    nk = kdim // tk
    grid = (m // tm, cout // tn, nk)

    if nk == 1:
        kernel, scratch = _conv_pool_kernel_1k, []
    else:
        kernel, scratch = _conv_pool_kernel, [pltpu.VMEM((4 * tm, tn), jnp.float32)]

    out = pl.pallas_call(
        kernel,
        out_shape=jax.ShapeDtypeStruct((m, cout), jnp.bfloat16),
        grid_spec=pltpu.PrefetchScalarGridSpec(
            num_scalar_prefetch=0,
            grid=grid,
            in_specs=[
                pl.BlockSpec((4, tm, tk), lambda i, j, k: (0, i, k)),
                pl.BlockSpec((tk, tn), lambda i, j, k: (k, j)),
                pl.BlockSpec((1, tn), lambda i, j, k: (0, j)),
            ],
            out_specs=pl.BlockSpec((tm, tn), lambda i, j, k: (i, j)),
            scratch_shapes=scratch,
        ),
        compiler_params=pltpu.CompilerParams(
            dimension_semantics=("parallel", "parallel", "arbitrary"),
            vmem_limit_bytes=VMEM_LIMIT),
    )(a, bmat, bias2d)
    return out.reshape(n, ph, pw, cout)


def conv_pool_mlp_head(x, w, b, wl1, bl1, wl2p, bl2):
    """Single pallas_call: conv2+ReLU+pool fused with linear1+ReLU+linear2+sigmoid.

    Used when the whole working set (weights + patches) fits comfortably in VMEM.
    wl2p is the lane-dense (zero-padded to 128 columns) linear2 weight.
    """
    n, h, wd, cin = x.shape
    kh, kw, _, cout = w.shape
    oh, ow = h // 2, wd // 2
    ph, pw = oh // 2, ow // 2
    kdim = kh * kw * cin
    spatial = ph * pw
    k1, n1 = wl1.shape
    assert k1 == spatial * cout
    n2p = wl2p.shape[1]
    n2 = bl2.shape[0]

    xp = jnp.pad(x, ((0, 0), (1, 1), (1, 1), (0, 0)))
    patches = jnp.concatenate(
        [xp[:, dh:dh + 2 * oh:2, dw:dw + 2 * ow:2, :]
         for dh in range(kh) for dw in range(kw)], axis=-1)        # (N, OH, OW, K)
    # Rows ordered (spatial, sample) so each spatial site is a contiguous slice
    # of the pooled activation inside the kernel.
    a = patches.reshape(n, ph, 2, pw, 2, kdim).transpose(2, 4, 1, 3, 0, 5)
    a = a.reshape(4, spatial * n, kdim).astype(jnp.bfloat16)
    m2 = spatial * n

    bmat = w.reshape(kdim, cout)
    bc = b.reshape(1, cout).astype(jnp.float32)
    wl1_3d = wl1.reshape(spatial, cout, n1)
    b1r = bl1.reshape(1, n1).astype(jnp.float32)
    b2r = jnp.pad(bl2.reshape(1, n2).astype(jnp.float32), ((0, 0), (0, n2p - n2)))

    out = pl.pallas_call(
        _conv_pool_head_kernel,
        out_shape=jax.ShapeDtypeStruct((n, n2p), jnp.float32),
        grid_spec=pltpu.PrefetchScalarGridSpec(
            num_scalar_prefetch=0,
            grid=(1,),
            in_specs=[
                pl.BlockSpec((4, m2, kdim), lambda i: (0, 0, 0)),
                pl.BlockSpec((kdim, cout), lambda i: (0, 0)),
                pl.BlockSpec((1, cout), lambda i: (0, 0)),
                pl.BlockSpec((spatial, cout, n1), lambda i: (0, 0, 0)),
                pl.BlockSpec((1, n1), lambda i: (0, 0)),
                pl.BlockSpec((n1, n2p), lambda i: (0, 0)),
                pl.BlockSpec((1, n2p), lambda i: (0, 0)),
            ],
            out_specs=pl.BlockSpec((n, n2p), lambda i: (0, 0)),
        ),
        compiler_params=pltpu.CompilerParams(
            dimension_semantics=("arbitrary",),
            vmem_limit_bytes=VMEM_LIMIT),
    )(a, bmat, bc, wl1_3d, b1r, wl2p, b2r)
    return out[:, :n2]


def mlp_head(x, w1, b1, w2p, b2, *, tk_target=None):
    """sigmoid(relu(x @ w1 + b1) @ w2 + b2) in one Pallas call (K tiled).

    w2p is lane-dense (zero-padded) so the final store is an unmasked vst; the
    padded columns are sliced off here.  K tile is chip-aware (big on v5e/v6e,
    capped on v7x).
    """
    m, k1 = x.shape
    _, n1 = w1.shape
    n2p = w2p.shape[1]
    n2 = b2.shape[0]
    tk = _pick_tile(k1, _HEAD_TK_TARGET if tk_target is None else tk_target, 128)
    nk = k1 // tk
    b1r = b1.reshape(1, n1).astype(jnp.float32)
    b2r = jnp.pad(b2.reshape(1, n2).astype(jnp.float32), ((0, 0), (0, n2p - n2)))

    # TODO(synk): on v7x, add a parallel column-split grid axis over n1 so both
    # TensorCores stream disjoint halves of w1 (emit partial logits, combine outside).

    if nk == 1:
        kernel, scratch = _mlp_head_kernel_1k, []
    else:
        kernel, scratch = _mlp_head_kernel, [pltpu.VMEM((m, n1), jnp.float32)]

    out = pl.pallas_call(
        kernel,
        out_shape=jax.ShapeDtypeStruct((m, n2p), jnp.float32),
        grid_spec=pltpu.PrefetchScalarGridSpec(
            num_scalar_prefetch=0,
            grid=(nk,),
            in_specs=[
                pl.BlockSpec((m, tk), lambda k: (0, k)),
                pl.BlockSpec((tk, n1), lambda k: (k, 0)),
                pl.BlockSpec((1, n1), lambda k: (0, 0)),
                pl.BlockSpec((n1, n2p), lambda k: (0, 0)),
                pl.BlockSpec((1, n2p), lambda k: (0, 0)),
            ],
            out_specs=pl.BlockSpec((m, n2p), lambda k: (0, 0)),
            scratch_shapes=scratch,
        ),
        compiler_params=pltpu.CompilerParams(
            dimension_semantics=("arbitrary",),
            vmem_limit_bytes=VMEM_LIMIT),
    )(x.astype(jnp.bfloat16), w1, b1r, w2p, b2r)
    return out[:, :n2]


def face_detector_forward(x_nchw, p, *, fuse=None):
    # PyTorch feeds NCHW; kernels use NHWC (channels on the lane dim).
    # TODO(synk): fold this transpose + bf16 cast into the conv1 gather once
    # im2col moves in-kernel.
    x = jnp.transpose(x_nchw, (0, 2, 3, 1)).astype(jnp.bfloat16)
    x = conv_relu_pool(x, p["w1"], p["b1"])        # (N, IMG/4, IMG/4, 64)

    n, ph, pw, c1 = x.shape
    if fuse is None:
        spatial2 = (ph // 2) * (pw // 2)
        fused_bytes = (p["wl1"].size + p["wl2"].size + p["w2"].size) * 2 \
                      + 4 * spatial2 * n * 9 * c1 * 2
        fuse = fused_bytes < 6 * 1024 * 1024       # whole working set must sit in VMEM

    if fuse:
        # Single-call conv2 + pool + MLP head (small-shape path).
        return conv_pool_mlp_head(x, p["w2"], p["b2"], p["wl1"], p["bl1"],
                                  p["wl2"], p["bl2"])

    x = conv_relu_pool(x, p["w2"], p["b2"])        # (N, IMG/16, IMG/16, 256)
    x = x.reshape(n, -1)                           # NHWC flatten (wl1 pre-permuted to match)
    return mlp_head(x, p["wl1"], p["bl1"], p["wl2"], p["bl2"])


# ---------------------------------------------------------------------------
# Parameters: "spec" layout (f32, wl1 rows in PyTorch NCHW-flatten order) plus
# a one-time prep step producing the bf16 / NHWC-permuted / lane-dense weights.
# ---------------------------------------------------------------------------
def init_params(key, img):
    def uni(k, shape, fan_in):
        lim = 1.0 / jnp.sqrt(jnp.float32(fan_in))
        return jax.random.uniform(k, shape, jnp.float32, -lim, lim)

    flat = 256 * (img // 16) * (img // 16)
    ks = jax.random.split(key, 8)
    return {
        "w1": uni(ks[0], (3, 3, 3, 64), 3 * 3 * 3),
        "b1": uni(ks[1], (64,), 3 * 3 * 3),
        "w2": uni(ks[2], (3, 3, 64, 256), 64 * 3 * 3),
        "b2": uni(ks[3], (256,), 64 * 3 * 3),
        "wl1": uni(ks[4], (flat, 1024), flat),
        "bl1": uni(ks[5], (1024,), flat),
        "wl2": uni(ks[6], (1024, 3), 1024),
        "bl2": uni(ks[7], (3,), 1024),
    }


def prepare_inference_params(p, img):
    s = img // 16
    # Permute wl1 rows once: NCHW-flatten (c,h,w) -> NHWC-flatten (h,w,c).
    wl1 = p["wl1"].reshape(256, s, s, 1024).transpose(1, 2, 0, 3)
    wl1 = wl1.reshape(256 * s * s, 1024)
    # Lane-dense linear2: zero-pad output columns to a multiple of 128.
    n1, n2 = p["wl2"].shape
    n2p = ((n2 + 127) // 128) * 128
    wl2 = jnp.pad(p["wl2"], ((0, 0), (0, n2p - n2)))
    return {
        "w1": p["w1"].astype(jnp.bfloat16), "b1": p["b1"],
        "w2": p["w2"].astype(jnp.bfloat16), "b2": p["b2"],
        "wl1": wl1.astype(jnp.bfloat16), "bl1": p["bl1"],
        "wl2": wl2.astype(jnp.bfloat16), "bl2": p["bl2"],   # bl2 keeps true length
    }


# ---------------------------------------------------------------------------
# Pure-jnp reference (original NCHW-flatten semantics + original wl1/wl2
# layout, same bf16 operand quantization) for correctness checks.
# ---------------------------------------------------------------------------
def _ref_forward(x_nchw, p):
    x = jnp.transpose(x_nchw, (0, 2, 3, 1)).astype(jnp.bfloat16)

    def conv(x, w, b):
        n, h, wd, cin = x.shape
        kh, kw, _, cout = w.shape
        oh, ow = h // 2, wd // 2
        xp = jnp.pad(x, ((0, 0), (1, 1), (1, 1), (0, 0)))
        pat = jnp.concatenate(
            [xp[:, dh:dh + 2 * oh:2, dw:dw + 2 * ow:2, :]
             for dh in range(kh) for dw in range(kw)], axis=-1)
        y = jnp.dot(pat.reshape(n * oh * ow, -1).astype(jnp.bfloat16),
                    w.reshape(-1, cout).astype(jnp.bfloat16),
                    preferred_element_type=jnp.float32) + b
        return jnp.maximum(y, 0.0).reshape(n, oh, ow, cout)

    def pool(x):
        n, h, w, c = x.shape
        return x.reshape(n, h // 2, 2, w // 2, 2, c).max(axis=(2, 4))

    x = pool(conv(x, p["w1"], p["b1"])).astype(jnp.bfloat16)
    x = pool(conv(x, p["w2"], p["b2"])).astype(jnp.bfloat16)
    # PyTorch flattens NCHW ordering.
    x = jnp.transpose(x, (0, 3, 1, 2)).reshape(x.shape[0], -1)
    h = jnp.maximum(
        jnp.dot(x.astype(jnp.bfloat16), p["wl1"].astype(jnp.bfloat16),
                preferred_element_type=jnp.float32) + p["bl1"], 0.0)
    logits = jnp.dot(h.astype(jnp.bfloat16), p["wl2"].astype(jnp.bfloat16),
                     preferred_element_type=jnp.float32) + p["bl2"]
    return jax.nn.sigmoid(logits)


if __name__ == "__main__":
    key = jax.random.PRNGKey(0)
    k_x, k_p = jax.random.split(key)
    x = jax.random.normal(k_x, (2, 3, IMG, IMG), jnp.float32)   # NCHW, like PyTorch
    spec_params = init_params(k_p, IMG)
    params = prepare_inference_params(spec_params, IMG)

    fwd = jax.jit(face_detector_forward, static_argnames=("fuse",))
    out_fused = jax.block_until_ready(fwd(x, params))             # auto -> fused path at IMG=32
    out_split = jax.block_until_ready(fwd(x, params, fuse=False))  # also exercise 3-call path
    assert out_fused.shape == (2, 3), out_fused.shape
    assert out_split.shape == (2, 3), out_split.shape

    ref = jax.block_until_ready(jax.jit(_ref_forward)(x, spec_params))
    for out in (out_fused, out_split):
        err = float(jnp.max(jnp.abs(out - ref)))
        assert jnp.allclose(out, ref, atol=5e-3, rtol=5e-3), err

    print("KERNEL_OK")
</pallas_src>

<mosaic_0001>
module attributes {stable_mosaic.version = 11 : i64} {
  func.func @_conv_pool_kernel_1k(%arg0: i32, %arg1: i32, %arg2: i32, %arg3: memref<4x128x27xbf16, #tpu.memory_space<vmem>>, %arg4: memref<27x64xbf16, #tpu.memory_space<vmem>>, %arg5: memref<1x64xf32, #tpu.memory_space<vmem>>, %arg6: memref<128x64xbf16, #tpu.memory_space<vmem>>) attributes {dimension_semantics = [#tpu.dimension_semantics<parallel>, #tpu.dimension_semantics<parallel>, #tpu.dimension_semantics<arbitrary>], iteration_bounds = array<i64: 1, 1, 1>, scalar_prefetch = 0 : i64, scratch_operands = 0 : i64, tpu.core_type = #tpu.core_type<tc>, window_params = [{transform_indices = @transform_0, window_bounds = array<i64: 4, 128, 27>}, {transform_indices = @transform_1, window_bounds = array<i64: 27, 64>}, {transform_indices = @transform_2, window_bounds = array<i64: 1, 64>}, {transform_indices = @transform_3, window_bounds = array<i64: 128, 64>}]} {
    %c0 = arith.constant 0 : index
    %c0_0 = arith.constant 0 : index
    %c0_1 = arith.constant 0 : index
    %0 = vector.load %arg3[%c0, %c0_0, %c0_1] : memref<4x128x27xbf16, #tpu.memory_space<vmem>>, vector<4x128x27xbf16>
    %1 = vector.shape_cast %0 : vector<4x128x27xbf16> to vector<512x27xbf16>
    %c0_2 = arith.constant 0 : index
    %c0_3 = arith.constant 0 : index
    %2 = vector.load %arg4[%c0_2, %c0_3] : memref<27x64xbf16, #tpu.memory_space<vmem>>, vector<27x64xbf16>
    %cst = arith.constant dense<0.000000e+00> : vector<512x64xf32>
    %3 = tpu.matmul %1, %2, %cst {dimension_numbers = #tpu.dot_dimension_numbers<[1], [0], [0], [1], [0, 0, 1, 1], [], []>} : vector<512x27xbf16>, vector<27x64xbf16>, vector<512x64xf32> -> vector<512x64xf32>
    %4 = vector.shape_cast %3 : vector<512x64xf32> to vector<4x128x64xf32>
    %5 = vector.extract_strided_slice %4 {offsets = [0, 0, 0], sizes = [1, 128, 64], strides = [1, 1, 1]} : vector<4x128x64xf32> to vector<1x128x64xf32>
    %6 = vector.shape_cast %5 : vector<1x128x64xf32> to vector<128x64xf32>
    %7 = vector.extract_strided_slice %4 {offsets = [1, 0, 0], sizes = [1, 128, 64], strides = [1, 1, 1]} : vector<4x128x64xf32> to vector<1x128x64xf32>
    %8 = vector.shape_cast %7 : vector<1x128x64xf32> to vector<128x64xf32>
    %9 = arith.maximumf %6, %8 : vector<128x64xf32>
    %10 = vector.extract_strided_slice %4 {offsets = [2, 0, 0], sizes = [1, 128, 64], strides = [1, 1, 1]} : vector<4x128x64xf32> to vector<1x128x64xf32>
    %11 = vector.shape_cast %10 : vector<1x128x64xf32> to vector<128x64xf32>
    %12 = arith.maximumf %9, %11 : vector<128x64xf32>
    %13 = vector.extract_strided_slice %4 {offsets = [3, 0, 0], sizes = [1, 128, 64], strides = [1, 1, 1]} : vector<4x128x64xf32> to vector<1x128x64xf32>
    %14 = vector.shape_cast %13 : vector<1x128x64xf32> to vector<128x64xf32>
    %15 = arith.maximumf %12, %14 : vector<128x64xf32>
    %c0_4 = arith.constant 0 : index
    %c0_5 = arith.constant 0 : index
    %16 = vector.load %arg5[%c0_4, %c0_5] : memref<1x64xf32, #tpu.memory_space<vmem>>, vector<1x64xf32>
    %17 = vector.broadcast %16 : vector<1x64xf32> to vector<128x64xf32>
    %18 = arith.addf %15, %17 : vector<128x64xf32>
    %cst_6 = arith.constant 0.000000e+00 : f32
    %19 = vector.broadcast %cst_6 : f32 to vector<128x64xf32>
    %20 = arith.maximumf %18, %19 : vector<128x64xf32>
    %21 = arith.truncf %20 : vector<128x64xf32> to vector<128x64xbf16>
    %c0_7 = arith.constant 0 : index
    %c0_8 = arith.constant 0 : index
    %22 = vector.load %arg6[%c0_7, %c0_8] : memref<128x64xbf16, #tpu.memory_space<vmem>>, vector<128x64xbf16>
    tpu.vector_store %arg6[%c0_7, %c0_8], %21 {strides = array<i32>} : memref<128x64xbf16, #tpu.memory_space<vmem>>, vector<128x64xbf16>,
    return
  }
  func.func @transform_0(%arg0: i32, %arg1: i32, %arg2: i32) -> (i32, i32, i32) {
    %c0_i32 = arith.constant 0 : i32
    %c0_i32_0 = arith.constant 0 : i32
    return %c0_i32, %arg0, %arg2 : i32, i32, i32
  }
  func.func @transform_1(%arg0: i32, %arg1: i32, %arg2: i32) -> (i32, i32) {
    %c0_i32 = arith.constant 0 : i32
    return %arg2, %arg1 : i32, i32
  }
  func.func @transform_2(%arg0: i32, %arg1: i32, %arg2: i32) -> (i32, i32) {
    %c0_i32 = arith.constant 0 : i32
    %c0_i32_0 = arith.constant 0 : i32
    return %c0_i32, %arg1 : i32, i32
  }
  func.func @transform_3(%arg0: i32, %arg1: i32, %arg2: i32) -> (i32, i32) {
    %c0_i32 = arith.constant 0 : i32
    return %arg0, %arg1 : i32, i32
  }
}

module attributes {stable_mosaic.version = 11 : i64} {
  func.func @_conv_pool_head_kernel(%arg0: i32, %arg1: memref<4x8x576xbf16, #tpu.memory_space<vmem>>, %arg2: memref<576x256xbf16, #tpu.memory_space<vmem>>, %arg3: memref<1x256xf32, #tpu.memory_space<vmem>>, %arg4: memref<4x256x1024xbf16, #tpu.memory_space<vmem>>, %arg5: memref<1x1024xf32, #tpu.memory_space<vmem>>, %arg6: memref<1024x128xbf16, #tpu.memory_space<vmem>>, %arg7: memref<1x128xf32, #tpu.memory_space<vmem>>, %arg8: memref<2x128xf32, #tpu.memory_space<vmem>>) attributes {dimension_semantics = [#tpu.dimension_semantics<arbitrary>], iteration_bounds = array<i64: 1>, scalar_prefetch = 0 : i64, scratch_operands = 0 : i64, tpu.core_type = #tpu.core_type<tc>, window_params = [{pipeline_mode = #tpu.pipeline_mode<synchronous>, transform_indices = @transform_0, window_bounds = array<i64: 4, 8, 576>}, {pipeline_mode = #tpu.pipeline_mode<synchronous>, transform_indices = @transform_1, window_bounds = array<i64: 576, 256>}, {pipeline_mode = #tpu.pipeline_mode<synchronous>, transform_indices = @transform_2, window_bounds = array<i64: 1, 256>}, {pipeline_mode = #tpu.pipeline_mode<synchronous>, transform_indices = @transform_3, window_bounds = array<i64: 4, 256, 1024>}, {pipeline_mode = #tpu.pipeline_mode<synchronous>, transform_indices = @transform_4, window_bounds = array<i64: 1, 1024>}, {pipeline_mode = #tpu.pipeline_mode<synchronous>, transform_indices = @transform_5, window_bounds = array<i64: 1024, 128>}, {pipeline_mode = #tpu.pipeline_mode<synchronous>, transform_indices = @transform_6, window_bounds = array<i64: 1, 128>}, {pipeline_mode = #tpu.pipeline_mode<synchronous>, transform_indices = @transform_7, window_bounds = array<i64: 2, 128>}]} {
    %c0 = arith.constant 0 : index
    %c0_0 = arith.constant 0 : index
    %c0_1 = arith.constant 0 : index
    %0 = vector.load %arg1[%c0, %c0_0, %c0_1] : memref<4x8x576xbf16, #tpu.memory_space<vmem>>, vector<4x8x576xbf16>
    %1 = vector.shape_cast %0 : vector<4x8x576xbf16> to vector<32x576xbf16>
    %c0_2 = arith.constant 0 : index
    %c0_3 = arith.constant 0 : index
    %2 = vector.load %arg2[%c0_2, %c0_3] : memref<576x256xbf16, #tpu.memory_space<vmem>>, vector<576x256xbf16>
    %cst = arith.constant dense<0.000000e+00> : vector<32x256xf32>
    %3 = tpu.matmul %1, %2, %cst {dimension_numbers = #tpu.dot_dimension_numbers<[1], [0], [0], [1], [0, 0, 1, 1], [], []>} : vector<32x576xbf16>, vector<576x256xbf16>, vector<32x256xf32> -> vector<32x256xf32>
    %4 = vector.shape_cast %3 : vector<32x256xf32> to vector<4x8x256xf32>
    %5 = vector.extract_strided_slice %4 {offsets = [0, 0, 0], sizes = [1, 8, 256], strides = [1, 1, 1]} : vector<4x8x256xf32> to vector<1x8x256xf32>
    %6 = vector.shape_cast %5 : vector<1x8x256xf32> to vector<8x256xf32>
    %7 = vector.extract_strided_slice %4 {offsets = [1, 0, 0], sizes = [1, 8, 256], strides = [1, 1, 1]} : vector<4x8x256xf32> to vector<1x8x256xf32>
    %8 = vector.shape_cast %7 : vector<1x8x256xf32> to vector<8x256xf32>
    %9 = arith.maximumf %6, %8 : vector<8x256xf32>
    %10 = vector.extract_strided_slice %4 {offsets = [2, 0, 0], sizes = [1, 8, 256], strides = [1, 1, 1]} : vector<4x8x256xf32> to vector<1x8x256xf32>
    %11 = vector.shape_cast %10 : vector<1x8x256xf32> to vector<8x256xf32>
    %12 = arith.maximumf %9, %11 : vector<8x256xf32>
    %13 = vector.extract_strided_slice %4 {offsets = [3, 0, 0], sizes = [1, 8, 256], strides = [1, 1, 1]} : vector<4x8x256xf32> to vector<1x8x256xf32>
    %14 = vector.shape_cast %13 : vector<1x8x256xf32> to vector<8x256xf32>
    %15 = arith.maximumf %12, %14 : vector<8x256xf32>
    %c0_4 = arith.constant 0 : index
    %c0_5 = arith.constant 0 : index
    %16 = vector.load %arg3[%c0_4, %c0_5] : memref<1x256xf32, #tpu.memory_space<vmem>>, vector<1x256xf32>
    %17 = vector.broadcast %16 : vector<1x256xf32> to vector<8x256xf32>
    %18 = arith.addf %15, %17 : vector<8x256xf32>
    %cst_6 = arith.constant 0.000000e+00 : f32
    %19 = vector.broadcast %cst_6 : f32 to vector<8x256xf32>
    %20 = arith.maximumf %18, %19 : vector<8x256xf32>
    %21 = arith.truncf %20 : vector<8x256xf32> to vector<8x256xbf16>
    %cst_7 = arith.constant 0.000000e+00 : f32
    %22 = vector.broadcast %cst_7 : f32 to vector<2x1024xf32>
    %23 = vector.extract_strided_slice %21 {offsets = [0, 0], sizes = [2, 256], strides = [1, 1]} : vector<8x256xbf16> to vector<2x256xbf16>
    %c0_8 = arith.constant 0 : index
    %c0_9 = arith.constant 0 : index
    %c0_10 = arith.constant 0 : index
    %24 = vector.load %arg4[%c0_8, %c0_9, %c0_10] : memref<4x256x1024xbf16, #tpu.memory_space<vmem>>, vector<1x256x1024xbf16>
    %25 = vector.shape_cast %24 : vector<1x256x1024xbf16> to vector<256x1024xbf16>
    %cst_11 = arith.constant dense<0.000000e+00> : vector<2x1024xf32>
    %26 = tpu.matmul %23, %25, %cst_11 {dimension_numbers = #tpu.dot_dimension_numbers<[1], [0], [0], [1], [0, 0, 1, 1], [], []>} : vector<2x256xbf16>, vector<256x1024xbf16>, vector<2x1024xf32> -> vector<2x1024xf32>
    %27 = arith.addf %22, %26 : vector<2x1024xf32>
    %28 = vector.extract_strided_slice %21 {offsets = [2, 0], sizes = [2, 256], strides = [1, 1]} : vector<8x256xbf16> to vector<2x256xbf16>
    %c1 = arith.constant 1 : index
    %c0_12 = arith.constant 0 : index
    %c0_13 = arith.constant 0 : index
    %29 = vector.load %arg4[%c1, %c0_12, %c0_13] : memref<4x256x1024xbf16, #tpu.memory_space<vmem>>, vector<1x256x1024xbf16>
    %30 = vector.shape_cast %29 : vector<1x256x1024xbf16> to vector<256x1024xbf16>
    %cst_14 = arith.constant dense<0.000000e+00> : vector<2x1024xf32>
    %31 = tpu.matmul %28, %30, %cst_14 {dimension_numbers = #tpu.dot_dimension_numbers<[1], [0], [0], [1], [0, 0, 1, 1], [], []>} : vector<2x256xbf16>, vector<256x1024xbf16>, vector<2x1024xf32> -> vector<2x1024xf32>
    %32 = arith.addf %27, %31 : vector<2x1024xf32>
    %33 = vector.extract_strided_slice %21 {offsets = [4, 0], sizes = [2, 256], strides = [1, 1]} : vector<8x256xbf16> to vector<2x256xbf16>
    %c2 = arith.constant 2 : index
    %c0_15 = arith.constant 0 : index
    %c0_16 = arith.constant 0 : index
    %34 = vector.load %arg4[%c2, %c0_15, %c0_16] : memref<4x256x1024xbf16, #tpu.memory_space<vmem>>, vector<1x256x1024xbf16>
    %35 = vector.shape_cast %34 : vector<1x256x1024xbf16> to vector<256x1024xbf16>
    %cst_17 = arith.constant dense<0.000000e+00> : vector<2x1024xf32>
    %36 = tpu.matmul %33, %35, %cst_17 {dimension_numbers = #tpu.dot_dimension_numbers<[1], [0], [0], [1], [0, 0, 1, 1], [], []>} : vector<2x256xbf16>, vector<256x1024xbf16>, vector<2x1024xf32> -> vector<2x1024xf32>
    %37 = arith.addf %32, %36 : vector<2x1024xf32>
    %38 = vector.extract_strided_slice %21 {offsets = [6, 0], sizes = [2, 256], strides = [1, 1]} : vector<8x256xbf16> to vector<2x256xbf16>
    %c3 = arith.constant 3 : index
    %c0_18 = arith.constant 0 : index
    %c0_19 = arith.constant 0 : index
    %39 = vector.load %arg4[%c3, %c0_18, %c0_19] : memref<4x256x1024xbf16, #tpu.memory_space<vmem>>, vector<1x256x1024xbf16>
    %40 = vector.shape_cast %39 : vector<1x256x1024xbf16> to vector<256x1024xbf16>
    %cst_20 = arith.constant dense<0.000000e+00> : vector<2x1024xf32>
    %41 = tpu.matmul %38, %40, %cst_20 {dimension_numbers = #tpu.dot_dimension_numbers<[1], [0], [0], [1], [0, 0, 1, 1], [], []>} : vector<2x256xbf16>, vector<256x1024xbf16>, vector<2x1024xf32> -> vector<2x1024xf32>
    %42 = arith.addf %37, %41 : vector<2x1024xf32>
    %c0_21 = arith.constant 0 : index
    %c0_22 = arith.constant 0 : index
    %43 = vector.load %arg5[%c0_21, %c0_22] : memref<1x1024xf32, #tpu.memory_space<vmem>>, vector<1x1024xf32>
    %44 = vector.broadcast %43 : vector<1x1024xf32> to vector<2x1024xf32>
    %45 = arith.addf %42, %44 : vector<2x1024xf32>
    %cst_23 = arith.constant 0.000000e+00 : f32
    %46 = vector.broadcast %cst_23 : f32 to vector<2x1024xf32>
    %47 = arith.maximumf %45, %46 : vector<2x1024xf32>
    %48 = arith.truncf %47 : vector<2x1024xf32> to vector<2x1024xbf16>
    %c0_24 = arith.constant 0 : index
    %c0_25 = arith.constant 0 : index
    %49 = vector.load %arg6[%c0_24, %c0_25] : memref<1024x128xbf16, #tpu.memory_space<vmem>>, vector<1024x128xbf16>
    %cst_26 = arith.constant dense<0.000000e+00> : vector<2x128xf32>
    %50 = tpu.matmul %48, %49, %cst_26 {dimension_numbers = #tpu.dot_dimension_numbers<[1], [0], [0], [1], [0, 0, 1, 1], [], []>} : vector<2x1024xbf16>, vector<1024x128xbf16>, vector<2x128xf32> -> vector<2x128xf32>
    %c0_27 = arith.constant 0 : index
    %c0_28 = arith.constant 0 : index
    %51 = vector.load %arg7[%c0_27, %c0_28] : memref<1x128xf32, #tpu.memory_space<vmem>>, vector<1x128xf32>
    %52 = vector.broadcast %51 : vector<1x128xf32> to vector<2x128xf32>
    %53 = arith.addf %50, %52 : vector<2x128xf32>
    %54 = arith.negf %53 : vector<2x128xf32>
    %55 = math.exp %54 : vector<2x128xf32>
    %cst_29 = arith.constant 1.000000e+00 : f32
    %56 = vector.broadcast %cst_29 : f32 to vector<2x128xf32>
    %57 = arith.addf %56, %55 : vector<2x128xf32>
    %58 = arith.divf %56, %57 : vector<2x128xf32>
    %c0_30 = arith.constant 0 : index
    %c0_31 = arith.constant 0 : index
    %59 = vector.load %arg8[%c0_30, %c0_31] : memref<2x128xf32, #tpu.memory_space<vmem>>, vector<2x128xf32>
    tpu.vector_store %arg8[%c0_30, %c0_31], %58 {strides = array<i32>} : memref<2x128xf32, #tpu.memory_space<vmem>>, vector<2x128xf32>,
    return
  }
  func.func @transform_0(%arg0: i32) -> (i32, i32, i32) {
    %c0_i32 = arith.constant 0 : i32
    %c0_i32_0 = arith.constant 0 : i32
    %c0_i32_1 = arith.constant 0 : i32
    %c0_i32_2 = arith.constant 0 : i32
    return %c0_i32, %c0_i32_0, %c0_i32_1 : i32, i32, i32
  }
  func.func @transform_1(%arg0: i32) -> (i32, i32) {
    %c0_i32 = arith.constant 0 : i32
    %c0_i32_0 = arith.constant 0 : i32
    %c0_i32_1 = arith.constant 0 : i32
    return %c0_i32, %c0_i32_0 : i32, i32
  }
  func.func @transform_2(%arg0: i32) -> (i32, i32) {
    %c0_i32 = arith.constant 0 : i32
    %c0_i32_0 = arith.constant 0 : i32
    %c0_i32_1 = arith.constant 0 : i32
    return %c0_i32, %c0_i32_0 : i32, i32
  }
  func.func @transform_3(%arg0: i32) -> (i32, i32, i32) {
    %c0_i32 = arith.constant 0 : i32
    %c0_i32_0 = arith.constant 0 : i32
    %c0_i32_1 = arith.constant 0 : i32
    %c0_i32_2 = arith.constant 0 : i32
    return %c0_i32, %c0_i32_0, %c0_i32_1 : i32, i32, i32
  }
  func.func @transform_4(%arg0: i32) -> (i32, i32) {
    %c0_i32 = arith.constant 0 : i32
    %c0_i32_0 = arith.constant 0 : i32
    %c0_i32_1 = arith.constant 0 : i32
    return %c0_i32, %c0_i32_0 : i32, i32
  }
  func.func @transform_5(%arg0: i32) -> (i32, i32) {
    %c0_i32 = arith.constant 0 : i32
    %c0_i32_0 = arith.constant 0 : i32
    %c0_i32_1 = arith.constant 0 : i32
    return %c0_i32, %c0_i32_0 : i32, i32
  }
  func.func @transform_6(%arg0: i32) -> (i32, i32) {
    %c0_i32 = arith.constant 0 : i32
    %c0_i32_0 = arith.constant 0 : i32
    %c0_i32_1 = arith.constant 0 : i32
    return %c0_i32, %c0_i32_0 : i32, i32
  }
  func.func @transform_7(%arg0: i32) -> (i32, i32) {
    %c0_i32 = arith.constant 0 : i32
    %c0_i32_0 = arith.constant 0 : i32
    %c0_i32_1 = arith.constant 0 : i32
    return %c0_i32, %c0_i32_0 : i32, i32
  }
}

</mosaic_0001>

<bundles_post_ra>
// kernel: face_detector_forward.2
= control target key start
LH: loop header
LB: loop body
LE: loop exit
PB: predicated region body
PF: predicated region fallthrough
CT: control target
= control target key end

     0   :  { %vm351_vm0 = vcmask 1044480   ;;  %vm352_vm1 = vcmask 1045504   ;;  %vm254_vm2 = vcmask 220160   ;;  %v1059_v1 = vmov 65535   ;;  %s1371_s1 = inlined_call_operand.vmem [shape: bf16[27,64], index: 1, kind: input, shape index: {}]   ;;  %s1372_s0 = inlined_call_operand.vmem [shape: bf16[4,128,27], index: 0, kind: input, shape index: {}]   ;;  %s1373_s2 = inlined_call_operand.vmem [shape: f32[1,64], index: 2, kind: input, shape index: {}]   ;;  %s1374_s3 = inlined_call_operand.vmem [shape: bf16[128,64], index: 3, kind: output, shape index: {}]  }
   0x1   :  { %v1025_v0 = vld [vmem:[%s1371_s1] sm:$0xff]   ;;  %v353_v2 = vsel %vm351_vm0, 4294967295, %v1059_v1  ;;  %v1026_v3 = vld [vmem:[%s1371_s1 + $0x8] sm:$0x3f]   ;;  %v1031_v10 = vld [vmem:[%s1372_s0 + $0x10] sm:$0xff]   ;;  %vm798_vm3 = vcmask 519168  }
   0x2   :  { %952 = vmatprep.subr.bf16.mxu0 %v1025_v0  ;;  %1020 = vmatprep.subr.bf16.mxu1 %v1025_v0  ;;  %v354_v4 = vsel %vm352_vm1, %v353_v2, 0  ;;  %v1027_v5 = vld [vmem:[%s1372_s0] sm:$0xff]   ;;  %v1028_v8 = vld [vmem:[%s1372_s0 + $0x8] sm:$0xff]   ;;  %v1033_v11 = vld [vmem:[%s1372_s0 + $0x90] sm:$0xff]  }
   0x3   :  { %953 = vmatpush3.bf16.msra.mxu0 %v1025_v0  ;;  %1022 = vmatpush3.bf16.msra.mxu1 %v1025_v0  ;;  %v356_v6 = vand.u32 %v1026_v3, %v354_v4  ;;  %v1029_v7 = vld [vmem:[%s1372_s0 + $0x80] sm:$0xff]   ;;  %v1030_v9 = vld [vmem:[%s1372_s0 + $0x88] sm:$0xff]   ;;  %v1032_v12 = vld [vmem:[%s1372_s0 + $0x18] sm:$0xff]  }
   0x4   :  { %956 = vmatprep.mubr.msk.bf16.mxu0 %vm254_vm2, %v1027_v5  ;;  %988 = vmatprep.mubr.msk.bf16.mxu1 %vm254_vm2, %v1029_v7  ;;  %v1034_v13 = vld [vmem:[%s1372_s0 + $0x98] sm:$0xff]   ;;  %v1035_v14 = vld [vmem:[%s1372_s0 + $0x20] sm:$0xff]   ;;  %v1036_v16 = vld [vmem:[%s1372_s0 + $0x28] sm:$0xff]  }
   0x5   :  { %954 = vmatprep.subr.bf16.mxu0 %v356_v6  ;;  %1021 = vmatprep.subr.bf16.mxu1 %v356_v6  ;;  %v1037_v15 = vld [vmem:[%s1372_s0 + $0xa0] sm:$0xff]   ;;  %v1038_v17 = vld [vmem:[%s1372_s0 + $0xa8] sm:$0xff]   ;;  %v1039_v18 = vld [vmem:[%s1372_s0 + $0x30] sm:$0xff]  }
   0x6   :  { %v1041_v19 = vld [vmem:[%s1372_s0 + $0xb0] sm:$0xff]   ;;  %v1040_v20 = vld [vmem:[%s1372_s0 + $0x38] sm:$0xff]   ;;  %v1043_v22 = vld [vmem:[%s1372_s0 + $0x40] sm:$0xff]  }
   0x7   :  { %955 = vmatpush3.bf16.msra.mxu0 %v356_v6  ;;  %1023 = vmatpush3.bf16.msra.mxu1 %v356_v6  ;;  %v1042_v21 = vld [vmem:[%s1372_s0 + $0xb8] sm:$0xff]   ;;  %v1045_v23 = vld [vmem:[%s1372_s0 + $0xc0] sm:$0xff]   ;;  %v1044_v24 = vld [vmem:[%s1372_s0 + $0x48] sm:$0xff]  }
   0x8   :  { %v1046_v25 = vld [vmem:[%s1372_s0 + $0xc8] sm:$0xff]   ;;  %v1047_v26 = vld [vmem:[%s1372_s0 + $0x50] sm:$0xff]   ;;  %v1048_v28 = vld [vmem:[%s1372_s0 + $0x58] sm:$0xff]  }
   0x9   :  { %v1049_v27 = vld [vmem:[%s1372_s0 + $0xd0] sm:$0xff]   ;;  %v1050_v29 = vld [vmem:[%s1372_s0 + $0xd8] sm:$0xff]   ;;  %v1051_v30 = vld [vmem:[%s1372_s0 + $0x60] sm:$0xff]  }
   0xa   :  { %957 = vmatmul.mubr.msk.bf16.vlgmr.msra.gmra.mrb[0].mxu0 %vm254_vm2, %v1028_v8  ;;  %989 = vmatmul.mubr.msk.bf16.vlgmr.msra.gmra.mrb[0].mxu1 %vm254_vm2, %v1030_v9  ;;  %v1053_v31 = vld [vmem:[%s1372_s0 + $0xe0] sm:$0xff]   ;;  %v1052_v32 = vld [vmem:[%s1372_s0 + $0x68] sm:$0xff]   ;;  %v1055_v34 = vld [vmem:[%s1372_s0 + $0x70] sm:$0xff]  }
   0xb   :  { %960 = vmatprep.mubr.msk.bf16.mxu0 %vm254_vm2, %v1031_v10  ;;  %992 = vmatprep.mubr.msk.bf16.mxu1 %vm254_vm2, %v1033_v11  ;;  %v1054_v33 = vld [vmem:[%s1372_s0 + $0xe8] sm:$0xff]   ;;  %v1057_v35 = vld [vmem:[%s1372_s0 + $0xf0] sm:$0xff]   ;;  %v1056_v36 = vld [vmem:[%s1372_s0 + $0x78] sm:$0xff]  }
   0xc   :  { %v1058_v37 = vld [vmem:[%s1372_s0 + $0xf8] sm:$0xff]  }
  0x12   :  { %961 = vmatmul.mubr.msk.bf16.gmra.mrb[4].mxu0 %vm254_vm2, %v1032_v12  ;;  %993 = vmatmul.mubr.msk.bf16.gmra.mrb[4].mxu1 %vm254_vm2, %v1034_v13 }
  0x13   :  { %964 = vmatprep.mubr.msk.bf16.mxu0 %vm254_vm2, %v1035_v14  ;;  %996 = vmatprep.mubr.msk.bf16.mxu1 %vm254_vm2, %v1037_v15 }
  0x1a   :  { %965 = vmatmul.mubr.msk.bf16.gmra.mrb[8].mxu0 %vm254_vm2, %v1036_v16  ;;  %997 = vmatmul.mubr.msk.bf16.gmra.mrb[8].mxu1 %vm254_vm2, %v1038_v17 }
  0x1b   :  { %968 = vmatprep.mubr.msk.bf16.mxu0 %vm254_vm2, %v1039_v18  ;;  %1000 = vmatprep.mubr.msk.bf16.mxu1 %vm254_vm2, %v1041_v19  ;;  %v1265_v18 = vld [vmem:[%s1373_s2] ss:$0 sm:$0xff] }
  0x22   :  { %969 = vmatmul.mubr.msk.bf16.gmra.mrb[12].mxu0 %vm254_vm2, %v1040_v20  ;;  %1001 = vmatmul.mubr.msk.bf16.gmra.mrb[12].mxu1 %vm254_vm2, %v1042_v21 }
  0x23   :  { %972 = vmatprep.mubr.msk.bf16.mxu0 %vm254_vm2, %v1043_v22  ;;  %1004 = vmatprep.mubr.msk.bf16.mxu1 %vm254_vm2, %v1045_v23 }
  0x2a   :  { %973 = vmatmul.mubr.msk.bf16.gmra.mrb[16].mxu0 %vm254_vm2, %v1044_v24  ;;  %1005 = vmatmul.mubr.msk.bf16.gmra.mrb[16].mxu1 %vm254_vm2, %v1046_v25 }
  0x2b   :  { %976 = vmatprep.mubr.msk.bf16.mxu0 %vm254_vm2, %v1047_v26  ;;  %1008 = vmatprep.mubr.msk.bf16.mxu1 %vm254_vm2, %v1049_v27 }
  0x32   :  { %977 = vmatmul.mubr.msk.bf16.gmra.mrb[20].mxu0 %vm254_vm2, %v1048_v28  ;;  %1009 = vmatmul.mubr.msk.bf16.gmra.mrb[20].mxu1 %vm254_vm2, %v1050_v29 }
  0x33   :  { %980 = vmatprep.mubr.msk.bf16.mxu0 %vm254_vm2, %v1051_v30  ;;  %1012 = vmatprep.mubr.msk.bf16.mxu1 %vm254_vm2, %v1053_v31 }
  0x3a   :  { %981 = vmatmul.mubr.msk.bf16.gmra.mrb[24].mxu0 %vm254_vm2, %v1052_v32  ;;  %1013 = vmatmul.mubr.msk.bf16.gmra.mrb[24].mxu1 %vm254_vm2, %v1054_v33 }
  0x3b   :  { %984 = vmatprep.mubr.msk.bf16.mxu0 %vm254_vm2, %v1055_v34  ;;  %1016 = vmatprep.mubr.msk.bf16.mxu1 %vm254_vm2, %v1057_v35 }
  0x42   :  { %985 = vmatmul.mubr.msk.bf16.gmra.mrb[28].mxu0 %vm254_vm2, %v1056_v36  ;;  %1017 = vmatmul.mubr.msk.bf16.gmra.mrb[28].mxu1 %vm254_vm2, %v1058_v37 }
  0xdd   :  { %v958_v38 = vpop.f32.mrb[0].mxu0  ;;  %v990_v39 = vpop.f32.mrb[0].mxu1 }
  0xde   :  { %v392_v40 = vpop.f32.mrb[1].mxu0  ;;  %v520_v41 = vpop.f32.mrb[1].mxu1 }
  0xdf   :  { %v959_v42 = vpop.f32.mrb[2].mxu0  ;;  %v991_v43 = vpop.f32.mrb[2].mxu1 }
  0xe0   :  { %v395_v44 = vpop.f32.mrb[3].mxu0  ;;  %v523_v45 = vpop.f32.mrb[3].mxu1 }
  0xe5   :  { %v1214_v46 = vpop.f32.mrb[4].mxu0  ;;  %v1216_v47 = vpop.f32.mrb[4].mxu1 }
  0xe6   :  { %v1218_v48 = vpop.f32.mrb[5].mxu0  ;;  %v1220_v49 = vpop.f32.mrb[5].mxu1 }
  0xe7   :  { %v1222_v50 = vpop.f32.mrb[6].mxu0  ;;  %v1224_v51 = vpop.f32.mrb[6].mxu1 }
  0xe8   :  { %v1226_v52 = vpop.f32.mrb[7].mxu0  ;;  %v1228_v53 = vpop.f32.mrb[7].mxu1 }
  0xed   :  { %v1230_v54 = vpop.f32.mrb[8].mxu0  ;;  %v1232_v55 = vpop.f32.mrb[8].mxu1 }
  0xee   :  { %v1234_v56 = vpop.f32.mrb[9].mxu0  ;;  %v1236_v57 = vpop.f32.mrb[9].mxu1 }
  0xef   :  { %v1238_v58 = vpop.f32.mrb[10].mxu0  ;;  %v1240_v59 = vpop.f32.mrb[10].mxu1 }
  0xf0   :  { %v1242_v60 = vpop.f32.mrb[11].mxu0  ;;  %v1244_v61 = vpop.f32.mrb[11].mxu1 }
  0xf5   :  { %v1246_v62 = vpop.f32.mrb[12].mxu0  ;;  %v1248_v63 = vpop.f32.mrb[12].mxu1 }
  0xf6   :  { %v1250_v0 = vpop.f32.mrb[13].mxu0  ;;  %v1252_v1 = vpop.f32.mrb[13].mxu1 }
  0xf7   :  { %v1254_v2 = vpop.f32.mrb[14].mxu0  ;;  %v1256_v3 = vpop.f32.mrb[14].mxu1 }
  0xf8   :  { %v1258_v4 = vpop.f32.mrb[15].mxu0  ;;  %v1260_v5 = vpop.f32.mrb[15].mxu1 }
  0xfd   :  { %v974_v6 = vpop.f32.mrb[16].mxu0  ;;  %v1006_v7 = vpop.f32.mrb[16].mxu1 }
  0xfe   :  { %v649_v8 = vmax.f32 %v958_v38, %v974_v6  ;;  %v456_v9 = vpop.f32.mrb[17].mxu0  ;;  %v584_v10 = vpop.f32.mrb[17].mxu1 }
  0xff   :  { %v647_v11 = vmax.f32 %v392_v40, %v456_v9  ;;  %v975_v12 = vpop.f32.mrb[18].mxu0  ;;  %v1007_v13 = vpop.f32.mrb[18].mxu1 }
 0x100   :  { %v665_v14 = vmax.f32 %v649_v8, %v990_v39  ;;  %v650_v15 = vmax.f32 %v959_v42, %v975_v12  ;;  %v459_v16 = vpop.f32.mrb[19].mxu0  ;;  %v587_v17 = vpop.f32.mrb[19].mxu1 }
 0x101   :  { %v663_v19 = vmax.f32 %v647_v11, %v520_v41  ;;  %v648_v20 = vmax.f32 %v395_v44, %v459_v16 }
 0x102   :  { %v681_v21 = vmax.f32 %v665_v14, %v1006_v7  ;;  %v666_v22 = vmax.f32 %v650_v15, %v991_v43 }
 0x103   :  { %v679_v23 = vmax.f32 %v663_v19, %v584_v10  ;;  %v664_v24 = vmax.f32 %v648_v20, %v523_v45 }
 0x104   :  { %v704_v25 = vadd.f32 %v1265_v18, %v681_v21  ;;  %v682_v26 = vmax.f32 %v666_v22, %v1007_v13 }
 0x105   :  { %v702_v27 = vadd.f32 %v1265_v18, %v679_v23  ;;  %v680_v28 = vmax.f32 %v664_v24, %v587_v17  ;;  %v978_v29 = vpop.f32.mrb[20].mxu0  ;;  %v1010_v30 = vpop.f32.mrb[20].mxu1 }
 0x106   :  { %v720_v31 = vmax.f32 %v704_v25, 0.0  ;;  %v705_v32 = vadd.f32 %v1265_v18, %v682_v26  ;;  %v653_v33 = vmax.f32 %v1214_v46, %v978_v29  ;;  %v472_v34 = vpop.f32.mrb[21].mxu0  ;;  %v600_v35 = vpop.f32.mrb[21].mxu1 }
 0x107   :  { %v718_v36 = vmax.f32 %v702_v27, 0.0  ;;  %v703_v37 = vadd.f32 %v1265_v18, %v680_v28  ;;  %v651_v38 = vmax.f32 %v1218_v48, %v472_v34  ;;  %v979_v39 = vpop.f32.mrb[22].mxu0  ;;  %v1011_v40 = vpop.f32.mrb[22].mxu1 }
 0x108   :  { %v904_v41 = vpack.c.bf16 %v720_v31, %v720_v31  ;;  %v721_v42 = vmax.f32 %v705_v32, 0.0  ;;  %v669_v43 = vmax.f32 %v653_v33, %v1216_v47  ;;  %v654_v44 = vmax.f32 %v1222_v50, %v979_v39  ;;  %v475_v45 = vpop.f32.mrb[23].mxu0  ;;  %v603_v6 = vpop.f32.mrb[23].mxu1 }
 0x109   :  { %v902_v7 = vpack.c.bf16 %v718_v36, %v718_v36  ;;  %v719_v46 = vmax.f32 %v703_v37, 0.0  ;;  %v667_v8 = vmax.f32 %v651_v38, %v1220_v49  ;;  %v652_v9 = vmax.f32 %v1226_v52, %v475_v45 }
 0x10a   :  { %801 = vst.msk [vmem:[%s1374_s3 + $0x8] sm:$0xf] %vm798_vm3, %v904_v41  ;;  %v905_v48 = vpack.c.bf16 %v721_v42, %v721_v42  ;;  %v685_v10 = vmax.f32 %v669_v43, %v1010_v30  ;;  %v670_v11 = vmax.f32 %v654_v44, %v1224_v51 }
 0x10b   :  { %799 = vst.msk [vmem:[%s1374_s3] sm:$0xf] %vm798_vm3, %v902_v7  ;;  %v903_v47 = vpack.c.bf16 %v719_v46, %v719_v46  ;;  %v683_v50 = vmax.f32 %v667_v8, %v600_v35  ;;  %v668_v49 = vmax.f32 %v652_v9, %v1228_v53 }
 0x10c   :  { %802 = vst.msk [vmem:[%s1374_s3 + $0xc] sm:$0xf] %vm798_vm3, %v905_v48  ;;  %v708_v52 = vadd.f32 %v1265_v18, %v685_v10  ;;  %v686_v12 = vmax.f32 %v670_v11, %v1011_v40 }
 0x10d   :  { %800 = vst.msk [vmem:[%s1374_s3 + $0x4] sm:$0xf] %vm798_vm3, %v903_v47  ;;  %v706_v51 = vadd.f32 %v1265_v18, %v683_v50  ;;  %v684_v13 = vmax.f32 %v668_v49, %v603_v6  ;;  %v982_v14 = vpop.f32.mrb[24].mxu0  ;;  %v1014_v15 = vpop.f32.mrb[24].mxu1 }
 0x10e   :  { %v724_v16 = vmax.f32 %v708_v52, 0.0  ;;  %v709_v53 = vadd.f32 %v1265_v18, %v686_v12  ;;  %v657_v17 = vmax.f32 %v1230_v54, %v982_v14  ;;  %v488_v19 = vpop.f32.mrb[25].mxu0  ;;  %v616_v20 = vpop.f32.mrb[25].mxu1 }
 0x10f   :  { %v722_v21 = vmax.f32 %v706_v51, 0.0  ;;  %v707_v22 = vadd.f32 %v1265_v18, %v684_v13  ;;  %v655_v23 = vmax.f32 %v1234_v56, %v488_v19  ;;  %v983_v24 = vpop.f32.mrb[26].mxu0  ;;  %v1015_v25 = vpop.f32.mrb[26].mxu1 }
 0x110   :  { %v908_v26 = vpack.c.bf16 %v724_v16, %v724_v16  ;;  %v725_v27 = vmax.f32 %v709_v53, 0.0  ;;  %v673_v28 = vmax.f32 %v657_v17, %v1232_v55  ;;  %v658_v29 = vmax.f32 %v1238_v58, %v983_v24  ;;  %v491_v30 = vpop.f32.mrb[27].mxu0  ;;  %v619_v31 = vpop.f32.mrb[27].mxu1 }
 0x111   :  { %v906_v32 = vpack.c.bf16 %v722_v21, %v722_v21  ;;  %v723_v33 = vmax.f32 %v707_v22, 0.0  ;;  %v671_v54 = vmax.f32 %v655_v23, %v1236_v57  ;;  %v656_v34 = vmax.f32 %v1242_v60, %v491_v30 }
 0x112   :  { %805 = vst.msk [vmem:[%s1374_s3 + $0x18] sm:$0xf] %vm798_vm3, %v908_v26  ;;  %v909_v56 = vpack.c.bf16 %v725_v27, %v725_v27  ;;  %v689_v35 = vmax.f32 %v673_v28, %v1014_v15  ;;  %v674_v36 = vmax.f32 %v658_v29, %v1240_v59 }
 0x113   :  { %803 = vst.msk [vmem:[%s1374_s3 + $0x10] sm:$0xf] %vm798_vm3, %v906_v32  ;;  %v907_v55 = vpack.c.bf16 %v723_v33, %v723_v33  ;;  %v687_v58 = vmax.f32 %v671_v54, %v616_v20  ;;  %v672_v57 = vmax.f32 %v656_v34, %v1244_v61 }
 0x114   :  { %806 = vst.msk [vmem:[%s1374_s3 + $0x1c] sm:$0xf] %vm798_vm3, %v909_v56  ;;  %v712_v60 = vadd.f32 %v1265_v18, %v689_v35  ;;  %v690_v37 = vmax.f32 %v674_v36, %v1015_v25 }
 0x115   :  { %804 = vst.msk [vmem:[%s1374_s3 + $0x14] sm:$0xf] %vm798_vm3, %v907_v55  ;;  %v710_v59 = vadd.f32 %v1265_v18, %v687_v58  ;;  %v688_v38 = vmax.f32 %v672_v57, %v619_v31  ;;  %v986_v39 = vpop.f32.mrb[28].mxu0  ;;  %v1018_v40 = vpop.f32.mrb[28].mxu1 }
 0x116   :  { %v728_v41 = vmax.f32 %v712_v60, 0.0  ;;  %v713_v61 = vadd.f32 %v1265_v18, %v690_v37  ;;  %v661_v42 = vmax.f32 %v1246_v62, %v986_v39  ;;  %v504_v43 = vpop.f32.mrb[29].mxu0  ;;  %v632_v44 = vpop.f32.mrb[29].mxu1 }
 0x117   :  { %v726_v45 = vmax.f32 %v710_v59, 0.0  ;;  %v711_v6 = vadd.f32 %v1265_v18, %v688_v38  ;;  %v659_v7 = vmax.f32 %v1250_v0, %v504_v43  ;;  %v987_v46 = vpop.f32.mrb[30].mxu0  ;;  %v1019_v8 = vpop.f32.mrb[30].mxu1 }
 0x118   :  { %v912_v9 = vpack.c.bf16 %v728_v41, %v728_v41  ;;  %v729_v48 = vmax.f32 %v713_v61, 0.0  ;;  %v677_v10 = vmax.f32 %v661_v42, %v1248_v63  ;;  %v662_v11 = vmax.f32 %v1254_v2, %v987_v46  ;;  %v507_v47 = vpop.f32.mrb[31].mxu0  ;;  %v635_v50 = vpop.f32.mrb[31].mxu1 }
 0x119   :  { %v910_v49 = vpack.c.bf16 %v726_v45, %v726_v45  ;;  %v727_v52 = vmax.f32 %v711_v6, 0.0  ;;  %v675_v62 = vmax.f32 %v659_v7, %v1252_v1  ;;  %v660_v12 = vmax.f32 %v1258_v4, %v507_v47 }
 0x11a   :  { %809 = vst.msk [vmem:[%s1374_s3 + $0x28] sm:$0xf] %vm798_vm3, %v912_v9  ;;  %v913_v0 = vpack.c.bf16 %v729_v48, %v729_v48  ;;  %v693_v51 = vmax.f32 %v677_v10, %v1018_v40  ;;  %v678_v13 = vmax.f32 %v662_v11, %v1256_v3 }
 0x11b   :  { %807 = vst.msk [vmem:[%s1374_s3 + $0x20] sm:$0xf] %vm798_vm3, %v910_v49  ;;  %v911_v63 = vpack.c.bf16 %v727_v52, %v727_v52  ;;  %v691_v2 = vmax.f32 %v675_v62, %v632_v44  ;;  %v676_v1 = vmax.f32 %v660_v12, %v1260_v5 }
 0x11c   :  { %810 = vst.msk [vmem:[%s1374_s3 + $0x2c] sm:$0xf] %vm798_vm3, %v913_v0  ;;  %v716_v4 = vadd.f32 %v1265_v18, %v693_v51  ;;  %v694_v14 = vmax.f32 %v678_v13, %v1019_v8 }
 0x11d   :  { %808 = vst.msk [vmem:[%s1374_s3 + $0x24] sm:$0xf] %vm798_vm3, %v911_v63  ;;  %v714_v3 = vadd.f32 %v1265_v18, %v691_v2  ;;  %v692_v15 = vmax.f32 %v676_v1, %v635_v50 }
 0x11e   :  { %v732_v16 = vmax.f32 %v716_v4, 0.0  ;;  %v717_v53 = vadd.f32 %v1265_v18, %v694_v14 }
 0x11f   :  { %v730_v5 = vmax.f32 %v714_v3, 0.0  ;;  %v715_v17 = vadd.f32 %v1265_v18, %v692_v15 }
 0x120   :  { %v916_v19 = vpack.c.bf16 %v732_v16, %v732_v16  ;;  %v733_v20 = vmax.f32 %v717_v53, 0.0 }
 0x121   :  { %v914_v21 = vpack.c.bf16 %v730_v5, %v730_v5  ;;  %v731_v22 = vmax.f32 %v715_v17, 0.0 }
 0x122   :  { %813 = vst.msk [vmem:[%s1374_s3 + $0x38] sm:$0xf] %vm798_vm3, %v916_v19  ;;  %v917_v23 = vpack.c.bf16 %v733_v20, %v733_v20 }
 0x123   :  { %811 = vst.msk [vmem:[%s1374_s3 + $0x30] sm:$0xf] %vm798_vm3, %v914_v21  ;;  %v915_v24 = vpack.c.bf16 %v731_v22, %v731_v22 }
 0x124   :  { %814 = vst.msk [vmem:[%s1374_s3 + $0x3c] sm:$0xf] %vm798_vm3, %v917_v23 }
 0x125   :  { %812 = vst.msk [vmem:[%s1374_s3 + $0x34] sm:$0xf] %vm798_vm3, %v915_v24 }

// kernel: face_detector_forward.3
= control target key start
LH: loop header
LB: loop body
LE: loop exit
PB: predicated region body
PF: predicated region fallthrough
CT: control target
= control target key end

     0   :  { %s8792_s0 = inlined_call_operand.vmem [shape: bf16[4,8,576], index: 0, kind: input, shape index: {}]   ;;  %s8793_s1 = inlined_call_operand.vmem [shape: bf16[576,256], index: 1, kind: input, shape index: {}]   ;;  %s8794_s2 = inlined_call_operand.vmem [shape: f32[1,256], index: 2, kind: input, shape index: {}]   ;;  %s8795_s3 = inlined_call_operand.vmem [shape: bf16[4,256,1024], index: 3, kind: input, shape index: {}]   ;;  %s8796_s4 = inlined_call_operand.vmem [shape: f32[1,1024], index: 4, kind: input, shape index: {}]   ;;  %s8797_s5 = inlined_call_operand.vmem [shape: bf16[1024,128], index: 5, kind: input, shape index: {}]   ;;  %s8798_s6 = inlined_call_operand.vmem [shape: f32[1,128], index: 6, kind: input, shape index: {}]   ;;  %s8799_s7 = inlined_call_operand.hbm [shape: f32[2,128], index: 7, kind: output, shape index: {}]  }
   0x1   :  { %v6391_v0 = vld [vmem:[%s8793_s1 + $0x4] ss:$8 sps:$4 sm:$0xff]   ;;  %v6393_v1 = vld [vmem:[%s8793_s1] ss:$8 sps:$4 sm:$0xff]   ;;  %v6394_v2 = vld [vmem:[%s8793_s1 + $0x14] ss:$8 sps:$4 sm:$0xff]  }
   0x2   :  { %529 = vmatprep.subr.bf16.mxu0 %v6391_v0  ;;  %v6396_v3 = vld [vmem:[%s8793_s1 + $0x10] ss:$8 sps:$4 sm:$0xff]   ;;  %v6397_v4 = vld [vmem:[%s8793_s1 + $0x24] ss:$8 sps:$4 sm:$0xff]   ;;  %v6399_v5 = vld [vmem:[%s8793_s1 + $0x20] ss:$8 sps:$4 sm:$0xff]  }
   0x3   :  { %530 = vmatpush1.bf16.msra.mxu0 %v6393_v1  ;;  %v6400_v6 = vld [vmem:[%s8793_s1 + $0x34] ss:$8 sps:$4 sm:$0xff]   ;;  %v6402_v7 = vld [vmem:[%s8793_s1 + $0x30] ss:$8 sps:$4 sm:$0xff]   ;;  %v6403_v8 = vld [vmem:[%s8793_s1 + $0x44] ss:$8 sps:$4 sm:$0xff]  }
   0x4   :  { %531 = vmatprep.subr.bf16.mxu0 %v6394_v2  ;;  %v6405_v9 = vld [vmem:[%s8793_s1 + $0x40] ss:$8 sps:$4 sm:$0xff]   ;;  %v6406_v10 = vld [vmem:[%s8793_s1 + $0x54] ss:$8 sps:$4 sm:$0xff]   ;;  %v6408_v11 = vld [vmem:[%s8793_s1 + $0x50] ss:$8 sps:$4 sm:$0xff]  }
   0x5   :  { %v6409_v12 = vld [vmem:[%s8793_s1 + $0x64] ss:$8 sps:$4 sm:$0xff]   ;;  %v6411_v14 = vld [vmem:[%s8793_s1 + $0x60] ss:$8 sps:$4 sm:$0xff]   ;;  %v6412_v15 = vld [vmem:[%s8793_s1 + $0x74] ss:$8 sps:$4 sm:$0xff]  }
   0x6   :  { %v6441_v13 = vld [vmem:[%s8792_s0 + $0x4] ss:$20 sps:$4 sm:$0xff]   ;;  %v6417_v18 = vld [vmem:[%s8793_s1 + $0x80] ss:$8 sps:$4 sm:$0xff]   ;;  %v6418_v19 = vld [vmem:[%s8793_s1 + $0x94] ss:$8 sps:$4 sm:$0xff]  }
   0x7   :  { %532 = vmatpush1.bf16.msra.mxu0 %v6396_v3  ;;  %561 = vmatprep.mubr.bf16.mxu0 %v6441_v13  ;;  %v6414_v16 = vld [vmem:[%s8793_s1 + $0x70] ss:$8 sps:$4 sm:$0xff]   ;;  %v6415_v17 = vld [vmem:[%s8793_s1 + $0x84] ss:$8 sps:$4 sm:$0xff]   ;;  %v6423_v22 = vld [vmem:[%s8793_s1 + $0xa0] ss:$8 sps:$4 sm:$0xff]  }
   0x8   :  { %533 = vmatprep.subr.bf16.mxu0 %v6397_v4  ;;  %v6420_v20 = vld [vmem:[%s8793_s1 + $0x90] ss:$8 sps:$4 sm:$0xff]   ;;  %v6421_v21 = vld [vmem:[%s8793_s1 + $0xa4] ss:$8 sps:$4 sm:$0xff]   ;;  %v6424_v23 = vld [vmem:[%s8793_s1 + $0xb4] ss:$8 sps:$4 sm:$0xff]  }
   0x9   :  { %v6426_v24 = vld [vmem:[%s8793_s1 + $0xb0] ss:$8 sps:$4 sm:$0xff]   ;;  %v6427_v25 = vld [vmem:[%s8793_s1 + $0xc4] ss:$8 sps:$4 sm:$0xff]   ;;  %v6429_v26 = vld [vmem:[%s8793_s1 + $0xc0] ss:$8 sps:$4 sm:$0xff]  }
   0xa   :  { %v6430_v27 = vld [vmem:[%s8793_s1 + $0xd4] ss:$8 sps:$4 sm:$0xff]   ;;  %v6432_v28 = vld [vmem:[%s8793_s1 + $0xd0] ss:$8 sps:$4 sm:$0xff]   ;;  %v6433_v29 = vld [vmem:[%s8793_s1 + $0xe4] ss:$8 sps:$4 sm:$0xff]  }
   0xb   :  { %534 = vmatpush1.bf16.msra.mxu0 %v6399_v5  ;;  %v6435_v30 = vld [vmem:[%s8793_s1 + $0xe0] ss:$8 sps:$4 sm:$0xff]   ;;  %v6436_v33 = vld [vmem:[%s8793_s1 + $0xf4] ss:$8 sps:$4 sm:$0xff]   ;;  %v6438_v41 = vld [vmem:[%s8793_s1 + $0xf0] ss:$8 sps:$4 sm:$0xff]  }
   0xc   :  { %535 = vmatprep.subr.bf16.mxu0 %v6400_v6  ;;  %v5323_v31 = vld [vmem:[%s8795_s3 + $0x400] sm:$0xff]  ;;  %v6447_v50 = vld [vmem:[%s8793_s1 + $0x114] ss:$8 sps:$4 sm:$0xff]   ;;  %v6445_v55 = vld [vmem:[%s8793_s1 + $0x110] ss:$8 sps:$4 sm:$0xff]  }
   0xd   :  { %v5327_v32 = vld [vmem:[%s8795_s3 + $0x420] sm:$0xff]  ;;  %v6486_v57 = vld [vmem:[%s8792_s0 + $0x28] ss:$20 sps:$4 sm:$0xff]   ;;  %v6451_v4 = vld [vmem:[%s8793_s1 + $0x130] ss:$8 sps:$4 sm:$0xff]  }
   0xe   :  { %v5452_v34 = vcombine.high %v5323_v31, %v5327_v32  ;;  %v5451_v35 = vcombine.low %v5323_v31, %v5327_v32  ;;  %v5331_v36 = vld [vmem:[%s8795_s3 + $0x440] sm:$0xff]  ;;  %v6453_v0 = vld [vmem:[%s8793_s1 + $0x134] ss:$8 sps:$4 sm:$0xff]  }
   0xf   :  { %536 = vmatpush1.bf16.msra.mxu0 %v6402_v7  ;;  %v5335_v37 = vld [vmem:[%s8795_s3 + $0x460] sm:$0xff] }
  0x10   :  { %537 = vmatprep.subr.bf16.mxu0 %v6403_v8  ;;  %1615 = vmatprep.subr.bf16.mxu1 %v5452_v34  ;;  %v5460_v38 = vcombine.high %v5331_v36, %v5335_v37  ;;  %v5339_v39 = vld [vmem:[%s8795_s3 + $0x480] sm:$0xff]  ;;  %v5459_v42 = vcombine.low %v5331_v36, %v5335_v37  ;;  %v6471_v34 = vld [vmem:[%s8793_s1 + $0x194] ss:$8 sps:$4 sm:$0xff]   ;;  %v6469_v36 = vld [vmem:[%s8793_s1 + $0x190] ss:$8 sps:$4 sm:$0xff]  }
  0x11   :  { %v5343_v40 = vld [vmem:[%s8795_s3 + $0x4a0] sm:$0xff]  ;;  %1616 = vmatpush1.bf16.msra.mxu1 %v5451_v35 }
  0x12   :  { %v6444_v43 = vld [vmem:[%s8793_s1 + $0x104] ss:$8 sps:$4 sm:$0xff]   ;;  %1617 = vmatprep.subr.bf16.mxu1 %v5460_v38  ;;  %v5468_v44 = vcombine.high %v5339_v39, %v5343_v40  ;;  %v6439_v45 = vld [vmem:[%s8792_s0] ss:$20 sps:$4 sm:$0xff]   ;;  %v5467_v51 = vcombine.low %v5339_v39, %v5343_v40  ;;  %v6475_v40 = vld [vmem:[%s8793_s1 + $0x1b0] ss:$8 sps:$4 sm:$0xff]  }
  0x13   :  { %538 = vmatpush1.bf16.msra.mxu0 %v6405_v9  ;;  %v5347_v46 = vld [vmem:[%s8795_s3 + $0x4c0] sm:$0xff]  ;;  %v6477_v39 = vld [vmem:[%s8793_s1 + $0x1b4] ss:$8 sps:$4 sm:$0xff]  }
  0x14   :  { %539 = vmatprep.subr.bf16.mxu0 %v6406_v10  ;;  %v5351_v47 = vld [vmem:[%s8795_s3 + $0x4e0] sm:$0xff] }
  0x15   :  { %v6442_v48 = vld [vmem:[%s8793_s1 + $0x100] ss:$8 sps:$4 sm:$0xff]   ;;  %1618 = vmatpush1.bf16.msra.mxu1 %v5459_v42  ;;  %v5476_v52 = vcombine.high %v5347_v46, %v5351_v47  ;;  %v6450_v56 = vld [vmem:[%s8793_s1 + $0x124] ss:$8 sps:$4 sm:$0xff]   ;;  %v5475_v58 = vcombine.low %v5347_v46, %v5351_v47 }
  0x16   :  { %v6484_v49 = vld [vmem:[%s8792_s0 + $0x2c] ss:$20 sps:$4 sm:$0xff]   ;;  %1619 = vmatprep.subr.bf16.mxu1 %v5468_v44 }
  0x17   :  { %540 = vmatpush1.bf16.msra.mxu0 %v6408_v11  ;;  %v5355_v53 = vld [vmem:[%s8795_s3 + $0x500] sm:$0xff] }
  0x18   :  { %541 = vmatprep.subr.bf16.mxu0 %v6409_v12  ;;  %v5359_v54 = vld [vmem:[%s8795_s3 + $0x520] sm:$0xff]  ;;  %v6459_v12 = vld [vmem:[%s8793_s1 + $0x154] ss:$8 sps:$4 sm:$0xff]  }
  0x19   :  { %1620 = vmatpush1.bf16.msra.mxu1 %v5467_v51  ;;  %v6448_v59 = vld [vmem:[%s8793_s1 + $0x120] ss:$8 sps:$4 sm:$0xff]   ;;  %v5484_v61 = vcombine.high %v5355_v53, %v5359_v54  ;;  %v5483_v1 = vcombine.low %v5355_v53, %v5359_v54  ;;  %v6456_v6 = vld [vmem:[%s8793_s1 + $0x144] ss:$8 sps:$4 sm:$0xff]  }
  0x1a   :  { %v6495_v60 = vld [vmem:[%s8792_s0 + $0xc] ss:$20 sps:$4 sm:$0xff]   ;;  %1621 = vmatprep.subr.bf16.mxu1 %v5476_v52 }
  0x1b   :  { %542 = vmatpush1.bf16.msra.mxu0 %v6411_v14  ;;  %v5363_v62 = vld [vmem:[%s8795_s3 + $0x540] sm:$0xff] }
  0x1c   :  { %543 = vmatprep.subr.bf16.mxu0 %v6412_v15  ;;  %v5367_v63 = vld [vmem:[%s8795_s3 + $0x560] sm:$0xff] }
  0x1d   :  { %1622 = vmatpush1.bf16.msra.mxu1 %v5475_v58  ;;  %v5371_v2 = vld [vmem:[%s8795_s3 + $0x580] sm:$0xff]  ;;  %v5492_v5 = vcombine.high %v5363_v62, %v5367_v63  ;;  %v5491_v7 = vcombine.low %v5363_v62, %v5367_v63 }
  0x1e   :  { %v5375_v3 = vld [vmem:[%s8795_s3 + $0x5a0] sm:$0xff]  ;;  %1623 = vmatprep.subr.bf16.mxu1 %v5484_v61 }
  0x1f   :  { %544 = vmatpush1.bf16.msra.mxu0 %v6414_v16  ;;  %v5379_v8 = vld [vmem:[%s8795_s3 + $0x5c0] sm:$0xff]  ;;  %v5500_v11 = vcombine.high %v5371_v2, %v5375_v3  ;;  %v5499_v13 = vcombine.low %v5371_v2, %v5375_v3  ;;  %v6457_v16 = vld [vmem:[%s8793_s1 + $0x150] ss:$8 sps:$4 sm:$0xff]  }
  0x20   :  { %545 = vmatprep.subr.bf16.mxu0 %v6415_v17  ;;  %v5383_v9 = vld [vmem:[%s8795_s3 + $0x5e0] sm:$0xff] }
  0x21   :  { %1624 = vmatpush1.bf16.msra.mxu1 %v5483_v1  ;;  %v6454_v10 = vld [vmem:[%s8793_s1 + $0x140] ss:$8 sps:$4 sm:$0xff]   ;;  %v5508_v17 = vcombine.high %v5379_v8, %v5383_v9  ;;  %v6474_v37 = vld [vmem:[%s8793_s1 + $0x1a4] ss:$8 sps:$4 sm:$0xff]  }
  0x22   :  { %1625 = vmatprep.subr.bf16.mxu1 %v5492_v5  ;;  %v5387_v14 = vld [vmem:[%s8795_s3 + $0x600] sm:$0xff] }
  0x23   :  { %546 = vmatpush1.bf16.msra.mxu0 %v6417_v18  ;;  %v5391_v15 = vld [vmem:[%s8795_s3 + $0x620] sm:$0xff] }
  0x24   :  { %547 = vmatprep.subr.bf16.mxu0 %v6418_v19  ;;  %v6462_v18 = vld [vmem:[%s8793_s1 + $0x164] ss:$8 sps:$4 sm:$0xff]   ;;  %v5507_v19 = vcombine.low %v5379_v8, %v5383_v9  ;;  %v6466_v32 = vld [vmem:[%s8793_s1 + $0x180] ss:$8 sps:$4 sm:$0xff]  }
  0x25   :  { %1626 = vmatpush1.bf16.msra.mxu1 %v5491_v7  ;;  %v6472_v38 = vld [vmem:[%s8793_s1 + $0x1a0] ss:$8 sps:$4 sm:$0xff]  }
  0x26   :  { %1627 = vmatprep.subr.bf16.mxu1 %v5500_v11  ;;  %v6478_v42 = vld [vmem:[%s8793_s1 + $0x1c0] ss:$8 sps:$4 sm:$0xff]  }
  0x27   :  { %548 = vmatpush1.bf16.msra.mxu0 %v6420_v20  ;;  %v5395_v20 = vld [vmem:[%s8795_s3 + $0x640] sm:$0xff] }
  0x28   :  { %549 = vmatprep.subr.bf16.mxu0 %v6421_v21  ;;  %v5399_v21 = vld [vmem:[%s8795_s3 + $0x660] sm:$0xff] }
  0x29   :  { %1628 = vmatpush1.bf16.msra.mxu1 %v5499_v13  ;;  %v5523_v31 = vcombine.low %v5395_v20, %v5399_v21 }
  0x2a   :  { %1629 = vmatprep.subr.bf16.mxu1 %v5508_v17 }
  0x2b   :  { %550 = vmatpush1.bf16.msra.mxu0 %v6423_v22  ;;  %v6460_v22 = vld [vmem:[%s8793_s1 + $0x160] ss:$8 sps:$4 sm:$0xff]  }
  0x2c   :  { %551 = vmatprep.subr.bf16.mxu0 %v6424_v23  ;;  %v5516_v23 = vcombine.high %v5387_v14, %v5391_v15 }
  0x2d   :  { %1630 = vmatpush1.bf16.msra.mxu1 %v5507_v19 }
  0x2e   :  { %1631 = vmatprep.subr.bf16.mxu1 %v5516_v23 }
  0x2f   :  { %552 = vmatpush1.bf16.msra.mxu0 %v6426_v24  ;;  %v6465_v24 = vld [vmem:[%s8793_s1 + $0x174] ss:$8 sps:$4 sm:$0xff]  }
  0x30   :  { %553 = vmatprep.subr.bf16.mxu0 %v6427_v25  ;;  %v5515_v25 = vcombine.low %v5387_v14, %v5391_v15 }
  0x32   :  { %1632 = vmatpush1.bf16.msra.mxu1 %v5515_v25 }
  0x33   :  { %554 = vmatpush1.bf16.msra.mxu0 %v6429_v26  ;;  %v5403_v26 = vld [vmem:[%s8795_s3 + $0x680] sm:$0xff] }
  0x34   :  { %555 = vmatprep.subr.bf16.mxu0 %v6430_v27  ;;  %v5407_v27 = vld [vmem:[%s8795_s3 + $0x6a0] sm:$0xff] }
  0x35   :  { %v5531_v35 = vcombine.low %v5403_v26, %v5407_v27 }
  0x37   :  { %556 = vmatpush1.bf16.msra.mxu0 %v6432_v28  ;;  %v6463_v28 = vld [vmem:[%s8793_s1 + $0x170] ss:$8 sps:$4 sm:$0xff]  }
  0x38   :  { %557 = vmatprep.subr.bf16.mxu0 %v6433_v29  ;;  %v5524_v29 = vcombine.high %v5395_v20, %v5399_v21 }
  0x3a   :  { %1633 = vmatprep.subr.bf16.mxu1 %v5524_v29 }
  0x3b   :  { %558 = vmatpush1.bf16.msra.mxu0 %v6435_v30  ;;  %v6468_v30 = vld [vmem:[%s8793_s1 + $0x184] ss:$8 sps:$4 sm:$0xff]   ;;  %1634 = vmatpush1.bf16.msra.mxu1 %v5523_v31 }
  0x3c   :  { %559 = vmatprep.subr.bf16.mxu0 %v6436_v33  ;;  %v5532_v33 = vcombine.high %v5403_v26, %v5407_v27 }
  0x3e   :  { %1635 = vmatprep.subr.bf16.mxu1 %v5532_v33 }
  0x3f   :  { %560 = vmatpush1.bf16.msra.mxu0 %v6438_v41  ;;  %1636 = vmatpush1.bf16.msra.mxu1 %v5531_v35  ;;  %v6480_v41 = vld [vmem:[%s8793_s1 + $0x1c4] ss:$8 sps:$4 sm:$0xff]  }
  0x40   :  { %582 = vmatprep.subr.bf16.mxu0 %v6444_v43  ;;  %v6483_v43 = vld [vmem:[%s8793_s1 + $0x1d4] ss:$8 sps:$4 sm:$0xff]  }
  0x42   :  { %562 = vmatmul.mubr.bf16.vlgmr.msra.gmra.mrb[0].mxu0 %v6439_v45 }
  0x43   :  { %583 = vmatpush1.bf16.msra.mxu0 %v6442_v48  ;;  %571 = vmatprep.mubr.bf16.mxu0 %v6484_v49 }
  0x44   :  { %584 = vmatprep.subr.bf16.mxu0 %v6447_v50 }
  0x47   :  { %585 = vmatpush1.bf16.msra.mxu0 %v6445_v55 }
  0x48   :  { %586 = vmatprep.subr.bf16.mxu0 %v6450_v56 }
  0x4a   :  { %572 = vmatmul.mubr.bf16.gmra.mrb[4].mxu0 %v6486_v57 }
  0x4b   :  { %587 = vmatpush1.bf16.msra.mxu0 %v6448_v59  ;;  %614 = vmatprep.mubr.bf16.mxu0 %v6495_v60 }
  0x4c   :  { %588 = vmatprep.subr.bf16.mxu0 %v6453_v0 }
  0x4f   :  { %589 = vmatpush1.bf16.msra.mxu0 %v6451_v4 }
  0x50   :  { %590 = vmatprep.subr.bf16.mxu0 %v6456_v6 }
  0x53   :  { %591 = vmatpush1.bf16.msra.mxu0 %v6454_v10 }
  0x54   :  { %592 = vmatprep.subr.bf16.mxu0 %v6459_v12 }
  0x57   :  { %593 = vmatpush1.bf16.msra.mxu0 %v6457_v16 }
  0x58   :  { %594 = vmatprep.subr.bf16.mxu0 %v6462_v18 }
  0x5b   :  { %595 = vmatpush1.bf16.msra.mxu0 %v6460_v22 }
  0x5c   :  { %596 = vmatprep.subr.bf16.mxu0 %v6465_v24 }
  0x5f   :  { %597 = vmatpush1.bf16.msra.mxu0 %v6463_v28 }
  0x60   :  { %598 = vmatprep.subr.bf16.mxu0 %v6468_v30 }
  0x63   :  { %599 = vmatpush1.bf16.msra.mxu0 %v6466_v32 }
  0x64   :  { %600 = vmatprep.subr.bf16.mxu0 %v6471_v34 }
  0x67   :  { %601 = vmatpush1.bf16.msra.mxu0 %v6469_v36 }
  0x68   :  { %602 = vmatprep.subr.bf16.mxu0 %v6474_v37 }
  0x6b   :  { %603 = vmatpush1.bf16.msra.mxu0 %v6472_v38 }
  0x6c   :  { %604 = vmatprep.subr.bf16.mxu0 %v6477_v39 }
  0x6f   :  { %605 = vmatpush1.bf16.msra.mxu0 %v6475_v40 }
  0x70   :  { %606 = vmatprep.subr.bf16.mxu0 %v6480_v41 }
  0x71   :  { %12 = vsyncpa [#allocation3], 0  ;;  %v6481_v44 = vld [vmem:[%s8793_s1 + $0x1d0] ss:$8 sps:$4 sm:$0xff]   ;;  %v6489_v45 = vld [vmem:[%s8793_s1 + $0x1e4] ss:$8 sps:$4 sm:$0xff]  }
  0x72   :  { %v6487_v46 = vld [vmem:[%s8793_s1 + $0x1e0] ss:$8 sps:$4 sm:$0xff]   ;;  %v6492_v47 = vld [vmem:[%s8793_s1 + $0x1f4] ss:$8 sps:$4 sm:$0xff]   ;;  %v6490_v48 = vld [vmem:[%s8793_s1 + $0x1f0] ss:$8 sps:$4 sm:$0xff]  }
  0x73   :  { %607 = vmatpush1.bf16.msra.mxu0 %v6478_v42  ;;  %v6498_v49 = vld [vmem:[%s8793_s1 + $0x204] ss:$8 sps:$4 sm:$0xff]   ;;  %v6493_v50 = vld [vmem:[%s8792_s0 + $0x8] ss:$20 sps:$4 sm:$0xff]   ;;  %v6499_v54 = vld [vmem:[%s8793_s1 + $0x210] ss:$8 sps:$4 sm:$0xff]  }
  0x74   :  { %608 = vmatprep.subr.bf16.mxu0 %v6483_v43  ;;  %v6496_v51 = vld [vmem:[%s8793_s1 + $0x200] ss:$8 sps:$4 sm:$0xff]   ;;  %v6501_v53 = vld [vmem:[%s8793_s1 + $0x214] ss:$8 sps:$4 sm:$0xff]   ;;  %v6507_v55 = vld [vmem:[%s8793_s1 + $0x224] ss:$8 sps:$4 sm:$0xff]  }
  0x75   :  { %v6502_v52 = vld [vmem:[%s8792_s0 + $0x34] ss:$20 sps:$4 sm:$0xff]   ;;  %v6504_v56 = vld [vmem:[%s8792_s0 + $0x30] ss:$20 sps:$4 sm:$0xff]   ;;  %v5326_v59 = vld [vmem:[%s8795_s3 + $0x418] sm:$0xff]  ;;  %v6605_v62 = vmov 0  }
  0x76   :  { %v6505_v57 = vld [vmem:[%s8793_s1 + $0x220] ss:$8 sps:$4 sm:$0xff]   ;;  %v6510_v58 = vld [vmem:[%s8793_s1 + $0x234] ss:$8 sps:$4 sm:$0xff]   ;;  %v6508_v61 = vld [vmem:[%s8793_s1 + $0x230] ss:$8 sps:$4 sm:$0xff]  }
  0x77   :  { %609 = vmatpush1.bf16.msra.mxu0 %v6481_v44  ;;  %v5330_v60 = vld [vmem:[%s8795_s3 + $0x438] sm:$0xff]  ;;  %v6511_v2 = vld [vmem:[%s8792_s0 + $0x10] ss:$20 sps:$4 sm:$0xff]   ;;  %vm522_vm0 = vcmask 523264   ;;  %s6606_s18 = smov [#allocation2]  }
  0x78   :  { %610 = vmatprep.subr.bf16.mxu0 %v6489_v45  ;;  %v5458_v63 = vcombine.high %v5326_v59, %v5330_v60  ;;  %v5334_v0 = vld [vmem:[%s8795_s3 + $0x458] sm:$0xff]  ;;  %v5457_v3 = vcombine.low %v5326_v59, %v5330_v60  ;;  %v5411_v43 = vld [vmem:[%s8795_s3 + $0x6c0] sm:$0xff] }
  0x79   :  { %v5338_v1 = vld [vmem:[%s8795_s3 + $0x478] sm:$0xff]  ;;  %v5415_v44 = vld [vmem:[%s8795_s3 + $0x6e0] sm:$0xff] }
  0x7a   :  { %v5466_v4 = vcombine.high %v5334_v0, %v5338_v1  ;;  %v5342_v5 = vld [vmem:[%s8795_s3 + $0x498] sm:$0xff]  ;;  %v5465_v7 = vcombine.low %v5334_v0, %v5338_v1  ;;  %v5427_v59 = vld [vmem:[%s8795_s3 + $0x740] sm:$0xff] }
  0x7b   :  { %611 = vmatpush1.bf16.msra.mxu0 %v6487_v46  ;;  %v5346_v6 = vld [vmem:[%s8795_s3 + $0x4b8] sm:$0xff]  ;;  %v5540_v46 = vcombine.high %v5411_v43, %v5415_v44  ;;  %v5431_v60 = vld [vmem:[%s8795_s3 + $0x760] sm:$0xff] }
  0x7c   :  { %612 = vmatprep.subr.bf16.mxu0 %v6492_v47  ;;  %v5474_v8 = vcombine.high %v5342_v5, %v5346_v6  ;;  %v5350_v9 = vld [vmem:[%s8795_s3 + $0x4d8] sm:$0xff]  ;;  %v5473_v12 = vcombine.low %v5342_v5, %v5346_v6 }
  0x7d   :  { %v5354_v10 = vld [vmem:[%s8795_s3 + $0x4f8] sm:$0xff]  ;;  %1637 = vmatprep.subr.bf16.mxu1 %v5540_v46 }
  0x7e   :  { %v6512_v11 = vld [vmem:[%s8792_s0 + $0x38] ss:$20 sps:$4 sm:$0xff]   ;;  %v5482_v13 = vcombine.high %v5350_v9, %v5354_v10  ;;  %v5481_v16 = vcombine.low %v5350_v9, %v5354_v10 }
  0x7f   :  { %613 = vmatpush1.bf16.msra.mxu0 %v6490_v48  ;;  %v5358_v14 = vld [vmem:[%s8795_s3 + $0x518] sm:$0xff] }
  0x80   :  { %635 = vmatprep.subr.bf16.mxu0 %v6498_v49  ;;  %v5362_v15 = vld [vmem:[%s8795_s3 + $0x538] sm:$0xff] }
  0x81   :  { %v5490_v17 = vcombine.high %v5358_v14, %v5362_v15  ;;  %v5366_v18 = vld [vmem:[%s8795_s3 + $0x558] sm:$0xff]  ;;  %v5489_v20 = vcombine.low %v5358_v14, %v5362_v15 }
  0x82   :  { %615 = vmatmul.mubr.bf16.vlgmr.msra.gmra.mrb[0].mxu0 %v6493_v50  ;;  %v5370_v19 = vld [vmem:[%s8795_s3 + $0x578] sm:$0xff]  ;;  %v5539_v50 = vcombine.low %v5411_v43, %v5415_v44 }
  0x83   :  { %636 = vmatpush1.bf16.msra.mxu0 %v6496_v51  ;;  %624 = vmatprep.mubr.bf16.mxu0 %v6502_v52  ;;  %v5498_v21 = vcombine.high %v5366_v18, %v5370_v19  ;;  %v5374_v22 = vld [vmem:[%s8795_s3 + $0x598] sm:$0xff]  ;;  %v5497_v24 = vcombine.low %v5366_v18, %v5370_v19  ;;  %v5419_v51 = vld [vmem:[%s8795_s3 + $0x700] sm:$0xff]  ;;  %v5324_v19 = vld [vmem:[%s8795_s3 + $0x408] sm:$0xff] }
  0x84   :  { %637 = vmatprep.subr.bf16.mxu0 %v6501_v53  ;;  %v5378_v23 = vld [vmem:[%s8795_s3 + $0x5b8] sm:$0xff]  ;;  %1638 = vmatpush1.bf16.msra.mxu1 %v5539_v50  ;;  %v5423_v52 = vld [vmem:[%s8795_s3 + $0x720] sm:$0xff] }
  0x85   :  { %v5506_v25 = vcombine.high %v5374_v22, %v5378_v23  ;;  %v5382_v26 = vld [vmem:[%s8795_s3 + $0x5d8] sm:$0xff]  ;;  %v5505_v28 = vcombine.low %v5374_v22, %v5378_v23  ;;  %v717_v23 = vld [vmem:[%s8795_s3 + $0x28] sm:$0xff] }
  0x86   :  { %v5386_v27 = vld [vmem:[%s8795_s3 + $0x5f8] sm:$0xff] }
  0x87   :  { %638 = vmatpush1.bf16.msra.mxu0 %v6499_v54  ;;  %v5514_v29 = vcombine.high %v5382_v26, %v5386_v27  ;;  %v5390_v30 = vld [vmem:[%s8795_s3 + $0x618] sm:$0xff]  ;;  %v5513_v32 = vcombine.low %v5382_v26, %v5386_v27  ;;  %v5548_v54 = vcombine.high %v5419_v51, %v5423_v52  ;;  %v696_v27 = vlaneseq }
  0x88   :  { %639 = vmatprep.subr.bf16.mxu0 %v6507_v55  ;;  %v5394_v31 = vld [vmem:[%s8795_s3 + $0x638] sm:$0xff] }
  0x89   :  { %v5522_v33 = vcombine.high %v5390_v30, %v5394_v31  ;;  %v5398_v34 = vld [vmem:[%s8795_s3 + $0x658] sm:$0xff]  ;;  %v5521_v36 = vcombine.low %v5390_v30, %v5394_v31  ;;  %1639 = vmatprep.subr.bf16.mxu1 %v5548_v54  ;;  %v7099_v30 = vshrl.u32 %v696_v27, 7  ;;  %v5332_v54 = vld [vmem:[%s8795_s3 + $0x448] sm:$0xff] }
  0x8a   :  { %625 = vmatmul.mubr.bf16.gmra.mrb[4].mxu0 %v6504_v56  ;;  %v5402_v35 = vld [vmem:[%s8795_s3 + $0x678] sm:$0xff]  ;;  %v5547_v56 = vcombine.low %v5419_v51, %v5423_v52 }
  0x8b   :  { %640 = vmatpush1.bf16.msra.mxu0 %v6505_v57  ;;  %667 = vmatprep.mubr.bf16.mxu0 %v6605_v62  ;;  %v5530_v37 = vcombine.high %v5398_v34, %v5402_v35  ;;  %v5406_v38 = vld [vmem:[%s8795_s3 + $0x698] sm:$0xff]  ;;  %v5529_v40 = vcombine.low %v5398_v34, %v5402_v35  ;;  %v698_v35 = vsub.s32 0, %v7099_v30 }
  0x8c   :  { %641 = vmatprep.subr.bf16.mxu0 %v6510_v58  ;;  %v5410_v39 = vld [vmem:[%s8795_s3 + $0x6b8] sm:$0xff]  ;;  %1640 = vmatpush1.bf16.msra.mxu1 %v5547_v56  ;;  %v721_v56 = vld [vmem:[%s8795_s3 + $0x48] sm:$0xff] }
  0x8d   :  { %v5538_v41 = vcombine.high %v5406_v38, %v5410_v39  ;;  %v5537_v42 = vcombine.low %v5406_v38, %v5410_v39  ;;  %v5414_v45 = vld [vmem:[%s8795_s3 + $0x6d8] sm:$0xff] }
  0x8e   :  { %v5418_v47 = vld [vmem:[%s8795_s3 + $0x6f8] sm:$0xff] }
  0x8f   :  { %642 = vmatpush1.bf16.msra.mxu0 %v6508_v61  ;;  %v5545_v48 = vcombine.low %v5414_v45, %v5418_v47  ;;  %v5546_v49 = vcombine.high %v5414_v45, %v5418_v47  ;;  %v5422_v53 = vld [vmem:[%s8795_s3 + $0x718] sm:$0xff] }
  0x90   :  { %1738 = vmatprep.subr.bf16.mxu0 %v5458_v63  ;;  %v5426_v55 = vld [vmem:[%s8795_s3 + $0x738] sm:$0xff] }
  0x91   :  { %v5553_v57 = vcombine.low %v5422_v53, %v5426_v55  ;;  %v5554_v58 = vcombine.high %v5422_v53, %v5426_v55  ;;  %v5430_v61 = vld [vmem:[%s8795_s3 + $0x758] sm:$0xff]  ;;  %v5336_v55 = vld [vmem:[%s8795_s3 + $0x468] sm:$0xff] }
  0x92   :  { %5321 = vmatmul.mubr.msk.bf16.vlgmr.msra.gmra.mrb[0].mxu0 %vm522_vm0, %v6511_v2  ;;  %v5434_v63 = vld [vmem:[%s8795_s3 + $0x778] sm:$0xff]  ;;  %v5555_v2 = vcombine.low %v5427_v59, %v5431_v60 }
  0x93   :  { %677 = vmatprep.mubr.bf16.mxu0 %v6605_v62  ;;  %1739 = vmatpush1.bf16.msra.mxu0 %v5457_v3  ;;  %v5556_v62 = vcombine.high %v5427_v59, %v5431_v60  ;;  %v5561_v0 = vcombine.low %v5430_v61, %v5434_v63  ;;  %v5562_v1 = vcombine.high %v5430_v61, %v5434_v63  ;;  %v5435_v3 = vld [vmem:[%s8795_s3 + $0x780] sm:$0xff]  ;;  %v5438_v5 = vld [vmem:[%s8795_s3 + $0x798] sm:$0xff]  ;;  %v5340_v60 = vld [vmem:[%s8795_s3 + $0x488] sm:$0xff] }
  0x94   :  { %1740 = vmatprep.subr.bf16.mxu0 %v5466_v4  ;;  %v5439_v4 = vld [vmem:[%s8795_s3 + $0x7a0] sm:$0xff]  ;;  %v5450_v15 = vld [vmem:[%s8795_s3 + $0x7f8] sm:$0xff]  ;;  %v5462_v61 = vcombine.high %v5332_v54, %v5336_v55  ;;  %v5344_v63 = vld [vmem:[%s8795_s3 + $0x4a8] sm:$0xff] }
  0x95   :  { %1641 = vmatprep.subr.bf16.mxu1 %v5556_v62  ;;  %v5564_v6 = vcombine.high %v5435_v3, %v5439_v4  ;;  %v5563_v10 = vcombine.low %v5435_v3, %v5439_v4  ;;  %v5470_v4 = vcombine.high %v5340_v60, %v5344_v63 }
  0x96   :  { %1642 = vmatpush1.bf16.msra.mxu1 %v5555_v2  ;;  %v5461_v2 = vcombine.low %v5332_v54, %v5336_v55  ;;  %v781_v54 = vld [vmem:[%s8795_s3 + $0x228] sm:$0xff] }
  0x97   :  { %1741 = vmatpush1.bf16.msra.mxu0 %v5465_v7  ;;  %v5442_v7 = vld [vmem:[%s8795_s3 + $0x7b8] sm:$0xff]  ;;  %1643 = vmatprep.subr.bf16.mxu1 %v5564_v6  ;;  %v5348_v6 = vld [vmem:[%s8795_s3 + $0x4c8] sm:$0xff] }
  0x98   :  { %1742 = vmatprep.subr.bf16.mxu0 %v5474_v8  ;;  %v5569_v8 = vcombine.low %v5438_v5, %v5442_v7  ;;  %v5570_v9 = vcombine.high %v5438_v5, %v5442_v7  ;;  %v5352_v7 = vld [vmem:[%s8795_s3 + $0x4e8] sm:$0xff] }
  0x9a   :  { %5322 = vmatmul.mubr.msk.bf16.gmra.mrb[4].mxu0 %vm522_vm0, %v6512_v11  ;;  %1644 = vmatpush1.bf16.msra.mxu1 %v5563_v10  ;;  %v5443_v11 = vld [vmem:[%s8795_s3 + $0x7c0] sm:$0xff]  ;;  %v5469_v10 = vcombine.low %v5340_v60, %v5344_v63  ;;  %v785_v63 = vld [vmem:[%s8795_s3 + $0x248] sm:$0xff] }
  0x9b   :  { %1743 = vmatpush1.bf16.msra.mxu0 %v5473_v12  ;;  %v5447_v12 = vld [vmem:[%s8795_s3 + $0x7e0] sm:$0xff] }
  0x9c   :  { %1744 = vmatprep.subr.bf16.mxu0 %v5482_v13  ;;  %v5446_v13 = vld [vmem:[%s8795_s3 + $0x7d8] sm:$0xff]  ;;  %v5572_v14 = vcombine.high %v5443_v11, %v5447_v12  ;;  %v5571_v18 = vcombine.low %v5443_v11, %v5447_v12  ;;  %v5478_v12 = vcombine.high %v5348_v6, %v5352_v7 }
  0x9e   :  { %1645 = vmatprep.subr.bf16.mxu1 %v5572_v14  ;;  %v5356_v14 = vld [vmem:[%s8795_s3 + $0x508] sm:$0xff] }
  0x9f   :  { %1745 = vmatpush1.bf16.msra.mxu0 %v5481_v16  ;;  %v5577_v16 = vcombine.low %v5446_v13, %v5450_v15  ;;  %1646 = vmatpush1.bf16.msra.mxu1 %v5571_v18  ;;  %v5477_v18 = vcombine.low %v5348_v6, %v5352_v7  ;;  %v5408_v6 = vld [vmem:[%s8795_s3 + $0x6a8] sm:$0xff] }
  0xa0   :  { %1746 = vmatprep.subr.bf16.mxu0 %v5490_v17  ;;  %v5578_v17 = vcombine.high %v5446_v13, %v5450_v15  ;;  %v5360_v15 = vld [vmem:[%s8795_s3 + $0x528] sm:$0xff] }
  0xa1   :  { %v793_v7 = vld [vmem:[%s8795_s3 + $0x288] sm:$0xff] }
  0xa3   :  { %1747 = vmatpush1.bf16.msra.mxu0 %v5489_v20  ;;  %v5328_v20 = vld [vmem:[%s8795_s3 + $0x428] sm:$0xff] }
  0xa4   :  { %1748 = vmatprep.subr.bf16.mxu0 %v5498_v21  ;;  %v713_v21 = vld [vmem:[%s8795_s3 + $0x8] sm:$0xff]  ;;  %v5454_v22 = vcombine.high %v5324_v19, %v5328_v20 }
  0xa5   :  { %v5582_v26 = vcombine.high %v713_v21, %v717_v23 }
  0xa6   :  { %1656 = vmatprep.subr.bf16.mxu1 %v5454_v22  ;;  %v5364_v22 = vld [vmem:[%s8795_s3 + $0x548] sm:$0xff] }
  0xa7   :  { %1749 = vmatpush1.bf16.msra.mxu0 %v5497_v24  ;;  %v5453_v24 = vcombine.low %v5324_v19, %v5328_v20  ;;  %v5486_v20 = vcombine.high %v5356_v14, %v5360_v15 }
  0xa8   :  { %1750 = vmatprep.subr.bf16.mxu0 %v5506_v25  ;;  %v5581_v25 = vcombine.low %v713_v21, %v717_v23  ;;  %v5368_v23 = vld [vmem:[%s8795_s3 + $0x568] sm:$0xff] }
  0xab   :  { %1751 = vmatpush1.bf16.msra.mxu0 %v5505_v28 }
  0xac   :  { %1752 = vmatprep.subr.bf16.mxu0 %v5514_v29 }
  0xaf   :  { %1753 = vmatpush1.bf16.msra.mxu0 %v5513_v32 }
  0xb0   :  { %1754 = vmatprep.subr.bf16.mxu0 %v5522_v33 }
  0xb3   :  { %1755 = vmatpush1.bf16.msra.mxu0 %v5521_v36  ;;  %v694_v36 = vld [vmem:[%s8794_s2] sm:$0x3] }
  0xb4   :  { %1756 = vmatprep.subr.bf16.mxu0 %v5530_v37  ;;  %v702_v37 = vsub.s32 1, %v7099_v30 }
  0xb6   :  { %v703_v44 = vrot.slane %v694_v36, %v702_v37 }
  0xb7   :  { %1757 = vmatpush1.bf16.msra.mxu0 %v5529_v40 }
  0xb8   :  { %1758 = vmatprep.subr.bf16.mxu0 %v5538_v41  ;;  %v699_v41 = vrot.slane %v694_v36, %v698_v35  ;;  %v5493_v36 = vcombine.low %v5364_v22, %v5368_v23 }
  0xbb   :  { %1759 = vmatpush1.bf16.msra.mxu0 %v5537_v42 }
  0xbc   :  { %1760 = vmatprep.subr.bf16.mxu0 %v5546_v49 }
  0xbf   :  { %1761 = vmatpush1.bf16.msra.mxu0 %v5545_v48 }
  0xc0   :  { %1762 = vmatprep.subr.bf16.mxu0 %v5554_v58 }
  0xc3   :  { %1763 = vmatpush1.bf16.msra.mxu0 %v5553_v57  ;;  %v725_v57 = vld [vmem:[%s8795_s3 + $0x68] sm:$0xff] }
  0xc4   :  { %1764 = vmatprep.subr.bf16.mxu0 %v5562_v1  ;;  %v5590_v62 = vcombine.high %v721_v56, %v725_v57  ;;  %v733_v1 = vld [vmem:[%s8795_s3 + $0xa8] sm:$0xff]  ;;  %v5589_v3 = vcombine.low %v721_v56, %v725_v57 }
  0xc7   :  { %1765 = vmatpush1.bf16.msra.mxu0 %v5561_v0  ;;  %v729_v0 = vld [vmem:[%s8795_s3 + $0x88] sm:$0xff] }
  0xc8   :  { %1766 = vmatprep.subr.bf16.mxu0 %v5570_v9  ;;  %v5598_v5 = vcombine.high %v729_v0, %v733_v1  ;;  %v741_v9 = vld [vmem:[%s8795_s3 + $0xe8] sm:$0xff]  ;;  %v5597_v11 = vcombine.low %v729_v0, %v733_v1 }
  0xc9   :  { %v789_v0 = vld [vmem:[%s8795_s3 + $0x268] sm:$0xff] }
  0xcb   :  { %1767 = vmatpush1.bf16.msra.mxu0 %v5569_v8  ;;  %v737_v8 = vld [vmem:[%s8795_s3 + $0xc8] sm:$0xff] }
  0xcc   :  { %1768 = vmatprep.subr.bf16.mxu0 %v5578_v17  ;;  %v5606_v13 = vcombine.high %v737_v8, %v741_v9  ;;  %v749_v17 = vld [vmem:[%s8795_s3 + $0x128] sm:$0xff]  ;;  %v5605_v19 = vcombine.low %v737_v8, %v741_v9 }
  0xcd   :  { %v797_v8 = vld [vmem:[%s8795_s3 + $0x2a8] sm:$0xff] }
  0xcf   :  { %1769 = vmatpush1.bf16.msra.mxu0 %v5577_v16  ;;  %v745_v16 = vld [vmem:[%s8795_s3 + $0x108] sm:$0xff] }
  0xd0   :  { %2460 = vmatprep.subr.bf16.mxu0 %v5582_v26  ;;  %v5614_v21 = vcombine.high %v745_v16, %v749_v17  ;;  %v5485_v26 = vcombine.low %v5356_v14, %v5360_v15  ;;  %v5613_v27 = vcombine.low %v745_v16, %v749_v17  ;;  %v5416_v14 = vld [vmem:[%s8795_s3 + $0x6e8] sm:$0xff] }
  0xd1   :  { %v801_v15 = vld [vmem:[%s8795_s3 + $0x2c8] sm:$0xff] }
  0xd2   :  { %v805_v16 = vld [vmem:[%s8795_s3 + $0x2e8] sm:$0xff] }
 0x165   :  { %v669_v28 = vpop.f32.mrb[0].mxu0 }
 0x166   :  { %v671_v29 = vpop.f32.mrb[1].mxu0 }
 0x167   :  { %v673_v31 = vpop.f32.mrb[2].mxu0 }
 0x168   :  { %v688_v32 = vmax.f32 %v669_v28, %v673_v31  ;;  %v675_v33 = vpop.f32.mrb[3].mxu0  ;;  %v5494_v28 = vcombine.high %v5364_v22, %v5368_v23  ;;  %v5372_v31 = vld [vmem:[%s8795_s3 + $0x588] sm:$0xff] }
 0x169   :  { %v689_v34 = vmax.f32 %v671_v29, %v675_v33  ;;  %v761_v33 = vld [vmem:[%s8795_s3 + $0x188] sm:$0xff] }
 0x16a   :  { %v5424_v22 = vld [vmem:[%s8795_s3 + $0x728] sm:$0xff] }
 0x16b   :  { %v809_v23 = vld [vmem:[%s8795_s3 + $0x308] sm:$0xff] }
 0x16d   :  { %v679_v38 = vpop.f32.mrb[4].mxu0 }
 0x16e   :  { %v690_v39 = vmax.f32 %v688_v32, %v679_v38  ;;  %v681_v40 = vpop.f32.mrb[5].mxu0  ;;  %v5376_v32 = vld [vmem:[%s8795_s3 + $0x5a8] sm:$0xff] }
 0x16f   :  { %v691_v42 = vmax.f32 %v689_v34, %v681_v40  ;;  %v683_v43 = vpop.f32.mrb[6].mxu0  ;;  %v765_v34 = vld [vmem:[%s8795_s3 + $0x1a8] sm:$0xff] }
 0x170   :  { %v692_v45 = vmax.f32 %v690_v39, %v683_v43  ;;  %v685_v46 = vpop.f32.mrb[7].mxu0  ;;  %v5502_v39 = vcombine.high %v5372_v31, %v5376_v32  ;;  %v5630_v40 = vcombine.high %v761_v33, %v765_v34  ;;  %v769_v43 = vld [vmem:[%s8795_s3 + $0x1c8] sm:$0xff] }
 0x171   :  { %v693_v47 = vmax.f32 %v691_v42, %v685_v46  ;;  %v5384_v42 = vld [vmem:[%s8795_s3 + $0x5e8] sm:$0xff]  ;;  %v5629_v46 = vcombine.low %v761_v33, %v765_v34 }
 0x172   :  { %v706_v48 = vadd.f32 %v699_v41, %v692_v45  ;;  %v5380_v41 = vld [vmem:[%s8795_s3 + $0x5c8] sm:$0xff]  ;;  %v5501_v45 = vcombine.low %v5372_v31, %v5376_v32 }
 0x173   :  { %v707_v49 = vadd.f32 %v703_v44, %v693_v47  ;;  %v773_v44 = vld [vmem:[%s8795_s3 + $0x1e8] sm:$0xff]  ;;  %v5510_v47 = vcombine.high %v5380_v41, %v5384_v42  ;;  %v5509_v55 = vcombine.low %v5380_v41, %v5384_v42 }
 0x174   :  { %v708_v50 = vmax.f32 %v706_v48, 0.0  ;;  %v5638_v48 = vcombine.high %v769_v43, %v773_v44  ;;  %v5637_v56 = vcombine.low %v769_v43, %v773_v44  ;;  %v5432_v31 = vld [vmem:[%s8795_s3 + $0x768] sm:$0xff] }
 0x175   :  { %v709_v51 = vmax.f32 %v707_v49, 0.0  ;;  %v5388_v49 = vld [vmem:[%s8795_s3 + $0x608] sm:$0xff] }
 0x176   :  { %v7110_v52 = vpack.c.bf16 %v708_v50, %v708_v50  ;;  %v5392_v50 = vld [vmem:[%s8795_s3 + $0x628] sm:$0xff] }
 0x177   :  { %v7112_v53 = vpack.c.bf16 %v709_v51, %v709_v51  ;;  %v777_v51 = vld [vmem:[%s8795_s3 + $0x208] sm:$0xff]  ;;  %v5518_v57 = vcombine.high %v5388_v49, %v5392_v50  ;;  %v5517_v1 = vcombine.low %v5388_v49, %v5392_v50 }
 0x178   :  { %v7130_v59 = vrot.slane %v7110_v52, 1  ;;  %v5646_v60 = vcombine.high %v777_v51, %v781_v54  ;;  %v817_v32 = vld [vmem:[%s8795_s3 + $0x348] sm:$0xff] }
 0x179   :  { %v7127_v58 = vrot.slane %v7112_v53, 1  ;;  %v821_v33 = vld [vmem:[%s8795_s3 + $0x368] sm:$0xff] }
 0x17a   :  { %v5440_v41 = vld [vmem:[%s8795_s3 + $0x7a8] sm:$0xff] }
 0x17b   :  { %1647 = vmatprep.mubr.bf16.mxu1 %v7127_v58  ;;  %1770 = vmatprep.mubr.bf16.mxu0 %v7127_v58  ;;  %v825_v42 = vld [vmem:[%s8795_s3 + $0x388] sm:$0xff] }
 0x17c   :  { %1648 = vmatmul.mubr.bf16.vlgmr.msra.gmra.mrb[0].mxu1 %v7130_v59  ;;  %1771 = vmatmul.mubr.bf16.vlgmr.msra.gmra.mrb[8].mxu0 %v7130_v59  ;;  %v829_v43 = vld [vmem:[%s8795_s3 + $0x3a8] sm:$0xff] }
 0x17d   :  { %1657 = vmatpush1.bf16.msra.mxu1 %v5453_v24  ;;  %2461 = vmatpush1.bf16.msra.mxu0 %v5581_v25  ;;  %v753_v24 = vld [vmem:[%s8795_s3 + $0x148] sm:$0xff] }
 0x17e   :  { %1688 = vmatprep.mubr.bf16.mxu1 %v7127_v58  ;;  %2492 = vmatprep.mubr.bf16.mxu0 %v7112_v53  ;;  %v757_v25 = vld [vmem:[%s8795_s3 + $0x168] sm:$0xff] }
 0x17f   :  { %1658 = vmatprep.subr.bf16.mxu1 %v5462_v61  ;;  %2462 = vmatprep.subr.bf16.mxu0 %v5590_v62  ;;  %v5622_v29 = vcombine.high %v753_v24, %v757_v25  ;;  %v5621_v38 = vcombine.low %v753_v24, %v757_v25  ;;  %v5396_v61 = vld [vmem:[%s8795_s3 + $0x648] sm:$0xff] }
 0x180   :  { %v5400_v62 = vld [vmem:[%s8795_s3 + $0x668] sm:$0xff] }
 0x181   :  { %1659 = vmatpush1.bf16.msra.mxu1 %v5461_v2  ;;  %2463 = vmatpush1.bf16.msra.mxu0 %v5589_v3  ;;  %v5645_v2 = vcombine.low %v777_v51, %v781_v54  ;;  %v5526_v3 = vcombine.high %v5396_v61, %v5400_v62  ;;  %v5525_v9 = vcombine.low %v5396_v61, %v5400_v62  ;;  %v813_v24 = vld [vmem:[%s8795_s3 + $0x328] sm:$0xff]  ;;  %v5329_v61 = vld [vmem:[%s8795_s3 + $0x430] sm:$0xff]  ;;  %v715_v62 = vld [vmem:[%s8795_s3 + $0x18] sm:$0xff] }
 0x182   :  { %1660 = vmatprep.subr.bf16.mxu1 %v5470_v4  ;;  %2464 = vmatprep.subr.bf16.mxu0 %v5598_v5  ;;  %v5654_v4 = vcombine.high %v785_v63, %v789_v0  ;;  %v5404_v5 = vld [vmem:[%s8795_s3 + $0x688] sm:$0xff] }
 0x183   :  { %v5533_v17 = vcombine.low %v5404_v5, %v5408_v6  ;;  %v5448_v49 = vld [vmem:[%s8795_s3 + $0x7e8] sm:$0xff] }
 0x184   :  { %v833_v50 = vld [vmem:[%s8795_s3 + $0x3c8] sm:$0xff] }
 0x185   :  { %1661 = vmatpush1.bf16.msra.mxu1 %v5469_v10  ;;  %2465 = vmatpush1.bf16.msra.mxu0 %v5597_v11  ;;  %v5653_v10 = vcombine.low %v785_v63, %v789_v0  ;;  %v5534_v11 = vcombine.high %v5404_v5, %v5408_v6  ;;  %v837_v51 = vld [vmem:[%s8795_s3 + $0x3e8] sm:$0xff]  ;;  %v719_v63 = vld [vmem:[%s8795_s3 + $0x38] sm:$0xff]  ;;  %v5337_v5 = vld [vmem:[%s8795_s3 + $0x470] sm:$0xff] }
 0x186   :  { %1662 = vmatprep.subr.bf16.mxu1 %v5478_v12  ;;  %2466 = vmatprep.subr.bf16.mxu0 %v5606_v13  ;;  %v5662_v12 = vcombine.high %v793_v7, %v797_v8  ;;  %v5412_v13 = vld [vmem:[%s8795_s3 + $0x6c8] sm:$0xff]  ;;  %v723_v6 = vld [vmem:[%s8795_s3 + $0x58] sm:$0xff] }
 0x187   :  { %v5541_v25 = vcombine.low %v5412_v13, %v5416_v14 }
 0x189   :  { %1663 = vmatpush1.bf16.msra.mxu1 %v5477_v18  ;;  %2467 = vmatpush1.bf16.msra.mxu0 %v5605_v19  ;;  %v5661_v18 = vcombine.low %v793_v7, %v797_v8  ;;  %v5542_v19 = vcombine.high %v5412_v13, %v5416_v14  ;;  %v727_v7 = vld [vmem:[%s8795_s3 + $0x78] sm:$0xff]  ;;  %v5345_v13 = vld [vmem:[%s8795_s3 + $0x4b0] sm:$0xff] }
 0x18a   :  { %1664 = vmatprep.subr.bf16.mxu1 %v5486_v20  ;;  %2468 = vmatprep.subr.bf16.mxu0 %v5614_v21  ;;  %v5670_v20 = vcombine.high %v801_v15, %v805_v16  ;;  %v5420_v21 = vld [vmem:[%s8795_s3 + $0x708] sm:$0xff]  ;;  %v731_v14 = vld [vmem:[%s8795_s3 + $0x98] sm:$0xff] }
 0x18b   :  { %v5549_v34 = vcombine.low %v5420_v21, %v5424_v22 }
 0x18d   :  { %1665 = vmatpush1.bf16.msra.mxu1 %v5485_v26  ;;  %2469 = vmatpush1.bf16.msra.mxu0 %v5613_v27  ;;  %v5669_v26 = vcombine.low %v801_v15, %v805_v16  ;;  %v5550_v27 = vcombine.high %v5420_v21, %v5424_v22  ;;  %v735_v15 = vld [vmem:[%s8795_s3 + $0xb8] sm:$0xff]  ;;  %v5353_v21 = vld [vmem:[%s8795_s3 + $0x4f0] sm:$0xff] }
 0x18e   :  { %1666 = vmatprep.subr.bf16.mxu1 %v5494_v28  ;;  %2470 = vmatprep.subr.bf16.mxu0 %v5622_v29  ;;  %v5678_v28 = vcombine.high %v809_v23, %v813_v24  ;;  %v5428_v29 = vld [vmem:[%s8795_s3 + $0x748] sm:$0xff]  ;;  %v743_v22 = vld [vmem:[%s8795_s3 + $0xf8] sm:$0xff] }
 0x18f   :  { %v5557_v44 = vcombine.low %v5428_v29, %v5432_v31 }
 0x191   :  { %1667 = vmatpush1.bf16.msra.mxu1 %v5493_v36  ;;  %2471 = vmatpush1.bf16.msra.mxu0 %v5621_v38  ;;  %v5677_v36 = vcombine.low %v809_v23, %v813_v24  ;;  %v5558_v38 = vcombine.high %v5428_v29, %v5432_v31  ;;  %v5601_v24 = vcombine.low %v731_v14, %v735_v15  ;;  %v747_v29 = vld [vmem:[%s8795_s3 + $0x118] sm:$0xff] }
 0x192   :  { %1668 = vmatprep.subr.bf16.mxu1 %v5502_v39  ;;  %2472 = vmatprep.subr.bf16.mxu0 %v5630_v40  ;;  %v5686_v39 = vcombine.high %v817_v32, %v821_v33  ;;  %v5436_v40 = vld [vmem:[%s8795_s3 + $0x788] sm:$0xff]  ;;  %v751_v31 = vld [vmem:[%s8795_s3 + $0x138] sm:$0xff] }
 0x193   :  { %v5565_v54 = vcombine.low %v5436_v40, %v5440_v41 }
 0x195   :  { %1669 = vmatpush1.bf16.msra.mxu1 %v5501_v45  ;;  %2473 = vmatpush1.bf16.msra.mxu0 %v5629_v46  ;;  %v5685_v45 = vcombine.low %v817_v32, %v821_v33  ;;  %v5566_v46 = vcombine.high %v5436_v40, %v5440_v41  ;;  %v755_v40 = vld [vmem:[%s8795_s3 + $0x158] sm:$0xff] }
 0x196   :  { %1670 = vmatprep.subr.bf16.mxu1 %v5510_v47  ;;  %2474 = vmatprep.subr.bf16.mxu0 %v5638_v48  ;;  %v5694_v47 = vcombine.high %v825_v42, %v829_v43  ;;  %v5444_v48 = vld [vmem:[%s8795_s3 + $0x7c8] sm:$0xff]  ;;  %v759_v41 = vld [vmem:[%s8795_s3 + $0x178] sm:$0xff] }
 0x197   :  { %v5573_v0 = vcombine.low %v5444_v48, %v5448_v49 }
 0x199   :  { %1671 = vmatpush1.bf16.msra.mxu1 %v5509_v55  ;;  %2475 = vmatpush1.bf16.msra.mxu0 %v5637_v56  ;;  %v5693_v55 = vcombine.low %v825_v42, %v829_v43  ;;  %v5574_v56 = vcombine.high %v5444_v48, %v5448_v49  ;;  %v5617_v43 = vcombine.low %v747_v29, %v751_v31  ;;  %v763_v48 = vld [vmem:[%s8795_s3 + $0x198] sm:$0xff] }
 0x19a   :  { %1672 = vmatprep.subr.bf16.mxu1 %v5518_v57  ;;  %2476 = vmatprep.subr.bf16.mxu0 %v5646_v60  ;;  %v5702_v57 = vcombine.high %v833_v50, %v837_v51  ;;  %v5325_v60 = vld [vmem:[%s8795_s3 + $0x410] sm:$0xff]  ;;  %v767_v49 = vld [vmem:[%s8795_s3 + $0x1b8] sm:$0xff] }
 0x19b   :  { %v5455_v8 = vcombine.low %v5325_v60, %v5329_v61 }
 0x19d   :  { %1673 = vmatpush1.bf16.msra.mxu1 %v5517_v1  ;;  %2477 = vmatpush1.bf16.msra.mxu0 %v5645_v2  ;;  %v5701_v1 = vcombine.low %v833_v50, %v837_v51  ;;  %v5456_v2 = vcombine.high %v5325_v60, %v5329_v61  ;;  %v5625_v51 = vcombine.low %v755_v40, %v759_v41  ;;  %v771_v60 = vld [vmem:[%s8795_s3 + $0x1d8] sm:$0xff] }
 0x19e   :  { %1674 = vmatprep.subr.bf16.mxu1 %v5526_v3  ;;  %2478 = vmatprep.subr.bf16.mxu0 %v5654_v4  ;;  %v5586_v3 = vcombine.high %v715_v62, %v719_v63  ;;  %v5333_v4 = vld [vmem:[%s8795_s3 + $0x450] sm:$0xff]  ;;  %v775_v61 = vld [vmem:[%s8795_s3 + $0x1f8] sm:$0xff] }
 0x19f   :  { %v5463_v16 = vcombine.low %v5333_v4, %v5337_v5 }
 0x1a1   :  { %1675 = vmatpush1.bf16.msra.mxu1 %v5525_v9  ;;  %2479 = vmatpush1.bf16.msra.mxu0 %v5653_v10  ;;  %v5585_v9 = vcombine.low %v715_v62, %v719_v63  ;;  %v5464_v10 = vcombine.high %v5333_v4, %v5337_v5  ;;  %v5633_v63 = vcombine.low %v763_v48, %v767_v49  ;;  %v779_v4 = vld [vmem:[%s8795_s3 + $0x218] sm:$0xff] }
 0x1a2   :  { %1676 = vmatprep.subr.bf16.mxu1 %v5534_v11  ;;  %2480 = vmatprep.subr.bf16.mxu0 %v5662_v12  ;;  %v5594_v11 = vcombine.high %v723_v6, %v727_v7  ;;  %v5341_v12 = vld [vmem:[%s8795_s3 + $0x490] sm:$0xff]  ;;  %v783_v5 = vld [vmem:[%s8795_s3 + $0x238] sm:$0xff] }
 0x1a3   :  { %v5471_v23 = vcombine.low %v5341_v12, %v5345_v13 }
 0x1a5   :  { %1677 = vmatpush1.bf16.msra.mxu1 %v5533_v17  ;;  %2481 = vmatpush1.bf16.msra.mxu0 %v5661_v18  ;;  %v5593_v17 = vcombine.low %v723_v6, %v727_v7  ;;  %v5472_v18 = vcombine.high %v5341_v12, %v5345_v13  ;;  %v5641_v7 = vcombine.low %v771_v60, %v775_v61  ;;  %v787_v12 = vld [vmem:[%s8795_s3 + $0x258] sm:$0xff] }
 0x1a6   :  { %1678 = vmatprep.subr.bf16.mxu1 %v5542_v19  ;;  %2482 = vmatprep.subr.bf16.mxu0 %v5670_v20  ;;  %v5602_v19 = vcombine.high %v731_v14, %v735_v15  ;;  %v5349_v20 = vld [vmem:[%s8795_s3 + $0x4d0] sm:$0xff]  ;;  %v791_v13 = vld [vmem:[%s8795_s3 + $0x278] sm:$0xff]  ;;  %v5649_v15 = vcombine.low %v779_v4, %v783_v5 }
 0x1a7   :  { %v5479_v32 = vcombine.low %v5349_v20, %v5353_v21 }
 0x1a9   :  { %1679 = vmatpush1.bf16.msra.mxu1 %v5541_v25  ;;  %2483 = vmatpush1.bf16.msra.mxu0 %v5669_v26  ;;  %v5480_v25 = vcombine.high %v5349_v20, %v5353_v21  ;;  %v795_v20 = vld [vmem:[%s8795_s3 + $0x298] sm:$0xff] }
 0x1aa   :  { %1680 = vmatprep.subr.bf16.mxu1 %v5550_v27  ;;  %2484 = vmatprep.subr.bf16.mxu0 %v5678_v28  ;;  %v5357_v27 = vld [vmem:[%s8795_s3 + $0x510] sm:$0xff]  ;;  %v799_v21 = vld [vmem:[%s8795_s3 + $0x2b8] sm:$0xff] }
 0x1ab   :  { %v5361_v28 = vld [vmem:[%s8795_s3 + $0x530] sm:$0xff] }
 0x1ac   :  { %v5487_v42 = vcombine.low %v5357_v27, %v5361_v28 }
 0x1ad   :  { %1681 = vmatpush1.bf16.msra.mxu1 %v5549_v34  ;;  %2485 = vmatpush1.bf16.msra.mxu0 %v5677_v36  ;;  %v5488_v34 = vcombine.high %v5357_v27, %v5361_v28  ;;  %v5618_v36 = vcombine.high %v747_v29, %v751_v31  ;;  %v803_v27 = vld [vmem:[%s8795_s3 + $0x2d8] sm:$0xff]  ;;  %v5665_v31 = vcombine.low %v795_v20, %v799_v21 }
 0x1ae   :  { %1682 = vmatprep.subr.bf16.mxu1 %v5558_v38  ;;  %2486 = vmatprep.subr.bf16.mxu0 %v5686_v39  ;;  %v5365_v38 = vld [vmem:[%s8795_s3 + $0x550] sm:$0xff]  ;;  %v807_v28 = vld [vmem:[%s8795_s3 + $0x2f8] sm:$0xff] }
 0x1af   :  { %v5369_v39 = vld [vmem:[%s8795_s3 + $0x570] sm:$0xff] }
 0x1b0   :  { %v5495_v50 = vcombine.low %v5365_v38, %v5369_v39 }
 0x1b1   :  { %1683 = vmatpush1.bf16.msra.mxu1 %v5557_v44  ;;  %2487 = vmatpush1.bf16.msra.mxu0 %v5685_v45  ;;  %v5496_v44 = vcombine.high %v5365_v38, %v5369_v39  ;;  %v5626_v45 = vcombine.high %v755_v40, %v759_v41  ;;  %v811_v38 = vld [vmem:[%s8795_s3 + $0x318] sm:$0xff]  ;;  %v5673_v41 = vcombine.low %v803_v27, %v807_v28 }
 0x1b2   :  { %1684 = vmatprep.subr.bf16.mxu1 %v5566_v46  ;;  %2488 = vmatprep.subr.bf16.mxu0 %v5694_v47  ;;  %v5373_v46 = vld [vmem:[%s8795_s3 + $0x590] sm:$0xff]  ;;  %v815_v39 = vld [vmem:[%s8795_s3 + $0x338] sm:$0xff] }
 0x1b3   :  { %v5377_v47 = vld [vmem:[%s8795_s3 + $0x5b0] sm:$0xff] }
 0x1b4   :  { %v5503_v62 = vcombine.low %v5373_v46, %v5377_v47 }
 0x1b5   :  { %1685 = vmatpush1.bf16.msra.mxu1 %v5565_v54  ;;  %2489 = vmatpush1.bf16.msra.mxu0 %v5693_v55  ;;  %v5504_v54 = vcombine.high %v5373_v46, %v5377_v47  ;;  %v5634_v55 = vcombine.high %v763_v48, %v767_v49  ;;  %v819_v46 = vld [vmem:[%s8795_s3 + $0x358] sm:$0xff]  ;;  %v5681_v49 = vcombine.low %v811_v38, %v815_v39 }
 0x1b6   :  { %1686 = vmatprep.subr.bf16.mxu1 %v5574_v56  ;;  %2490 = vmatprep.subr.bf16.mxu0 %v5702_v57  ;;  %v5381_v56 = vld [vmem:[%s8795_s3 + $0x5d0] sm:$0xff]  ;;  %v823_v47 = vld [vmem:[%s8795_s3 + $0x378] sm:$0xff] }
 0x1b7   :  { %v5385_v57 = vld [vmem:[%s8795_s3 + $0x5f0] sm:$0xff] }
 0x1b8   :  { %v5511_v6 = vcombine.low %v5381_v56, %v5385_v57 }
 0x1b9   :  { %1687 = vmatpush1.bf16.msra.mxu1 %v5573_v0  ;;  %2491 = vmatpush1.bf16.msra.mxu0 %v5701_v1  ;;  %v5512_v0 = vcombine.high %v5381_v56, %v5385_v57  ;;  %v5642_v1 = vcombine.high %v771_v60, %v775_v61  ;;  %v827_v56 = vld [vmem:[%s8795_s3 + $0x398] sm:$0xff]  ;;  %v5689_v61 = vcombine.low %v819_v46, %v823_v47 }
 0x1ba   :  { %1697 = vmatprep.subr.bf16.mxu1 %v5456_v2  ;;  %2542 = vmatprep.subr.bf16.mxu0 %v5586_v3  ;;  %v5389_v2 = vld [vmem:[%s8795_s3 + $0x610] sm:$0xff]  ;;  %v831_v57 = vld [vmem:[%s8795_s3 + $0x3b8] sm:$0xff] }
 0x1bb   :  { %v5393_v3 = vld [vmem:[%s8795_s3 + $0x630] sm:$0xff] }
 0x1bc   :  { %1689 = vmatmul.mubr.bf16.vlgmr.msra.gmra.mrb[4].mxu1 %v7130_v59  ;;  %2493 = vmatmul.mubr.bf16.vlgmr.msra.gmra.mrb[12].mxu0 %v7110_v52  ;;  %v5519_v14 = vcombine.low %v5389_v2, %v5393_v3 }
 0x1bd   :  { %1698 = vmatpush1.bf16.msra.mxu1 %v5455_v8  ;;  %1729 = vmatprep.mubr.bf16.mxu1 %v7127_v58  ;;  %v739_v58 = vld [vmem:[%s8795_s3 + $0xd8] sm:$0xff]  ;;  %v5520_v8 = vcombine.high %v5389_v2, %v5393_v3 }
 0x1be   :  { %2543 = vmatpush1.bf16.msra.mxu0 %v5585_v9  ;;  %2574 = vmatprep.mubr.bf16.mxu0 %v7112_v53  ;;  %v5610_v26 = vcombine.high %v739_v58, %v743_v22  ;;  %v5609_v33 = vcombine.low %v739_v58, %v743_v22  ;;  %v5650_v9 = vcombine.high %v779_v4, %v783_v5  ;;  %v835_v2 = vld [vmem:[%s8795_s3 + $0x3d8] sm:$0xff] }
 0x1bf   :  { %1699 = vmatprep.subr.bf16.mxu1 %v5464_v10  ;;  %2544 = vmatprep.subr.bf16.mxu0 %v5594_v11  ;;  %v5397_v10 = vld [vmem:[%s8795_s3 + $0x650] sm:$0xff]  ;;  %v5657_v22 = vcombine.low %v787_v12, %v791_v13  ;;  %v839_v3 = vld [vmem:[%s8795_s3 + $0x3f8] sm:$0xff]  ;;  %v5697_v5 = vcombine.low %v827_v56, %v831_v57 }
 0x1c0   :  { %v5401_v11 = vld [vmem:[%s8795_s3 + $0x670] sm:$0xff] }
 0x1c1   :  { %1700 = vmatpush1.bf16.msra.mxu1 %v5463_v16  ;;  %v5528_v16 = vcombine.high %v5397_v10, %v5401_v11  ;;  %v5527_v58 = vcombine.low %v5397_v10, %v5401_v11  ;;  %v5708_v10 = vld [vmem:[%s8795_s3 + $0x808] sm:$0xff] }
 0x1c2   :  { %2545 = vmatpush1.bf16.msra.mxu0 %v5593_v17  ;;  %1701 = vmatprep.subr.bf16.mxu1 %v5472_v18  ;;  %v5658_v17 = vcombine.high %v787_v12, %v791_v13  ;;  %v5405_v18 = vld [vmem:[%s8795_s3 + $0x690] sm:$0xff]  ;;  %v5712_v11 = vld [vmem:[%s8795_s3 + $0x828] sm:$0xff]  ;;  %v5705_v13 = vcombine.low %v835_v2, %v839_v3 }
 0x1c3   :  { %2546 = vmatprep.subr.bf16.mxu0 %v5602_v19  ;;  %v5409_v19 = vld [vmem:[%s8795_s3 + $0x6b0] sm:$0xff] }
 0x1c4   :  { %v5535_v29 = vcombine.low %v5405_v18, %v5409_v19 }
 0x1c5   :  { %1702 = vmatpush1.bf16.msra.mxu1 %v5471_v23  ;;  %v5536_v23 = vcombine.high %v5405_v18, %v5409_v19  ;;  %v5716_v19 = vld [vmem:[%s8795_s3 + $0x848] sm:$0xff] }
 0x1c6   :  { %2547 = vmatpush1.bf16.msra.mxu0 %v5601_v24  ;;  %1703 = vmatprep.subr.bf16.mxu1 %v5480_v25  ;;  %v5666_v24 = vcombine.high %v795_v20, %v799_v21  ;;  %v5413_v25 = vld [vmem:[%s8795_s3 + $0x6d0] sm:$0xff]  ;;  %v5720_v20 = vld [vmem:[%s8795_s3 + $0x868] sm:$0xff]  ;;  %v5837_v21 = vcombine.low %v5708_v10, %v5712_v11 }
 0x1c7   :  { %2548 = vmatprep.subr.bf16.mxu0 %v5610_v26  ;;  %v5417_v26 = vld [vmem:[%s8795_s3 + $0x6f0] sm:$0xff] }
 0x1c8   :  { %v5543_v40 = vcombine.low %v5413_v25, %v5417_v26 }
 0x1c9   :  { %1704 = vmatpush1.bf16.msra.mxu1 %v5479_v32  ;;  %v5544_v32 = vcombine.high %v5413_v25, %v5417_v26  ;;  %v5724_v25 = vld [vmem:[%s8795_s3 + $0x888] sm:$0xff] }
 0x1ca   :  { %2549 = vmatpush1.bf16.msra.mxu0 %v5609_v33  ;;  %1705 = vmatprep.subr.bf16.mxu1 %v5488_v34  ;;  %v5674_v33 = vcombine.high %v803_v27, %v807_v28  ;;  %v5421_v34 = vld [vmem:[%s8795_s3 + $0x710] sm:$0xff]  ;;  %v5728_v26 = vld [vmem:[%s8795_s3 + $0x8a8] sm:$0xff]  ;;  %v7541_v27 = vrot.slane %v7112_v53, 2 }
 0x1cb   :  { %2550 = vmatprep.subr.bf16.mxu0 %v5618_v36  ;;  %v5425_v36 = vld [vmem:[%s8795_s3 + $0x730] sm:$0xff] }
 0x1cc   :  { %v5551_v48 = vcombine.low %v5421_v34, %v5425_v36 }
 0x1cd   :  { %1706 = vmatpush1.bf16.msra.mxu1 %v5487_v42  ;;  %v5552_v42 = vcombine.high %v5421_v34, %v5425_v36  ;;  %v5732_v34 = vld [vmem:[%s8795_s3 + $0x8c8] sm:$0xff] }
 0x1ce   :  { %2551 = vmatpush1.bf16.msra.mxu0 %v5617_v43  ;;  %1707 = vmatprep.subr.bf16.mxu1 %v5496_v44  ;;  %v5682_v43 = vcombine.high %v811_v38, %v815_v39  ;;  %v5429_v44 = vld [vmem:[%s8795_s3 + $0x750] sm:$0xff]  ;;  %v5736_v36 = vld [vmem:[%s8795_s3 + $0x8e8] sm:$0xff]  ;;  %v5853_v39 = vcombine.low %v5724_v25, %v5728_v26 }
 0x1cf   :  { %2552 = vmatprep.subr.bf16.mxu0 %v5626_v45  ;;  %v5433_v45 = vld [vmem:[%s8795_s3 + $0x770] sm:$0xff] }
 0x1d0   :  { %v5559_v60 = vcombine.low %v5429_v44, %v5433_v45 }
 0x1d1   :  { %1708 = vmatpush1.bf16.msra.mxu1 %v5495_v50  ;;  %v5560_v50 = vcombine.high %v5429_v44, %v5433_v45  ;;  %v5740_v44 = vld [vmem:[%s8795_s3 + $0x908] sm:$0xff] }
 0x1d2   :  { %2553 = vmatpush1.bf16.msra.mxu0 %v5625_v51  ;;  %1709 = vmatprep.subr.bf16.mxu1 %v5504_v54  ;;  %v5690_v51 = vcombine.high %v819_v46, %v823_v47  ;;  %v5437_v54 = vld [vmem:[%s8795_s3 + $0x790] sm:$0xff]  ;;  %v5744_v45 = vld [vmem:[%s8795_s3 + $0x928] sm:$0xff]  ;;  %v5861_v47 = vcombine.low %v5732_v34, %v5736_v36 }
 0x1d3   :  { %2554 = vmatprep.subr.bf16.mxu0 %v5634_v55  ;;  %v5441_v55 = vld [vmem:[%s8795_s3 + $0x7b0] sm:$0xff] }
 0x1d4   :  { %v5567_v4 = vcombine.low %v5437_v54, %v5441_v55 }
 0x1d5   :  { %1710 = vmatpush1.bf16.msra.mxu1 %v5503_v62  ;;  %v5568_v62 = vcombine.high %v5437_v54, %v5441_v55  ;;  %v5748_v54 = vld [vmem:[%s8795_s3 + $0x948] sm:$0xff] }
 0x1d6   :  { %2555 = vmatpush1.bf16.msra.mxu0 %v5633_v63  ;;  %1711 = vmatprep.subr.bf16.mxu1 %v5512_v0  ;;  %v5698_v63 = vcombine.high %v827_v56, %v831_v57  ;;  %v5445_v0 = vld [vmem:[%s8795_s3 + $0x7d0] sm:$0xff]  ;;  %v5752_v55 = vld [vmem:[%s8795_s3 + $0x968] sm:$0xff]  ;;  %v5869_v57 = vcombine.low %v5740_v44, %v5744_v45 }
 0x1d7   :  { %2556 = vmatprep.subr.bf16.mxu0 %v5642_v1  ;;  %v5449_v1 = vld [vmem:[%s8795_s3 + $0x7f0] sm:$0xff] }
 0x1d8   :  { %v5575_v12 = vcombine.low %v5445_v0, %v5449_v1 }
 0x1d9   :  { %1712 = vmatpush1.bf16.msra.mxu1 %v5511_v6  ;;  %v5576_v6 = vcombine.high %v5445_v0, %v5449_v1  ;;  %v5756_v0 = vld [vmem:[%s8795_s3 + $0x988] sm:$0xff] }
 0x1da   :  { %2557 = vmatpush1.bf16.msra.mxu0 %v5641_v7  ;;  %1713 = vmatprep.subr.bf16.mxu1 %v5520_v8  ;;  %v5706_v7 = vcombine.high %v835_v2, %v839_v3  ;;  %v712_v8 = vld [vmem:[%s8795_s3] sm:$0xff]  ;;  %v5760_v1 = vld [vmem:[%s8795_s3 + $0x9a8] sm:$0xff]  ;;  %v5877_v3 = vcombine.low %v5748_v54, %v5752_v55 }
 0x1db   :  { %2558 = vmatprep.subr.bf16.mxu0 %v5650_v9  ;;  %v716_v9 = vld [vmem:[%s8795_s3 + $0x20] sm:$0xff] }
 0x1dc   :  { %v5579_v18 = vcombine.low %v712_v8, %v716_v9 }
 0x1dd   :  { %1714 = vmatpush1.bf16.msra.mxu1 %v5519_v14  ;;  %v5580_v14 = vcombine.high %v712_v8, %v716_v9  ;;  %v5764_v8 = vld [vmem:[%s8795_s3 + $0x9c8] sm:$0xff] }
 0x1de   :  { %2559 = vmatpush1.bf16.msra.mxu0 %v5649_v15  ;;  %1715 = vmatprep.subr.bf16.mxu1 %v5528_v16  ;;  %v5838_v15 = vcombine.high %v5708_v10, %v5712_v11  ;;  %v720_v16 = vld [vmem:[%s8795_s3 + $0x40] sm:$0xff]  ;;  %v5768_v9 = vld [vmem:[%s8795_s3 + $0x9e8] sm:$0xff]  ;;  %v5885_v11 = vcombine.low %v5756_v0, %v5760_v1 }
 0x1df   :  { %2560 = vmatprep.subr.bf16.mxu0 %v5658_v17  ;;  %v724_v17 = vld [vmem:[%s8795_s3 + $0x60] sm:$0xff] }
 0x1e0   :  { %v5587_v28 = vcombine.low %v720_v16, %v724_v17 }
 0x1e1   :  { %1716 = vmatpush1.bf16.msra.mxu1 %v5527_v58  ;;  %v5588_v58 = vcombine.high %v720_v16, %v724_v17  ;;  %v5772_v16 = vld [vmem:[%s8795_s3 + $0xa08] sm:$0xff] }
 0x1e2   :  { %2561 = vmatpush1.bf16.msra.mxu0 %v5657_v22  ;;  %1717 = vmatprep.subr.bf16.mxu1 %v5536_v23  ;;  %v728_v22 = vld [vmem:[%s8795_s3 + $0x80] sm:$0xff]  ;;  %v5776_v17 = vld [vmem:[%s8795_s3 + $0xa28] sm:$0xff] }
 0x1e3   :  { %2562 = vmatprep.subr.bf16.mxu0 %v5666_v24  ;;  %v732_v23 = vld [vmem:[%s8795_s3 + $0xa0] sm:$0xff]  ;;  %v5846_v24 = vcombine.high %v5716_v19, %v5720_v20 }
 0x1e4   :  { %v5595_v38 = vcombine.low %v728_v22, %v732_v23 }
 0x1e5   :  { %1718 = vmatpush1.bf16.msra.mxu1 %v5535_v29  ;;  %v5596_v29 = vcombine.high %v728_v22, %v732_v23  ;;  %v788_v22 = vld [vmem:[%s8795_s3 + $0x260] sm:$0xff]  ;;  %v5780_v23 = vld [vmem:[%s8795_s3 + $0xa48] sm:$0xff] }
 0x1e6   :  { %2563 = vmatpush1.bf16.msra.mxu0 %v5665_v31  ;;  %1719 = vmatprep.subr.bf16.mxu1 %v5544_v32  ;;  %v5854_v31 = vcombine.high %v5724_v25, %v5728_v26  ;;  %v736_v32 = vld [vmem:[%s8795_s3 + $0xc0] sm:$0xff]  ;;  %v5901_v26 = vcombine.low %v5772_v16, %v5776_v17 }
 0x1e7   :  { %2564 = vmatprep.subr.bf16.mxu0 %v5674_v33  ;;  %v740_v33 = vld [vmem:[%s8795_s3 + $0xe0] sm:$0xff] }
 0x1e8   :  { %v5603_v46 = vcombine.low %v736_v32, %v740_v33 }
 0x1e9   :  { %1720 = vmatpush1.bf16.msra.mxu1 %v5543_v40  ;;  %v5604_v40 = vcombine.high %v736_v32, %v740_v33  ;;  %v5788_v32 = vld [vmem:[%s8795_s3 + $0xa88] sm:$0xff] }
 0x1ea   :  { %2565 = vmatpush1.bf16.msra.mxu0 %v5673_v41  ;;  %1721 = vmatprep.subr.bf16.mxu1 %v5552_v42  ;;  %v5862_v41 = vcombine.high %v5732_v34, %v5736_v36  ;;  %v744_v42 = vld [vmem:[%s8795_s3 + $0x100] sm:$0xff]  ;;  %v5792_v33 = vld [vmem:[%s8795_s3 + $0xaa8] sm:$0xff] }
 0x1eb   :  { %2566 = vmatprep.subr.bf16.mxu0 %v5682_v43  ;;  %v748_v43 = vld [vmem:[%s8795_s3 + $0x120] sm:$0xff] }
 0x1ec   :  { %v5611_v56 = vcombine.low %v744_v42, %v748_v43 }
 0x1ed   :  { %1722 = vmatpush1.bf16.msra.mxu1 %v5551_v48  ;;  %v5612_v48 = vcombine.high %v744_v42, %v748_v43  ;;  %v5796_v42 = vld [vmem:[%s8795_s3 + $0xac8] sm:$0xff] }
 0x1ee   :  { %2567 = vmatpush1.bf16.msra.mxu0 %v5681_v49  ;;  %1723 = vmatprep.subr.bf16.mxu1 %v5560_v50  ;;  %v5870_v49 = vcombine.high %v5740_v44, %v5744_v45  ;;  %v752_v50 = vld [vmem:[%s8795_s3 + $0x140] sm:$0xff]  ;;  %v5800_v43 = vld [vmem:[%s8795_s3 + $0xae8] sm:$0xff]  ;;  %v5917_v45 = vcombine.low %v5788_v32, %v5792_v33 }
 0x1ef   :  { %2568 = vmatprep.subr.bf16.mxu0 %v5690_v51  ;;  %v756_v51 = vld [vmem:[%s8795_s3 + $0x160] sm:$0xff] }
 0x1f0   :  { %v5619_v2 = vcombine.low %v752_v50, %v756_v51 }
 0x1f1   :  { %1724 = vmatpush1.bf16.msra.mxu1 %v5559_v60  ;;  %v5620_v60 = vcombine.high %v752_v50, %v756_v51  ;;  %v5804_v50 = vld [vmem:[%s8795_s3 + $0xb08] sm:$0xff] }
 0x1f2   :  { %2569 = vmatpush1.bf16.msra.mxu0 %v5689_v61  ;;  %1725 = vmatprep.subr.bf16.mxu1 %v5568_v62  ;;  %v5878_v61 = vcombine.high %v5748_v54, %v5752_v55  ;;  %v760_v62 = vld [vmem:[%s8795_s3 + $0x180] sm:$0xff]  ;;  %v5808_v51 = vld [vmem:[%s8795_s3 + $0xb28] sm:$0xff]  ;;  %v5925_v55 = vcombine.low %v5796_v42, %v5800_v43 }
 0x1f3   :  { %2570 = vmatprep.subr.bf16.mxu0 %v5698_v63  ;;  %v764_v63 = vld [vmem:[%s8795_s3 + $0x1a0] sm:$0xff] }
 0x1f4   :  { %v5627_v10 = vcombine.low %v760_v62, %v764_v63 }
 0x1f5   :  { %1726 = vmatpush1.bf16.msra.mxu1 %v5567_v4  ;;  %v5628_v4 = vcombine.high %v760_v62, %v764_v63  ;;  %v5812_v62 = vld [vmem:[%s8795_s3 + $0xb48] sm:$0xff] }
 0x1f6   :  { %2571 = vmatpush1.bf16.msra.mxu0 %v5697_v5  ;;  %1727 = vmatprep.subr.bf16.mxu1 %v5576_v6  ;;  %v5886_v5 = vcombine.high %v5756_v0, %v5760_v1  ;;  %v768_v6 = vld [vmem:[%s8795_s3 + $0x1c0] sm:$0xff]  ;;  %v5816_v63 = vld [vmem:[%s8795_s3 + $0xb68] sm:$0xff]  ;;  %v5933_v1 = vcombine.low %v5804_v50, %v5808_v51 }
 0x1f7   :  { %2572 = vmatprep.subr.bf16.mxu0 %v5706_v7  ;;  %v772_v7 = vld [vmem:[%s8795_s3 + $0x1e0] sm:$0xff] }
 0x1f9   :  { %1728 = vmatpush1.bf16.msra.mxu1 %v5575_v12  ;;  %v5636_v12 = vcombine.high %v768_v6, %v772_v7 }
 0x1fa   :  { %2573 = vmatpush1.bf16.msra.mxu0 %v5705_v13  ;;  %2419 = vmatprep.subr.bf16.mxu1 %v5580_v14  ;;  %v5894_v13 = vcombine.high %v5764_v8, %v5768_v9  ;;  %v776_v14 = vld [vmem:[%s8795_s3 + $0x200] sm:$0xff] }
 0x1fb   :  { %3397 = vmatprep.subr.bf16.mxu0 %v5838_v15  ;;  %v780_v15 = vld [vmem:[%s8795_s3 + $0x220] sm:$0xff] }
 0x1fc   :  { %1730 = vmatmul.mubr.bf16.vlgmr.msra.gmra.mrb[8].mxu1 %v7130_v59  ;;  %v5845_v59 = vcombine.low %v5716_v19, %v5720_v20  ;;  %v5893_v19 = vcombine.low %v5764_v8, %v5768_v9  ;;  %v5644_v20 = vcombine.high %v776_v14, %v780_v15  ;;  %v5643_v25 = vcombine.low %v776_v14, %v780_v15  ;;  %v5828_v14 = vld [vmem:[%s8795_s3 + $0xbc8] sm:$0xff] }
 0x1fd   :  { %2575 = vmatmul.mubr.bf16.vlgmr.msra.gmra.mrb[16].mxu0 %v7110_v52  ;;  %2420 = vmatpush1.bf16.msra.mxu1 %v5579_v18  ;;  %v5635_v18 = vcombine.low %v768_v6, %v772_v7  ;;  %v5820_v6 = vld [vmem:[%s8795_s3 + $0xb88] sm:$0xff]  ;;  %v5941_v9 = vcombine.low %v5812_v62, %v5816_v63 }
 0x1fe   :  { %2451 = vmatprep.mubr.bf16.mxu1 %v7112_v53  ;;  %3398 = vmatpush1.bf16.msra.mxu0 %v5837_v21  ;;  %v5902_v21 = vcombine.high %v5772_v16, %v5776_v17  ;;  %v5824_v7 = vld [vmem:[%s8795_s3 + $0xba8] sm:$0xff] }
 0x1ff   :  { %3429 = vmatprep.mubr.bf16.mxu0 %v7541_v27  ;;  %2421 = vmatprep.subr.bf16.mxu1 %v5588_v58  ;;  %v784_v58 = vld [vmem:[%s8795_s3 + $0x240] sm:$0xff]  ;;  %v5832_v15 = vld [vmem:[%s8795_s3 + $0xbe8] sm:$0xff]  ;;  %v5949_v17 = vcombine.low %v5820_v6, %v5824_v7 }
 0x200   :  { %3399 = vmatprep.subr.bf16.mxu0 %v5846_v24  ;;  %v5784_v24 = vld [vmem:[%s8795_s3 + $0xa68] sm:$0xff]  ;;  %v5651_v34 = vcombine.low %v784_v58, %v788_v22 }
 0x201   :  { %2422 = vmatpush1.bf16.msra.mxu1 %v5587_v28  ;;  %v5652_v28 = vcombine.high %v784_v58, %v788_v22  ;;  %v5909_v36 = vcombine.low %v5780_v23, %v5784_v24  ;;  %v5710_v58 = vld [vmem:[%s8795_s3 + $0x818] sm:$0xff] }
 0x202   :  { %3400 = vmatpush1.bf16.msra.mxu0 %v5845_v59  ;;  %2423 = vmatprep.subr.bf16.mxu1 %v5596_v29  ;;  %v5910_v59 = vcombine.high %v5780_v23, %v5784_v24  ;;  %v792_v29 = vld [vmem:[%s8795_s3 + $0x280] sm:$0xff]  ;;  %v5714_v22 = vld [vmem:[%s8795_s3 + $0x838] sm:$0xff]  ;;  %v5957_v24 = vcombine.low %v5828_v14, %v5832_v15 }
 0x203   :  { %3401 = vmatprep.subr.bf16.mxu0 %v5854_v31  ;;  %v796_v31 = vld [vmem:[%s8795_s3 + $0x2a0] sm:$0xff] }
 0x204   :  { %v5659_v44 = vcombine.low %v792_v29, %v796_v31 }
 0x205   :  { %2424 = vmatpush1.bf16.msra.mxu1 %v5595_v38  ;;  %v5660_v38 = vcombine.high %v792_v29, %v796_v31  ;;  %v5718_v31 = vld [vmem:[%s8795_s3 + $0x858] sm:$0xff] }
 0x206   :  { %3402 = vmatpush1.bf16.msra.mxu0 %v5853_v39  ;;  %2425 = vmatprep.subr.bf16.mxu1 %v5604_v40  ;;  %v5918_v39 = vcombine.high %v5788_v32, %v5792_v33  ;;  %v800_v40 = vld [vmem:[%s8795_s3 + $0x2c0] sm:$0xff]  ;;  %v5722_v32 = vld [vmem:[%s8795_s3 + $0x878] sm:$0xff]  ;;  %v5841_v33 = vcombine.low %v5710_v58, %v5714_v22 }
 0x207   :  { %3403 = vmatprep.subr.bf16.mxu0 %v5862_v41  ;;  %v804_v41 = vld [vmem:[%s8795_s3 + $0x2e0] sm:$0xff] }
 0x208   :  { %v5667_v54 = vcombine.low %v800_v40, %v804_v41 }
 0x209   :  { %2426 = vmatpush1.bf16.msra.mxu1 %v5603_v46  ;;  %v5668_v46 = vcombine.high %v800_v40, %v804_v41  ;;  %v5850_v40 = vcombine.high %v5718_v31, %v5722_v32  ;;  %v5726_v41 = vld [vmem:[%s8795_s3 + $0x898] sm:$0xff] }
 0x20a   :  { %3404 = vmatpush1.bf16.msra.mxu0 %v5861_v47  ;;  %2427 = vmatprep.subr.bf16.mxu1 %v5612_v48  ;;  %v5926_v47 = vcombine.high %v5796_v42, %v5800_v43  ;;  %v808_v48 = vld [vmem:[%s8795_s3 + $0x300] sm:$0xff]  ;;  %v5730_v42 = vld [vmem:[%s8795_s3 + $0x8b8] sm:$0xff] }
 0x20b   :  { %3405 = vmatprep.subr.bf16.mxu0 %v5870_v49  ;;  %v812_v49 = vld [vmem:[%s8795_s3 + $0x320] sm:$0xff] }
 0x20c   :  { %v5675_v0 = vcombine.low %v808_v48, %v812_v49 }
 0x20d   :  { %2428 = vmatpush1.bf16.msra.mxu1 %v5611_v56  ;;  %v5676_v56 = vcombine.high %v808_v48, %v812_v49  ;;  %v742_v48 = vld [vmem:[%s8795_s3 + $0xf0] sm:$0xff]  ;;  %v5734_v49 = vld [vmem:[%s8795_s3 + $0x8d8] sm:$0xff] }
 0x20e   :  { %3406 = vmatpush1.bf16.msra.mxu0 %v5869_v57  ;;  %2429 = vmatprep.subr.bf16.mxu1 %v5620_v60  ;;  %v5934_v57 = vcombine.high %v5804_v50, %v5808_v51  ;;  %v816_v60 = vld [vmem:[%s8795_s3 + $0x340] sm:$0xff]  ;;  %v5738_v50 = vld [vmem:[%s8795_s3 + $0x8f8] sm:$0xff] }
 0x20f   :  { %3407 = vmatprep.subr.bf16.mxu0 %v5878_v61  ;;  %v820_v61 = vld [vmem:[%s8795_s3 + $0x360] sm:$0xff] }
 0x210   :  { %v5683_v8 = vcombine.low %v816_v60, %v820_v61 }
 0x211   :  { %2430 = vmatpush1.bf16.msra.mxu1 %v5619_v2  ;;  %v5684_v2 = vcombine.high %v816_v60, %v820_v61  ;;  %v750_v60 = vld [vmem:[%s8795_s3 + $0x130] sm:$0xff]  ;;  %v5742_v61 = vld [vmem:[%s8795_s3 + $0x918] sm:$0xff] }
 0x212   :  { %3408 = vmatpush1.bf16.msra.mxu0 %v5877_v3  ;;  %2431 = vmatprep.subr.bf16.mxu1 %v5628_v4  ;;  %v5942_v3 = vcombine.high %v5812_v62, %v5816_v63  ;;  %v824_v4 = vld [vmem:[%s8795_s3 + $0x380] sm:$0xff]  ;;  %v5746_v62 = vld [vmem:[%s8795_s3 + $0x938] sm:$0xff] }
 0x213   :  { %3409 = vmatprep.subr.bf16.mxu0 %v5886_v5  ;;  %v828_v5 = vld [vmem:[%s8795_s3 + $0x3a0] sm:$0xff] }
 0x214   :  { %v5691_v16 = vcombine.low %v824_v4, %v828_v5 }
 0x215   :  { %2432 = vmatpush1.bf16.msra.mxu1 %v5627_v10  ;;  %v5692_v10 = vcombine.high %v824_v4, %v828_v5  ;;  %v758_v4 = vld [vmem:[%s8795_s3 + $0x170] sm:$0xff]  ;;  %v5750_v5 = vld [vmem:[%s8795_s3 + $0x958] sm:$0xff] }
 0x216   :  { %3410 = vmatpush1.bf16.msra.mxu0 %v5885_v11  ;;  %2433 = vmatprep.subr.bf16.mxu1 %v5636_v12  ;;  %v5950_v11 = vcombine.high %v5820_v6, %v5824_v7  ;;  %v832_v12 = vld [vmem:[%s8795_s3 + $0x3c0] sm:$0xff]  ;;  %v5754_v6 = vld [vmem:[%s8795_s3 + $0x978] sm:$0xff] }
 0x217   :  { %3411 = vmatprep.subr.bf16.mxu0 %v5894_v13  ;;  %v836_v13 = vld [vmem:[%s8795_s3 + $0x3e0] sm:$0xff] }
 0x218   :  { %v5699_v23 = vcombine.low %v832_v12, %v836_v13 }
 0x219   :  { %2434 = vmatpush1.bf16.msra.mxu1 %v5635_v18  ;;  %v5700_v18 = vcombine.high %v832_v12, %v836_v13  ;;  %v766_v12 = vld [vmem:[%s8795_s3 + $0x1b0] sm:$0xff]  ;;  %v5758_v13 = vld [vmem:[%s8795_s3 + $0x998] sm:$0xff] }
 0x21a   :  { %3412 = vmatpush1.bf16.msra.mxu0 %v5893_v19  ;;  %2435 = vmatprep.subr.bf16.mxu1 %v5644_v20  ;;  %v5958_v19 = vcombine.high %v5828_v14, %v5832_v15  ;;  %v714_v20 = vld [vmem:[%s8795_s3 + $0x10] sm:$0xff]  ;;  %v5762_v14 = vld [vmem:[%s8795_s3 + $0x9b8] sm:$0xff] }
 0x21b   :  { %3413 = vmatprep.subr.bf16.mxu0 %v5902_v21  ;;  %v718_v21 = vld [vmem:[%s8795_s3 + $0x30] sm:$0xff] }
 0x21c   :  { %v5583_v29 = vcombine.low %v714_v20, %v718_v21 }
 0x21d   :  { %2436 = vmatpush1.bf16.msra.mxu1 %v5643_v25  ;;  %v5584_v25 = vcombine.high %v714_v20, %v718_v21  ;;  %v5890_v20 = vcombine.high %v5758_v13, %v5762_v14  ;;  %v770_v21 = vld [vmem:[%s8795_s3 + $0x1d0] sm:$0xff] }
 0x21e   :  { %3414 = vmatpush1.bf16.msra.mxu0 %v5901_v26  ;;  %2437 = vmatprep.subr.bf16.mxu1 %v5652_v28  ;;  %v5842_v26 = vcombine.high %v5710_v58, %v5714_v22  ;;  %v722_v28 = vld [vmem:[%s8795_s3 + $0x50] sm:$0xff] }
 0x21f   :  { %3415 = vmatprep.subr.bf16.mxu0 %v5910_v59  ;;  %v726_v59 = vld [vmem:[%s8795_s3 + $0x70] sm:$0xff] }
 0x220   :  { %v5591_v43 = vcombine.low %v722_v28, %v726_v59  ;;  %v774_v58 = vld [vmem:[%s8795_s3 + $0x1f0] sm:$0xff] }
 0x221   :  { %2438 = vmatpush1.bf16.msra.mxu1 %v5651_v34  ;;  %v7726_v34 = vrot.slane %v7110_v52, 2 }
 0x222   :  { %3416 = vmatpush1.bf16.msra.mxu0 %v5909_v36  ;;  %2439 = vmatprep.subr.bf16.mxu1 %v5660_v38  ;;  %v5592_v36 = vcombine.high %v722_v28, %v726_v59  ;;  %v730_v38 = vld [vmem:[%s8795_s3 + $0x90] sm:$0xff] }
 0x223   :  { %3417 = vmatprep.subr.bf16.mxu0 %v5918_v39  ;;  %v734_v39 = vld [vmem:[%s8795_s3 + $0xb0] sm:$0xff] }
 0x224   :  { %v5599_v51 = vcombine.low %v730_v38, %v734_v39 }
 0x225   :  { %2440 = vmatpush1.bf16.msra.mxu1 %v5659_v44  ;;  %v5849_v44 = vcombine.low %v5718_v31, %v5722_v32  ;;  %v5889_v32 = vcombine.low %v5758_v13, %v5762_v14  ;;  %v5810_v13 = vld [vmem:[%s8795_s3 + $0xb38] sm:$0xff] }
 0x226   :  { %3418 = vmatpush1.bf16.msra.mxu0 %v5917_v45  ;;  %2441 = vmatprep.subr.bf16.mxu1 %v5668_v46  ;;  %v5600_v45 = vcombine.high %v730_v38, %v734_v39  ;;  %v5858_v46 = vcombine.high %v5726_v41, %v5730_v42  ;;  %v778_v38 = vld [vmem:[%s8795_s3 + $0x210] sm:$0xff] }
 0x227   :  { %3419 = vmatprep.subr.bf16.mxu0 %v5926_v47  ;;  %v738_v47 = vld [vmem:[%s8795_s3 + $0xd0] sm:$0xff] }
 0x228   :  { %v5607_v63 = vcombine.low %v738_v47, %v742_v48  ;;  %v782_v39 = vld [vmem:[%s8795_s3 + $0x230] sm:$0xff] }
 0x229   :  { %2442 = vmatpush1.bf16.msra.mxu1 %v5667_v54  ;;  %v5857_v54 = vcombine.low %v5726_v41, %v5730_v42  ;;  %v5778_v41 = vld [vmem:[%s8795_s3 + $0xa38] sm:$0xff]  ;;  %v5639_v42 = vcombine.low %v770_v21, %v774_v58 }
 0x22a   :  { %3420 = vmatpush1.bf16.msra.mxu0 %v5925_v55  ;;  %2443 = vmatprep.subr.bf16.mxu1 %v5676_v56  ;;  %v5608_v55 = vcombine.high %v738_v47, %v742_v48  ;;  %v5866_v56 = vcombine.high %v5734_v49, %v5738_v50  ;;  %v790_v47 = vld [vmem:[%s8795_s3 + $0x270] sm:$0xff]  ;;  %v5782_v48 = vld [vmem:[%s8795_s3 + $0xa58] sm:$0xff] }
 0x22b   :  { %3421 = vmatprep.subr.bf16.mxu0 %v5934_v57  ;;  %v746_v57 = vld [vmem:[%s8795_s3 + $0x110] sm:$0xff] }
 0x22c   :  { %v5615_v7 = vcombine.low %v746_v57, %v750_v60 }
 0x22d   :  { %2444 = vmatpush1.bf16.msra.mxu1 %v5675_v0  ;;  %v5865_v0 = vcombine.low %v5734_v49, %v5738_v50  ;;  %v5786_v49 = vld [vmem:[%s8795_s3 + $0xa78] sm:$0xff]  ;;  %v5647_v50 = vcombine.low %v778_v38, %v782_v39 }
 0x22e   :  { %3422 = vmatpush1.bf16.msra.mxu0 %v5933_v1  ;;  %2445 = vmatprep.subr.bf16.mxu1 %v5684_v2  ;;  %v5616_v1 = vcombine.high %v746_v57, %v750_v60  ;;  %v5874_v2 = vcombine.high %v5742_v61, %v5746_v62  ;;  %v798_v57 = vld [vmem:[%s8795_s3 + $0x2b0] sm:$0xff]  ;;  %v5790_v60 = vld [vmem:[%s8795_s3 + $0xa98] sm:$0xff] }
 0x22f   :  { %3423 = vmatprep.subr.bf16.mxu0 %v5942_v3  ;;  %v754_v3 = vld [vmem:[%s8795_s3 + $0x150] sm:$0xff] }
 0x230   :  { %v5623_v15 = vcombine.low %v754_v3, %v758_v4 }
 0x231   :  { %2446 = vmatpush1.bf16.msra.mxu1 %v5683_v8  ;;  %v5873_v8 = vcombine.low %v5742_v61, %v5746_v62  ;;  %v5794_v61 = vld [vmem:[%s8795_s3 + $0xab8] sm:$0xff] }
 0x232   :  { %3424 = vmatpush1.bf16.msra.mxu0 %v5941_v9  ;;  %2447 = vmatprep.subr.bf16.mxu1 %v5692_v10  ;;  %v5624_v9 = vcombine.high %v754_v3, %v758_v4  ;;  %v5882_v10 = vcombine.high %v5750_v5, %v5754_v6  ;;  %v806_v3 = vld [vmem:[%s8795_s3 + $0x2f0] sm:$0xff]  ;;  %v5798_v4 = vld [vmem:[%s8795_s3 + $0xad8] sm:$0xff] }
 0x233   :  { %3425 = vmatprep.subr.bf16.mxu0 %v5950_v11  ;;  %v762_v11 = vld [vmem:[%s8795_s3 + $0x190] sm:$0xff] }
 0x234   :  { %v5631_v59 = vcombine.low %v762_v11, %v766_v12 }
 0x235   :  { %2448 = vmatpush1.bf16.msra.mxu1 %v5691_v16  ;;  %v5881_v16 = vcombine.low %v5750_v5, %v5754_v6  ;;  %v5802_v5 = vld [vmem:[%s8795_s3 + $0xaf8] sm:$0xff] }
 0x236   :  { %3426 = vmatpush1.bf16.msra.mxu0 %v5949_v17  ;;  %2449 = vmatprep.subr.bf16.mxu1 %v5700_v18  ;;  %v5632_v17 = vcombine.high %v762_v11, %v766_v12  ;;  %v814_v11 = vld [vmem:[%s8795_s3 + $0x330] sm:$0xff]  ;;  %v5806_v12 = vld [vmem:[%s8795_s3 + $0xb18] sm:$0xff] }
 0x237   :  { %3427 = vmatprep.subr.bf16.mxu0 %v5958_v19 }
 0x239   :  { %2450 = vmatpush1.bf16.msra.mxu1 %v5699_v23 }
 0x23a   :  { %3428 = vmatpush1.bf16.msra.mxu0 %v5957_v24  ;;  %2501 = vmatprep.subr.bf16.mxu1 %v5584_v25  ;;  %v5766_v24 = vld [vmem:[%s8795_s3 + $0x9d8] sm:$0xff] }
 0x23b   :  { %3479 = vmatprep.subr.bf16.mxu0 %v5842_v26  ;;  %v5770_v25 = vld [vmem:[%s8795_s3 + $0x9f8] sm:$0xff] }
 0x23c   :  { %2452 = vmatmul.mubr.bf16.vlgmr.msra.gmra.mrb[12].mxu1 %v7110_v52 }
 0x23d   :  { %3430 = vmatmul.mubr.bf16.vlgmr.msra.gmra.mrb[20].mxu0 %v7726_v34  ;;  %2502 = vmatpush1.bf16.msra.mxu1 %v5583_v29 }
 0x23e   :  { %2533 = vmatprep.mubr.bf16.mxu1 %v7112_v53  ;;  %3480 = vmatpush1.bf16.msra.mxu0 %v5841_v33  ;;  %v5640_v33 = vcombine.high %v770_v21, %v774_v58  ;;  %v822_v21 = vld [vmem:[%s8795_s3 + $0x370] sm:$0xff]  ;;  %v5814_v58 = vld [vmem:[%s8795_s3 + $0xb58] sm:$0xff] }
 0x23f   :  { %3511 = vmatprep.mubr.bf16.mxu0 %v7541_v27  ;;  %2503 = vmatprep.subr.bf16.mxu1 %v5592_v36  ;;  %v5898_v36 = vcombine.high %v5766_v24, %v5770_v25 }
 0x240   :  { %3481 = vmatprep.subr.bf16.mxu0 %v5850_v40  ;;  %v5774_v40 = vld [vmem:[%s8795_s3 + $0xa18] sm:$0xff] }
 0x241   :  { %2504 = vmatpush1.bf16.msra.mxu1 %v5591_v43  ;;  %v5897_v43 = vcombine.low %v5766_v24, %v5770_v25  ;;  %v5818_v24 = vld [vmem:[%s8795_s3 + $0xb78] sm:$0xff] }
 0x242   :  { %3482 = vmatpush1.bf16.msra.mxu0 %v5849_v44  ;;  %2505 = vmatprep.subr.bf16.mxu1 %v5600_v45  ;;  %v5648_v44 = vcombine.high %v778_v38, %v782_v39  ;;  %v5906_v45 = vcombine.high %v5774_v40, %v5778_v41  ;;  %v5945_v38 = vcombine.low %v5814_v58, %v5818_v24 }
 0x243   :  { %3483 = vmatprep.subr.bf16.mxu0 %v5858_v46  ;;  %v786_v46 = vld [vmem:[%s8795_s3 + $0x250] sm:$0xff] }
 0x244   :  { %v5655_v62 = vcombine.low %v786_v46, %v790_v47 }
 0x245   :  { %2506 = vmatpush1.bf16.msra.mxu1 %v5599_v51  ;;  %v5905_v51 = vcombine.low %v5774_v40, %v5778_v41  ;;  %v834_v41 = vld [vmem:[%s8795_s3 + $0x3d0] sm:$0xff] }
 0x246   :  { %3484 = vmatpush1.bf16.msra.mxu0 %v5857_v54  ;;  %2507 = vmatprep.subr.bf16.mxu1 %v5608_v55  ;;  %v5656_v54 = vcombine.high %v786_v46, %v790_v47  ;;  %v5914_v55 = vcombine.high %v5782_v48, %v5786_v49 }
 0x247   :  { %3485 = vmatprep.subr.bf16.mxu0 %v5866_v56  ;;  %v794_v56 = vld [vmem:[%s8795_s3 + $0x290] sm:$0xff] }
 0x248   :  { %v5663_v6 = vcombine.low %v794_v56, %v798_v57 }
 0x249   :  { %2508 = vmatpush1.bf16.msra.mxu1 %v5607_v63  ;;  %v5913_v63 = vcombine.low %v5782_v48, %v5786_v49  ;;  %v5707_v49 = vld [vmem:[%s8795_s3 + $0x800] sm:$0xff] }
 0x24a   :  { %3486 = vmatpush1.bf16.msra.mxu0 %v5865_v0  ;;  %2509 = vmatprep.subr.bf16.mxu1 %v5616_v1  ;;  %v5664_v0 = vcombine.high %v794_v56, %v798_v57  ;;  %v5922_v1 = vcombine.high %v5790_v60, %v5794_v61 }
 0x24b   :  { %3487 = vmatprep.subr.bf16.mxu0 %v5874_v2  ;;  %v802_v2 = vld [vmem:[%s8795_s3 + $0x2d0] sm:$0xff] }
 0x24c   :  { %v5671_v14 = vcombine.low %v802_v2, %v806_v3 }
 0x24d   :  { %2510 = vmatpush1.bf16.msra.mxu1 %v5615_v7  ;;  %v5921_v7 = vcombine.low %v5790_v60, %v5794_v61  ;;  %v5715_v61 = vld [vmem:[%s8795_s3 + $0x840] sm:$0xff] }
 0x24e   :  { %3488 = vmatpush1.bf16.msra.mxu0 %v5873_v8  ;;  %2511 = vmatprep.subr.bf16.mxu1 %v5624_v9  ;;  %v5672_v8 = vcombine.high %v802_v2, %v806_v3  ;;  %v5930_v9 = vcombine.high %v5798_v4, %v5802_v5 }
 0x24f   :  { %v7792_v18 = vpop.f32.mrb[0].mxu1  ;;  %v7794_v19 = vpop.f32.mrb[8].mxu0  ;;  %3489 = vmatprep.subr.bf16.mxu0 %v5882_v10  ;;  %v810_v10 = vld [vmem:[%s8795_s3 + $0x310] sm:$0xff] }
 0x250   :  { %v7802_v22 = vpop.f32.mrb[1].mxu1  ;;  %v7804_v23 = vpop.f32.mrb[9].mxu0  ;;  %v5679_v25 = vcombine.low %v810_v10, %v814_v11 }
 0x251   :  { %2512 = vmatpush1.bf16.msra.mxu1 %v5623_v15  ;;  %v1653_v26 = vpop.f32.mrb[2].mxu1  ;;  %v1776_v28 = vpop.f32.mrb[10].mxu0  ;;  %v5929_v15 = vcombine.low %v5798_v4, %v5802_v5  ;;  %v5723_v4 = vld [vmem:[%s8795_s3 + $0x880] sm:$0xff] }
 0x252   :  { %3490 = vmatpush1.bf16.msra.mxu0 %v5881_v16  ;;  %v1654_v29 = vpop.f32.mrb[3].mxu1  ;;  %v1777_v31 = vpop.f32.mrb[11].mxu0  ;;  %2513 = vmatprep.subr.bf16.mxu1 %v5632_v17  ;;  %v5680_v16 = vcombine.high %v810_v10, %v814_v11  ;;  %v5938_v17 = vcombine.high %v5806_v12, %v5810_v13  ;;  %v5937_v26 = vcombine.low %v5806_v12, %v5810_v13  ;;  %v5727_v5 = vld [vmem:[%s8795_s3 + $0x8a0] sm:$0xff] }
 0x253   :  { %3491 = vmatprep.subr.bf16.mxu0 %v5890_v20  ;;  %v818_v20 = vld [vmem:[%s8795_s3 + $0x350] sm:$0xff]  ;;  %v5852_v12 = vcombine.high %v5723_v4, %v5727_v5 }
 0x254   :  { %v5688_v28 = vcombine.high %v818_v20, %v822_v21  ;;  %v826_v29 = vld [vmem:[%s8795_s3 + $0x390] sm:$0xff] }
 0x255   :  { %2514 = vmatpush1.bf16.msra.mxu1 %v5631_v59  ;;  %v5946_v59 = vcombine.high %v5814_v58, %v5818_v24  ;;  %v830_v31 = vld [vmem:[%s8795_s3 + $0x3b0] sm:$0xff]  ;;  %v5739_v24 = vld [vmem:[%s8795_s3 + $0x900] sm:$0xff] }
 0x256   :  { %3492 = vmatpush1.bf16.msra.mxu0 %v5889_v32  ;;  %2515 = vmatprep.subr.bf16.mxu1 %v5640_v33  ;;  %v5822_v32 = vld [vmem:[%s8795_s3 + $0xb98] sm:$0xff]  ;;  %v5696_v39 = vcombine.high %v826_v29, %v830_v31 }
 0x257   :  { %3493 = vmatprep.subr.bf16.mxu0 %v5898_v36  ;;  %v5826_v33 = vld [vmem:[%s8795_s3 + $0xbb8] sm:$0xff]  ;;  %v5687_v36 = vcombine.low %v818_v20, %v822_v21 }
 0x258   :  { %v5954_v40 = vcombine.high %v5822_v32, %v5826_v33  ;;  %v5953_v46 = vcombine.low %v5822_v32, %v5826_v33  ;;  %v5747_v33 = vld [vmem:[%s8795_s3 + $0x940] sm:$0xff] }
 0x259   :  { %2516 = vmatpush1.bf16.msra.mxu1 %v5639_v42  ;;  %v838_v42 = vld [vmem:[%s8795_s3 + $0x3f0] sm:$0xff] }
 0x25a   :  { %3494 = vmatpush1.bf16.msra.mxu0 %v5897_v43  ;;  %2517 = vmatprep.subr.bf16.mxu1 %v5648_v44  ;;  %v5830_v43 = vld [vmem:[%s8795_s3 + $0xbd8] sm:$0xff]  ;;  %v5704_v47 = vcombine.high %v834_v41, %v838_v42 }
 0x25b   :  { %3495 = vmatprep.subr.bf16.mxu0 %v5906_v45  ;;  %v5834_v44 = vld [vmem:[%s8795_s3 + $0xbf8] sm:$0xff]  ;;  %v5695_v45 = vcombine.low %v826_v29, %v830_v31 }
 0x25c   :  { %v5962_v48 = vcombine.high %v5830_v43, %v5834_v44  ;;  %v5961_v56 = vcombine.low %v5830_v43, %v5834_v44  ;;  %v5755_v44 = vld [vmem:[%s8795_s3 + $0x980] sm:$0xff] }
 0x25d   :  { %2518 = vmatpush1.bf16.msra.mxu1 %v5647_v50  ;;  %v5711_v50 = vld [vmem:[%s8795_s3 + $0x820] sm:$0xff] }
 0x25e   :  { %3496 = vmatpush1.bf16.msra.mxu0 %v5905_v51  ;;  %2519 = vmatprep.subr.bf16.mxu1 %v5656_v54  ;;  %v5964_v51 = vld [vmem:[%s8795_s3 + $0xc08] sm:$0xff]  ;;  %v5836_v57 = vcombine.high %v5707_v49, %v5711_v50 }
 0x25f   :  { %3497 = vmatprep.subr.bf16.mxu0 %v5914_v55  ;;  %v5968_v54 = vld [vmem:[%s8795_s3 + $0xc28] sm:$0xff]  ;;  %v5703_v55 = vcombine.low %v834_v41, %v838_v42 }
 0x260   :  { %v6094_v60 = vcombine.high %v5964_v51, %v5968_v54  ;;  %v6093_v2 = vcombine.low %v5964_v51, %v5968_v54 }
 0x261   :  { %2520 = vmatpush1.bf16.msra.mxu1 %v5655_v62  ;;  %v5719_v62 = vld [vmem:[%s8795_s3 + $0x860] sm:$0xff] }
 0x262   :  { %3498 = vmatpush1.bf16.msra.mxu0 %v5913_v63  ;;  %2521 = vmatprep.subr.bf16.mxu1 %v5664_v0  ;;  %v5835_v63 = vcombine.low %v5707_v49, %v5711_v50  ;;  %v5972_v0 = vld [vmem:[%s8795_s3 + $0xc48] sm:$0xff]  ;;  %v5844_v3 = vcombine.high %v5715_v61, %v5719_v62  ;;  %v5843_v10 = vcombine.low %v5715_v61, %v5719_v62 }
 0x263   :  { %3499 = vmatprep.subr.bf16.mxu0 %v5922_v1  ;;  %v5976_v1 = vld [vmem:[%s8795_s3 + $0xc68] sm:$0xff] }
 0x264   :  { %v6101_v11 = vcombine.low %v5972_v0, %v5976_v1 }
 0x265   :  { %2522 = vmatpush1.bf16.msra.mxu1 %v5663_v6  ;;  %v6102_v6 = vcombine.high %v5972_v0, %v5976_v1  ;;  %v6024_v0 = vld [vmem:[%s8795_s3 + $0xde8] sm:$0xff] }
 0x266   :  { %3500 = vmatpush1.bf16.msra.mxu0 %v5921_v7  ;;  %2523 = vmatprep.subr.bf16.mxu1 %v5672_v8  ;;  %v5980_v7 = vld [vmem:[%s8795_s3 + $0xc88] sm:$0xff] }
 0x267   :  { %3501 = vmatprep.subr.bf16.mxu0 %v5930_v9  ;;  %v5984_v8 = vld [vmem:[%s8795_s3 + $0xca8] sm:$0xff]  ;;  %v7947_v9 = vrot.slane %v7112_v53, 3 }
 0x268   :  { %v6110_v13 = vcombine.high %v5980_v7, %v5984_v8  ;;  %v5988_v53 = vld [vmem:[%s8795_s3 + $0xcc8] sm:$0xff]  ;;  %v6109_v20 = vcombine.low %v5980_v7, %v5984_v8 }
 0x269   :  { %2524 = vmatpush1.bf16.msra.mxu1 %v5671_v14  ;;  %v5731_v14 = vld [vmem:[%s8795_s3 + $0x8c0] sm:$0xff] }
 0x26a   :  { %3502 = vmatpush1.bf16.msra.mxu0 %v5929_v15  ;;  %2525 = vmatprep.subr.bf16.mxu1 %v5680_v16  ;;  %v5735_v15 = vld [vmem:[%s8795_s3 + $0x8e0] sm:$0xff]  ;;  %v5992_v16 = vld [vmem:[%s8795_s3 + $0xce8] sm:$0xff] }
 0x26b   :  { %3503 = vmatprep.subr.bf16.mxu0 %v5938_v17  ;;  %v5851_v17 = vcombine.low %v5723_v4, %v5727_v5  ;;  %v5860_v21 = vcombine.high %v5731_v14, %v5735_v15  ;;  %v6118_v58 = vcombine.high %v5988_v53, %v5992_v16  ;;  %v6117_v29 = vcombine.low %v5988_v53, %v5992_v16 }
 0x26d   :  { %2526 = vmatpush1.bf16.msra.mxu1 %v5679_v25  ;;  %v5743_v25 = vld [vmem:[%s8795_s3 + $0x920] sm:$0xff] }
 0x26e   :  { %3504 = vmatpush1.bf16.msra.mxu0 %v5937_v26  ;;  %2527 = vmatprep.subr.bf16.mxu1 %v5688_v28  ;;  %v5996_v26 = vld [vmem:[%s8795_s3 + $0xd08] sm:$0xff]  ;;  %v5868_v31 = vcombine.high %v5739_v24, %v5743_v25 }
 0x26f   :  { %3505 = vmatprep.subr.bf16.mxu0 %v5946_v59  ;;  %v6000_v28 = vld [vmem:[%s8795_s3 + $0xd28] sm:$0xff]  ;;  %v5859_v59 = vcombine.low %v5731_v14, %v5735_v15 }
 0x270   :  { %v6126_v32 = vcombine.high %v5996_v26, %v6000_v28  ;;  %v6125_v41 = vcombine.low %v5996_v26, %v6000_v28  ;;  %v6032_v14 = vld [vmem:[%s8795_s3 + $0xe28] sm:$0xff] }
 0x271   :  { %2528 = vmatpush1.bf16.msra.mxu1 %v5687_v36  ;;  %v5751_v36 = vld [vmem:[%s8795_s3 + $0x960] sm:$0xff] }
 0x272   :  { %3506 = vmatpush1.bf16.msra.mxu0 %v5945_v38  ;;  %2529 = vmatprep.subr.bf16.mxu1 %v5696_v39  ;;  %v6004_v38 = vld [vmem:[%s8795_s3 + $0xd48] sm:$0xff]  ;;  %v5876_v42 = vcombine.high %v5747_v33, %v5751_v36 }
 0x273   :  { %3507 = vmatprep.subr.bf16.mxu0 %v5954_v40  ;;  %v6008_v39 = vld [vmem:[%s8795_s3 + $0xd68] sm:$0xff]  ;;  %v5867_v40 = vcombine.low %v5739_v24, %v5743_v25 }
 0x274   :  { %v6134_v43 = vcombine.high %v6004_v38, %v6008_v39  ;;  %v6133_v49 = vcombine.low %v6004_v38, %v6008_v39  ;;  %v6040_v24 = vld [vmem:[%s8795_s3 + $0xe68] sm:$0xff] }
 0x275   :  { %2530 = vmatpush1.bf16.msra.mxu1 %v5695_v45  ;;  %v5759_v45 = vld [vmem:[%s8795_s3 + $0x9a0] sm:$0xff] }
 0x276   :  { %3508 = vmatpush1.bf16.msra.mxu0 %v5953_v46  ;;  %2531 = vmatprep.subr.bf16.mxu1 %v5704_v47  ;;  %v6012_v46 = vld [vmem:[%s8795_s3 + $0xd88] sm:$0xff]  ;;  %v5884_v50 = vcombine.high %v5755_v44, %v5759_v45  ;;  %v5883_v4 = vcombine.low %v5755_v44, %v5759_v45 }
 0x277   :  { %3509 = vmatprep.subr.bf16.mxu0 %v5962_v48  ;;  %v6016_v47 = vld [vmem:[%s8795_s3 + $0xda8] sm:$0xff]  ;;  %v5875_v48 = vcombine.low %v5747_v33, %v5751_v36 }
 0x278   :  { %v6141_v7 = vcombine.low %v6012_v46, %v6016_v47  ;;  %v6048_v33 = vld [vmem:[%s8795_s3 + $0xea8] sm:$0xff] }
 0x279   :  { %2532 = vmatpush1.bf16.msra.mxu1 %v5703_v55  ;;  %v6142_v55 = vcombine.high %v6012_v46, %v6016_v47  ;;  %v6056_v44 = vld [vmem:[%s8795_s3 + $0xee8] sm:$0xff] }
 0x27a   :  { %3510 = vmatpush1.bf16.msra.mxu0 %v5961_v56  ;;  %3356 = vmatprep.subr.bf16.mxu1 %v5836_v57  ;;  %v5763_v56 = vld [vmem:[%s8795_s3 + $0x9c0] sm:$0xff] }
 0x27b   :  { %4342 = vmatprep.subr.bf16.mxu0 %v6094_v60  ;;  %v5767_v57 = vld [vmem:[%s8795_s3 + $0x9e0] sm:$0xff] }
 0x27c   :  { %2534 = vmatmul.mubr.bf16.vlgmr.msra.gmra.mrb[16].mxu1 %v7110_v52  ;;  %v5892_v8 = vcombine.high %v5763_v56, %v5767_v57  ;;  %v5891_v15 = vcombine.low %v5763_v56, %v5767_v57 }
 0x27d   :  { %3512 = vmatmul.mubr.bf16.vlgmr.msra.gmra.mrb[24].mxu0 %v7726_v34  ;;  %3357 = vmatpush1.bf16.msra.mxu1 %v5835_v63  ;;  %v6020_v63 = vld [vmem:[%s8795_s3 + $0xdc8] sm:$0xff] }
 0x27e   :  { %3388 = vmatprep.mubr.bf16.mxu1 %v7541_v27  ;;  %4343 = vmatpush1.bf16.msra.mxu0 %v6093_v2  ;;  %v6149_v53 = vcombine.low %v6020_v63, %v6024_v0 }
 0x27f   :  { %4374 = vmatprep.mubr.bf16.mxu0 %v7947_v9  ;;  %3358 = vmatprep.subr.bf16.mxu1 %v5844_v3 }
 0x280   :  { %4344 = vmatprep.subr.bf16.mxu0 %v6102_v6 }
 0x281   :  { %3359 = vmatpush1.bf16.msra.mxu1 %v5843_v10  ;;  %v6150_v10 = vcombine.high %v6020_v63, %v6024_v0  ;;  %v5815_v63 = vld [vmem:[%s8795_s3 + $0xb60] sm:$0xff]  ;;  %v6068_v0 = vld [vmem:[%s8795_s3 + $0xf48] sm:$0xff] }
 0x282   :  { %4345 = vmatpush1.bf16.msra.mxu0 %v6101_v11  ;;  %3360 = vmatprep.subr.bf16.mxu1 %v5852_v12  ;;  %v5771_v11 = vld [vmem:[%s8795_s3 + $0xa00] sm:$0xff] }
 0x283   :  { %4346 = vmatprep.subr.bf16.mxu0 %v6110_v13  ;;  %v5775_v12 = vld [vmem:[%s8795_s3 + $0xa20] sm:$0xff]  ;;  %v6028_v13 = vld [vmem:[%s8795_s3 + $0xe08] sm:$0xff] }
 0x284   :  { %v5900_v16 = vcombine.high %v5771_v11, %v5775_v12  ;;  %v5899_v25 = vcombine.low %v5771_v11, %v5775_v12  ;;  %v6157_v26 = vcombine.low %v6028_v13, %v6032_v14  ;;  %v6080_v11 = vld [vmem:[%s8795_s3 + $0xfa8] sm:$0xff] }
 0x285   :  { %3361 = vmatpush1.bf16.msra.mxu1 %v5851_v17  ;;  %v6158_v17 = vcombine.high %v6028_v13, %v6032_v14 }
 0x286   :  { %4347 = vmatpush1.bf16.msra.mxu0 %v6109_v20  ;;  %3362 = vmatprep.subr.bf16.mxu1 %v5860_v21  ;;  %v5779_v20 = vld [vmem:[%s8795_s3 + $0xa40] sm:$0xff] }
 0x287   :  { %4348 = vmatprep.subr.bf16.mxu0 %v6118_v58  ;;  %v5783_v21 = vld [vmem:[%s8795_s3 + $0xa60] sm:$0xff]  ;;  %v6036_v58 = vld [vmem:[%s8795_s3 + $0xe48] sm:$0xff] }
 0x288   :  { %v5908_v28 = vcombine.high %v5779_v20, %v5783_v21  ;;  %v5907_v36 = vcombine.low %v5779_v20, %v5783_v21  ;;  %v6165_v38 = vcombine.low %v6036_v58, %v6040_v24  ;;  %v6088_v20 = vld [vmem:[%s8795_s3 + $0xfe8] sm:$0xff] }
 0x289   :  { %3363 = vmatpush1.bf16.msra.mxu1 %v5859_v59  ;;  %v6166_v59 = vcombine.high %v6036_v58, %v6040_v24 }
 0x28a   :  { %4349 = vmatpush1.bf16.msra.mxu0 %v6117_v29  ;;  %3364 = vmatprep.subr.bf16.mxu1 %v5868_v31  ;;  %v5787_v29 = vld [vmem:[%s8795_s3 + $0xa80] sm:$0xff] }
 0x28b   :  { %4350 = vmatprep.subr.bf16.mxu0 %v6126_v32  ;;  %v5791_v31 = vld [vmem:[%s8795_s3 + $0xaa0] sm:$0xff]  ;;  %v6044_v32 = vld [vmem:[%s8795_s3 + $0xe88] sm:$0xff] }
 0x28c   :  { %v5916_v39 = vcombine.high %v5787_v29, %v5791_v31  ;;  %v5915_v45 = vcombine.low %v5787_v29, %v5791_v31  ;;  %v6173_v46 = vcombine.low %v6044_v32, %v6048_v33  ;;  %v5970_v29 = vld [vmem:[%s8795_s3 + $0xc38] sm:$0xff] }
 0x28d   :  { %3365 = vmatpush1.bf16.msra.mxu1 %v5867_v40  ;;  %v6174_v40 = vcombine.high %v6044_v32, %v6048_v33 }
 0x28e   :  { %4351 = vmatpush1.bf16.msra.mxu0 %v6125_v41  ;;  %3366 = vmatprep.subr.bf16.mxu1 %v5876_v42  ;;  %v5795_v41 = vld [vmem:[%s8795_s3 + $0xac0] sm:$0xff] }
 0x28f   :  { %v1690_v51 = vpop.f32.mrb[4].mxu1  ;;  %v2494_v54 = vpop.f32.mrb[12].mxu0  ;;  %4352 = vmatprep.subr.bf16.mxu0 %v6134_v43  ;;  %v5799_v42 = vld [vmem:[%s8795_s3 + $0xae0] sm:$0xff]  ;;  %v6052_v43 = vld [vmem:[%s8795_s3 + $0xec8] sm:$0xff] }
 0x290   :  { %v8005_v60 = vadd.f32 %v2494_v54, %v1690_v51  ;;  %v1692_v61 = vpop.f32.mrb[5].mxu1  ;;  %v2496_v62 = vpop.f32.mrb[13].mxu0  ;;  %v5924_v47 = vcombine.high %v5795_v41, %v5799_v42  ;;  %v6060_v51 = vld [vmem:[%s8795_s3 + $0xf08] sm:$0xff]  ;;  %v6181_v56 = vcombine.low %v6052_v43, %v6056_v44 }
 0x291   :  { %v8013_v1 = vadd.f32 %v2496_v62, %v1692_v61  ;;  %v1694_v2 = vpop.f32.mrb[6].mxu1  ;;  %v2498_v3 = vpop.f32.mrb[14].mxu0  ;;  %3367 = vmatpush1.bf16.msra.mxu1 %v5875_v48  ;;  %v6182_v48 = vcombine.high %v6052_v43, %v6056_v44  ;;  %v6064_v54 = vld [vmem:[%s8795_s3 + $0xf28] sm:$0xff]  ;;  %v5811_v62 = vld [vmem:[%s8795_s3 + $0xb40] sm:$0xff]  ;;  %v8136_v44 = vrot.slane %v7110_v52, 3  ;;  %v5986_v52 = vld [vmem:[%s8795_s3 + $0xcb8] sm:$0xff] }
 0x292   :  { %4353 = vmatpush1.bf16.msra.mxu0 %v6133_v49  ;;  %v1695_v5 = vpop.f32.mrb[7].mxu1  ;;  %v2499_v6 = vpop.f32.mrb[15].mxu0  ;;  %3368 = vmatprep.subr.bf16.mxu1 %v5884_v50  ;;  %v5803_v49 = vld [vmem:[%s8795_s3 + $0xb00] sm:$0xff]  ;;  %v6190_v61 = vcombine.high %v6060_v51, %v6064_v54  ;;  %v6072_v2 = vld [vmem:[%s8795_s3 + $0xf68] sm:$0xff]  ;;  %v5939_v12 = vcombine.low %v5811_v62, %v5815_v63 }
 0x293   :  { %4354 = vmatprep.subr.bf16.mxu0 %v6142_v55  ;;  %v5807_v50 = vld [vmem:[%s8795_s3 + $0xb20] sm:$0xff]  ;;  %v5923_v55 = vcombine.low %v5795_v41, %v5799_v42  ;;  %v5940_v5 = vcombine.high %v5811_v62, %v5815_v63  ;;  %v6198_v6 = vcombine.high %v6068_v0, %v6072_v2  ;;  %v6197_v13 = vcombine.low %v6068_v0, %v6072_v2  ;;  %v5974_v41 = vld [vmem:[%s8795_s3 + $0xc58] sm:$0xff] }
 0x294   :  { %v5932_v57 = vcombine.high %v5803_v49, %v5807_v50  ;;  %v5931_v3 = vcombine.low %v5803_v49, %v5807_v50  ;;  %v5978_v42 = vld [vmem:[%s8795_s3 + $0xc78] sm:$0xff] }
 0x295   :  { %3369 = vmatpush1.bf16.msra.mxu1 %v5883_v4  ;;  %v6189_v4 = vcombine.low %v6060_v51, %v6064_v54  ;;  %v5982_v49 = vld [vmem:[%s8795_s3 + $0xc98] sm:$0xff]  ;;  %v6105_v51 = vcombine.low %v5974_v41, %v5978_v42 }
 0x296   :  { %4355 = vmatpush1.bf16.msra.mxu0 %v6141_v7  ;;  %3370 = vmatprep.subr.bf16.mxu1 %v5892_v8  ;;  %v5819_v7 = vld [vmem:[%s8795_s3 + $0xb80] sm:$0xff]  ;;  %v6113_v63 = vcombine.low %v5982_v49, %v5986_v52 }
 0x297   :  { %4356 = vmatprep.subr.bf16.mxu0 %v6150_v10  ;;  %v5823_v8 = vld [vmem:[%s8795_s3 + $0xba0] sm:$0xff]  ;;  %v6076_v10 = vld [vmem:[%s8795_s3 + $0xf88] sm:$0xff] }
 0x298   :  { %v5948_v14 = vcombine.high %v5819_v7, %v5823_v8  ;;  %v5947_v21 = vcombine.low %v5819_v7, %v5823_v8  ;;  %v6205_v58 = vcombine.low %v6076_v10, %v6080_v11 }
 0x299   :  { %3371 = vmatpush1.bf16.msra.mxu1 %v5891_v15  ;;  %v6206_v15 = vcombine.high %v6076_v10, %v6080_v11 }
 0x29a   :  { %4357 = vmatpush1.bf16.msra.mxu0 %v6149_v53  ;;  %3372 = vmatprep.subr.bf16.mxu1 %v5900_v16  ;;  %v5827_v53 = vld [vmem:[%s8795_s3 + $0xbc0] sm:$0xff] }
 0x29b   :  { %4358 = vmatprep.subr.bf16.mxu0 %v6158_v17  ;;  %v5831_v16 = vld [vmem:[%s8795_s3 + $0xbe0] sm:$0xff]  ;;  %v6084_v17 = vld [vmem:[%s8795_s3 + $0xfc8] sm:$0xff] }
 0x29c   :  { %v5956_v24 = vcombine.high %v5827_v53, %v5831_v16  ;;  %v5955_v31 = vcombine.low %v5827_v53, %v5831_v16  ;;  %v6213_v32 = vcombine.low %v6084_v17, %v6088_v20 }
 0x29d   :  { %3373 = vmatpush1.bf16.msra.mxu1 %v5899_v25  ;;  %v6214_v25 = vcombine.high %v6084_v17, %v6088_v20 }
 0x29e   :  { %4359 = vmatpush1.bf16.msra.mxu0 %v6157_v26  ;;  %3374 = vmatprep.subr.bf16.mxu1 %v5908_v28  ;;  %v5709_v26 = vld [vmem:[%s8795_s3 + $0x810] sm:$0xff] }
 0x29f   :  { %4360 = vmatprep.subr.bf16.mxu0 %v6166_v59  ;;  %v5713_v28 = vld [vmem:[%s8795_s3 + $0x830] sm:$0xff]  ;;  %v5966_v59 = vld [vmem:[%s8795_s3 + $0xc18] sm:$0xff] }
 0x2a0   :  { %v5840_v33 = vcombine.high %v5709_v26, %v5713_v28  ;;  %v6097_v43 = vcombine.low %v5966_v59, %v5970_v29 }
 0x2a1   :  { %3375 = vmatpush1.bf16.msra.mxu1 %v5907_v36  ;;  %v6098_v36 = vcombine.high %v5966_v59, %v5970_v29 }
 0x2a2   :  { %4361 = vmatpush1.bf16.msra.mxu0 %v6165_v38  ;;  %3376 = vmatprep.subr.bf16.mxu1 %v5916_v39  ;;  %v5717_v38 = vld [vmem:[%s8795_s3 + $0x850] sm:$0xff] }
 0x2a3   :  { %4362 = vmatprep.subr.bf16.mxu0 %v6174_v40  ;;  %v5721_v39 = vld [vmem:[%s8795_s3 + $0x870] sm:$0xff]  ;;  %v5839_v40 = vcombine.low %v5709_v26, %v5713_v28 }
 0x2a4   :  { %v5847_v50 = vcombine.low %v5717_v38, %v5721_v39 }
 0x2a5   :  { %3377 = vmatpush1.bf16.msra.mxu1 %v5915_v45  ;;  %v5848_v45 = vcombine.high %v5717_v38, %v5721_v39  ;;  %v6022_v39 = vld [vmem:[%s8795_s3 + $0xdd8] sm:$0xff] }
 0x2a6   :  { %4363 = vmatpush1.bf16.msra.mxu0 %v6173_v46  ;;  %3378 = vmatprep.subr.bf16.mxu1 %v5924_v47  ;;  %v5725_v46 = vld [vmem:[%s8795_s3 + $0x890] sm:$0xff] }
 0x2a7   :  { %4364 = vmatprep.subr.bf16.mxu0 %v6182_v48  ;;  %v5729_v47 = vld [vmem:[%s8795_s3 + $0x8b0] sm:$0xff]  ;;  %v6106_v48 = vcombine.high %v5974_v41, %v5978_v42 }
 0x2a8   :  { %v5856_v54 = vcombine.high %v5725_v46, %v5729_v47  ;;  %v5855_v62 = vcombine.low %v5725_v46, %v5729_v47 }
 0x2a9   :  { %3379 = vmatpush1.bf16.msra.mxu1 %v5923_v55  ;;  %v6114_v55 = vcombine.high %v5982_v49, %v5986_v52 }
 0x2aa   :  { %4365 = vmatpush1.bf16.msra.mxu0 %v6181_v56  ;;  %3380 = vmatprep.subr.bf16.mxu1 %v5932_v57  ;;  %v5733_v56 = vld [vmem:[%s8795_s3 + $0x8d0] sm:$0xff] }
 0x2ab   :  { %4366 = vmatprep.subr.bf16.mxu0 %v6190_v61  ;;  %v5737_v57 = vld [vmem:[%s8795_s3 + $0x8f0] sm:$0xff]  ;;  %v5994_v61 = vld [vmem:[%s8795_s3 + $0xcf8] sm:$0xff] }
 0x2ac   :  { %v5864_v0 = vcombine.high %v5733_v56, %v5737_v57  ;;  %v5863_v7 = vcombine.low %v5733_v56, %v5737_v57 }
 0x2ad   :  { %3381 = vmatpush1.bf16.msra.mxu1 %v5931_v3  ;;  %v5741_v3 = vld [vmem:[%s8795_s3 + $0x910] sm:$0xff] }
 0x2ae   :  { %4367 = vmatpush1.bf16.msra.mxu0 %v6189_v4  ;;  %3382 = vmatprep.subr.bf16.mxu1 %v5940_v5  ;;  %v5745_v4 = vld [vmem:[%s8795_s3 + $0x930] sm:$0xff]  ;;  %v5998_v5 = vld [vmem:[%s8795_s3 + $0xd18] sm:$0xff] }
 0x2af   :  { %4368 = vmatprep.subr.bf16.mxu0 %v6198_v6  ;;  %v6002_v6 = vld [vmem:[%s8795_s3 + $0xd38] sm:$0xff]  ;;  %v5872_v10 = vcombine.high %v5741_v3, %v5745_v4  ;;  %v5871_v53 = vcombine.low %v5741_v3, %v5745_v4 }
 0x2b0   :  { %v6130_v11 = vcombine.high %v5998_v5, %v6002_v6  ;;  %v6129_v16 = vcombine.low %v5998_v5, %v6002_v6 }
 0x2b1   :  { %3383 = vmatpush1.bf16.msra.mxu1 %v5939_v12  ;;  %v5749_v12 = vld [vmem:[%s8795_s3 + $0x950] sm:$0xff] }
 0x2b2   :  { %4369 = vmatpush1.bf16.msra.mxu0 %v6197_v13  ;;  %3384 = vmatprep.subr.bf16.mxu1 %v5948_v14  ;;  %v5753_v13 = vld [vmem:[%s8795_s3 + $0x970] sm:$0xff]  ;;  %v6006_v14 = vld [vmem:[%s8795_s3 + $0xd58] sm:$0xff] }
 0x2b3   :  { %4370 = vmatprep.subr.bf16.mxu0 %v6206_v15  ;;  %v6010_v15 = vld [vmem:[%s8795_s3 + $0xd78] sm:$0xff]  ;;  %v5880_v17 = vcombine.high %v5749_v12, %v5753_v13  ;;  %v5879_v26 = vcombine.low %v5749_v12, %v5753_v13 }
 0x2b4   :  { %v6138_v20 = vcombine.high %v6006_v14, %v6010_v15  ;;  %v6137_v28 = vcombine.low %v6006_v14, %v6010_v15 }
 0x2b5   :  { %3385 = vmatpush1.bf16.msra.mxu1 %v5947_v21  ;;  %v5757_v21 = vld [vmem:[%s8795_s3 + $0x990] sm:$0xff] }
 0x2b6   :  { %4371 = vmatpush1.bf16.msra.mxu0 %v6205_v58  ;;  %3386 = vmatprep.subr.bf16.mxu1 %v5956_v24  ;;  %v5761_v58 = vld [vmem:[%s8795_s3 + $0x9b0] sm:$0xff]  ;;  %v6014_v24 = vld [vmem:[%s8795_s3 + $0xd98] sm:$0xff] }
 0x2b7   :  { %4372 = vmatprep.subr.bf16.mxu0 %v6214_v25  ;;  %v6018_v25 = vld [vmem:[%s8795_s3 + $0xdb8] sm:$0xff]  ;;  %v5888_v59 = vcombine.high %v5757_v21, %v5761_v58 }
 0x2b8   :  { %v6145_v49 = vcombine.low %v6014_v24, %v6018_v25 }
 0x2b9   :  { %3387 = vmatpush1.bf16.msra.mxu1 %v5955_v31  ;;  %v6146_v31 = vcombine.high %v6014_v24, %v6018_v25 }
 0x2ba   :  { %4373 = vmatpush1.bf16.msra.mxu0 %v6213_v32  ;;  %3438 = vmatprep.subr.bf16.mxu1 %v5840_v33  ;;  %v5765_v32 = vld [vmem:[%s8795_s3 + $0x9d0] sm:$0xff] }
 0x2bb   :  { %4424 = vmatprep.subr.bf16.mxu0 %v6098_v36  ;;  %v5769_v33 = vld [vmem:[%s8795_s3 + $0x9f0] sm:$0xff] }
 0x2bc   :  { %3389 = vmatmul.mubr.bf16.vlgmr.msra.gmra.mrb[20].mxu1 %v7726_v34  ;;  %v5896_v52 = vcombine.high %v5765_v32, %v5769_v33  ;;  %v5895_v56 = vcombine.low %v5765_v32, %v5769_v33 }
 0x2bd   :  { %4375 = vmatmul.mubr.bf16.vlgmr.msra.gmra.mrb[28].mxu0 %v8136_v44  ;;  %3439 = vmatpush1.bf16.msra.mxu1 %v5839_v40  ;;  %v6026_v40 = vld [vmem:[%s8795_s3 + $0xdf8] sm:$0xff] }
 0x2be   :  { %3470 = vmatprep.mubr.bf16.mxu1 %v7541_v27  ;;  %4425 = vmatpush1.bf16.msra.mxu0 %v6097_v43  ;;  %v5990_v27 = vld [vmem:[%s8795_s3 + $0xcd8] sm:$0xff]  ;;  %v6153_v57 = vcombine.low %v6022_v39, %v6026_v40 }
 0x2bf   :  { %4456 = vmatprep.mubr.bf16.mxu0 %v7947_v9  ;;  %3440 = vmatprep.subr.bf16.mxu1 %v5848_v45  ;;  %v6122_v2 = vcombine.high %v5990_v27, %v5994_v61  ;;  %v6121_v8 = vcombine.low %v5990_v27, %v5994_v61  ;;  %v5887_v45 = vcombine.low %v5757_v21, %v5761_v58 }
 0x2c0   :  { %4426 = vmatprep.subr.bf16.mxu0 %v6106_v48 }
 0x2c1   :  { %3441 = vmatpush1.bf16.msra.mxu1 %v5847_v50 }
 0x2c2   :  { %4427 = vmatpush1.bf16.msra.mxu0 %v6105_v51  ;;  %3442 = vmatprep.subr.bf16.mxu1 %v5856_v54  ;;  %v6154_v51 = vcombine.high %v6022_v39, %v6026_v40  ;;  %v5777_v54 = vld [vmem:[%s8795_s3 + $0xa30] sm:$0xff] }
 0x2c3   :  { %4428 = vmatprep.subr.bf16.mxu0 %v6114_v55  ;;  %v6034_v55 = vld [vmem:[%s8795_s3 + $0xe38] sm:$0xff]  ;;  %v5813_v40 = vld [vmem:[%s8795_s3 + $0xb50] sm:$0xff] }
 0x2c5   :  { %3443 = vmatpush1.bf16.msra.mxu1 %v5855_v62  ;;  %v5781_v62 = vld [vmem:[%s8795_s3 + $0xa50] sm:$0xff] }
 0x2c6   :  { %4429 = vmatpush1.bf16.msra.mxu0 %v6113_v63  ;;  %3444 = vmatprep.subr.bf16.mxu1 %v5864_v0  ;;  %v5785_v63 = vld [vmem:[%s8795_s3 + $0xa70] sm:$0xff]  ;;  %v6038_v0 = vld [vmem:[%s8795_s3 + $0xe58] sm:$0xff] }
 0x2c7   :  { %4430 = vmatprep.subr.bf16.mxu0 %v6122_v2  ;;  %v6042_v2 = vld [vmem:[%s8795_s3 + $0xe78] sm:$0xff]  ;;  %v5912_v5 = vcombine.high %v5781_v62, %v5785_v63  ;;  %v5911_v12 = vcombine.low %v5781_v62, %v5785_v63 }
 0x2c8   :  { %v6170_v6 = vcombine.high %v6038_v0, %v6042_v2  ;;  %v6169_v13 = vcombine.low %v6038_v0, %v6042_v2  ;;  %v6086_v62 = vld [vmem:[%s8795_s3 + $0xfd8] sm:$0xff] }
 0x2c9   :  { %3445 = vmatpush1.bf16.msra.mxu1 %v5863_v7  ;;  %v5789_v7 = vld [vmem:[%s8795_s3 + $0xa90] sm:$0xff]  ;;  %v6090_v63 = vld [vmem:[%s8795_s3 + $0xff8] sm:$0xff] }
 0x2ca   :  { %4431 = vmatpush1.bf16.msra.mxu0 %v6121_v8  ;;  %3446 = vmatprep.subr.bf16.mxu1 %v5872_v10  ;;  %v5793_v8 = vld [vmem:[%s8795_s3 + $0xab0] sm:$0xff]  ;;  %v6046_v10 = vld [vmem:[%s8795_s3 + $0xe98] sm:$0xff] }
 0x2cb   :  { %4432 = vmatprep.subr.bf16.mxu0 %v6130_v11  ;;  %v6050_v11 = vld [vmem:[%s8795_s3 + $0xeb8] sm:$0xff]  ;;  %v5920_v14 = vcombine.high %v5789_v7, %v5793_v8  ;;  %v5919_v21 = vcombine.low %v5789_v7, %v5793_v8  ;;  %v6217_v8 = vcombine.low %v6086_v62, %v6090_v63 }
 0x2cc   :  { %v6178_v15 = vcombine.high %v6046_v10, %v6050_v11  ;;  %v6177_v58 = vcombine.low %v6046_v10, %v6050_v11  ;;  %v5971_v11 = vld [vmem:[%s8795_s3 + $0xc40] sm:$0xff] }
 0x2cd   :  { %3447 = vmatpush1.bf16.msra.mxu1 %v5871_v53  ;;  %v5797_v53 = vld [vmem:[%s8795_s3 + $0xad0] sm:$0xff] }
 0x2ce   :  { %4433 = vmatpush1.bf16.msra.mxu0 %v6129_v16  ;;  %3448 = vmatprep.subr.bf16.mxu1 %v5880_v17  ;;  %v5801_v16 = vld [vmem:[%s8795_s3 + $0xaf0] sm:$0xff]  ;;  %v6054_v17 = vld [vmem:[%s8795_s3 + $0xed8] sm:$0xff] }
 0x2cf   :  { %v8202_v29 = vpop.f32.mrb[8].mxu1  ;;  %4434 = vmatprep.subr.bf16.mxu0 %v6138_v20  ;;  %v6058_v20 = vld [vmem:[%s8795_s3 + $0xef8] sm:$0xff]  ;;  %v5928_v24 = vcombine.high %v5797_v53, %v5801_v16  ;;  %v5927_v32 = vcombine.low %v5797_v53, %v5801_v16  ;;  %v5979_v53 = vld [vmem:[%s8795_s3 + $0xc80] sm:$0xff] }
 0x2d0   :  { %v2576_v36 = vpop.f32.mrb[16].mxu0  ;;  %v8210_v38 = vpop.f32.mrb[9].mxu1  ;;  %v6186_v25 = vcombine.high %v6054_v17, %v6058_v20  ;;  %v6185_v33 = vcombine.low %v6054_v17, %v6058_v20  ;;  %v5983_v16 = vld [vmem:[%s8795_s3 + $0xca0] sm:$0xff]  ;;  %v6515_v20 = vld [vmem:[%s8797_s5 + $0xc8] sm:$0xff]  }
 0x2d1   :  { %v8219_v41 = vadd.f32 %v2576_v36, %v7794_v19  ;;  %v2578_v42 = vpop.f32.mrb[17].mxu0  ;;  %v1735_v43 = vpop.f32.mrb[10].mxu1  ;;  %3449 = vmatpush1.bf16.msra.mxu1 %v5879_v26  ;;  %v5773_v19 = vld [vmem:[%s8795_s3 + $0xa10] sm:$0xff]  ;;  %v6514_v17 = vld [vmem:[%s8797_s5 + $0x80] sm:$0xff]  }
 0x2d2   :  { %v8222_v46 = vadd.f32 %v2578_v42, %v7804_v23  ;;  %v2580_v47 = vpop.f32.mrb[18].mxu0  ;;  %4435 = vmatpush1.bf16.msra.mxu0 %v6137_v28  ;;  %v1736_v48 = vpop.f32.mrb[11].mxu1  ;;  %3450 = vmatprep.subr.bf16.mxu1 %v5888_v59  ;;  %v6030_v23 = vld [vmem:[%s8795_s3 + $0xe18] sm:$0xff]  ;;  %v5904_v27 = vcombine.high %v5773_v19, %v5777_v54  ;;  %v5903_v3 = vcombine.low %v5773_v19, %v5777_v54  ;;  %v5805_v26 = vld [vmem:[%s8795_s3 + $0xb10] sm:$0xff] }
 0x2d3   :  { %v2581_v50 = vpop.f32.mrb[19].mxu0  ;;  %4436 = vmatprep.subr.bf16.mxu0 %v6146_v31  ;;  %v6162_v61 = vcombine.high %v6030_v23, %v6034_v55  ;;  %v6161_v4 = vcombine.low %v6030_v23, %v6034_v55  ;;  %v5809_v28 = vld [vmem:[%s8795_s3 + $0xb30] sm:$0xff]  ;;  %v6062_v59 = vld [vmem:[%s8795_s3 + $0xf18] sm:$0xff] }
 0x2d4   :  { %v6066_v31 = vld [vmem:[%s8795_s3 + $0xf38] sm:$0xff]  ;;  %v5936_v36 = vcombine.high %v5805_v26, %v5809_v28  ;;  %v5817_v42 = vld [vmem:[%s8795_s3 + $0xb70] sm:$0xff]  ;;  %v5935_v47 = vcombine.low %v5805_v26, %v5809_v28  ;;  %v6107_v28 = vcombine.low %v5979_v53, %v5983_v16 }
 0x2d5   :  { %3451 = vmatpush1.bf16.msra.mxu1 %v5887_v45  ;;  %v6194_v39 = vcombine.high %v6062_v59, %v6066_v31  ;;  %v6070_v43 = vld [vmem:[%s8795_s3 + $0xf58] sm:$0xff]  ;;  %v6193_v48 = vcombine.low %v6062_v59, %v6066_v31  ;;  %v5821_v50 = vld [vmem:[%s8795_s3 + $0xb90] sm:$0xff]  ;;  %v5943_v23 = vcombine.low %v5813_v40, %v5817_v42  ;;  %v5995_v31 = vld [vmem:[%s8795_s3 + $0xd00] sm:$0xff] }
 0x2d6   :  { %4437 = vmatpush1.bf16.msra.mxu0 %v6145_v49  ;;  %3452 = vmatprep.subr.bf16.mxu1 %v5896_v52  ;;  %v6074_v45 = vld [vmem:[%s8795_s3 + $0xf78] sm:$0xff]  ;;  %v5944_v49 = vcombine.high %v5813_v40, %v5817_v42  ;;  %v6517_v26 = vld [vmem:[%s8797_s5 + $0xd0] sm:$0xff]   ;;  %v6003_v42 = vld [vmem:[%s8795_s3 + $0xd40] sm:$0xff] }
 0x2d7   :  { %4438 = vmatprep.subr.bf16.mxu0 %v6154_v51  ;;  %v6202_v52 = vcombine.high %v6070_v43, %v6074_v45  ;;  %v5825_v51 = vld [vmem:[%s8795_s3 + $0xbb0] sm:$0xff]  ;;  %v6078_v19 = vld [vmem:[%s8795_s3 + $0xf98] sm:$0xff]  ;;  %v6201_v55 = vcombine.low %v6070_v43, %v6074_v45  ;;  %v6007_v43 = vld [vmem:[%s8795_s3 + $0xd60] sm:$0xff] }
 0x2d8   :  { %v6082_v54 = vld [vmem:[%s8795_s3 + $0xfb8] sm:$0xff]  ;;  %v5951_v0 = vcombine.low %v5821_v50, %v5825_v51 }
 0x2d9   :  { %3453 = vmatpush1.bf16.msra.mxu1 %v5895_v56  ;;  %v5952_v56 = vcombine.high %v5821_v50, %v5825_v51  ;;  %v6209_v2 = vcombine.low %v6078_v19, %v6082_v54  ;;  %v6520_v45 = vld [vmem:[%s8797_s5 + $0x98] sm:$0xff]   ;;  %v6015_v50 = vld [vmem:[%s8795_s3 + $0xda0] sm:$0xff] }
 0x2da   :  { %4439 = vmatpush1.bf16.msra.mxu0 %v6153_v57  ;;  %3454 = vmatprep.subr.bf16.mxu1 %v5904_v27  ;;  %v6210_v57 = vcombine.high %v6078_v19, %v6082_v54  ;;  %v5829_v27 = vld [vmem:[%s8795_s3 + $0xbd0] sm:$0xff]  ;;  %v6522_v51 = vld [vmem:[%s8797_s5 + $0xa0] sm:$0xff]   ;;  %v6523_v19 = vld [vmem:[%s8797_s5 + $0xe8] sm:$0xff]   ;;  %v6131_v54 = vcombine.low %v6003_v42, %v6007_v43 }
 0x2db   :  { %4440 = vmatprep.subr.bf16.mxu0 %v6162_v61  ;;  %v5833_v61 = vld [vmem:[%s8795_s3 + $0xbf0] sm:$0xff] }
 0x2dc   :  { %v5959_v7 = vcombine.low %v5829_v27, %v5833_v61 }
 0x2dd   :  { %3455 = vmatpush1.bf16.msra.mxu1 %v5903_v3  ;;  %v5960_v3 = vcombine.high %v5829_v27, %v5833_v61  ;;  %v6524_v27 = vld [vmem:[%s8797_s5 + $0xa8] sm:$0xff]  }
 0x2de   :  { %4441 = vmatpush1.bf16.msra.mxu0 %v6161_v4  ;;  %3456 = vmatprep.subr.bf16.mxu1 %v5912_v5  ;;  %v6218_v4 = vcombine.high %v6086_v62, %v6090_v63  ;;  %v5963_v5 = vld [vmem:[%s8795_s3 + $0xc00] sm:$0xff] }
 0x2df   :  { %4442 = vmatprep.subr.bf16.mxu0 %v6170_v6  ;;  %v5967_v6 = vld [vmem:[%s8795_s3 + $0xc20] sm:$0xff] }
 0x2e0   :  { %v6092_v10 = vcombine.high %v5963_v5, %v5967_v6 }
 0x2e1   :  { %3457 = vmatpush1.bf16.msra.mxu1 %v5911_v12  ;;  %v5975_v12 = vld [vmem:[%s8795_s3 + $0xc60] sm:$0xff] }
 0x2e2   :  { %4443 = vmatpush1.bf16.msra.mxu0 %v6169_v13  ;;  %3458 = vmatprep.subr.bf16.mxu1 %v5920_v14  ;;  %v6091_v13 = vcombine.low %v5963_v5, %v5967_v6  ;;  %v6513_v14 = vld [vmem:[%s8797_s5 + $0xc0] sm:$0xff]  }
 0x2e3   :  { %4444 = vmatprep.subr.bf16.mxu0 %v6178_v15  ;;  %v6100_v15 = vcombine.high %v5971_v11, %v5975_v12 }
 0x2e5   :  { %3459 = vmatpush1.bf16.msra.mxu1 %v5919_v21  ;;  %v6099_v21 = vcombine.low %v5971_v11, %v5975_v12  ;;  %v6031_v11 = vld [vmem:[%s8795_s3 + $0xe20] sm:$0xff] }
 0x2e6   :  { %4445 = vmatpush1.bf16.msra.mxu0 %v6177_v58  ;;  %3460 = vmatprep.subr.bf16.mxu1 %v5928_v24  ;;  %v6108_v58 = vcombine.high %v5979_v53, %v5983_v16  ;;  %v5987_v24 = vld [vmem:[%s8795_s3 + $0xcc0] sm:$0xff]  ;;  %v6528_v16 = vld [vmem:[%s8797_s5 + $0xb8] sm:$0xff]  }
 0x2e7   :  { %4446 = vmatprep.subr.bf16.mxu0 %v6186_v25  ;;  %v6516_v25 = vld [vmem:[%s8797_s5 + $0x88] sm:$0xff]   ;;  %v6039_v53 = vld [vmem:[%s8795_s3 + $0xe60] sm:$0xff] }
 0x2e9   :  { %3461 = vmatpush1.bf16.msra.mxu1 %v5927_v32  ;;  %v5999_v32 = vld [vmem:[%s8795_s3 + $0xd20] sm:$0xff] }
 0x2ea   :  { %4447 = vmatpush1.bf16.msra.mxu0 %v6185_v33  ;;  %3462 = vmatprep.subr.bf16.mxu1 %v5936_v36  ;;  %v6518_v33 = vld [vmem:[%s8797_s5 + $0x90] sm:$0xff]   ;;  %v6519_v36 = vld [vmem:[%s8797_s5 + $0xd8] sm:$0xff]   ;;  %v6124_v40 = vcombine.high %v5995_v31, %v5999_v32 }
 0x2eb   :  { %4448 = vmatprep.subr.bf16.mxu0 %v6194_v39 }
 0x2ed   :  { %3463 = vmatpush1.bf16.msra.mxu1 %v5935_v47  ;;  %v6521_v47 = vld [vmem:[%s8797_s5 + $0xe0] sm:$0xff]  }
 0x2ee   :  { %4449 = vmatpush1.bf16.msra.mxu0 %v6193_v48  ;;  %3464 = vmatprep.subr.bf16.mxu1 %v5944_v49  ;;  %v6123_v48 = vcombine.low %v5995_v31, %v5999_v32  ;;  %v6132_v49 = vcombine.high %v6003_v42, %v6007_v43  ;;  %v6059_v32 = vld [vmem:[%s8795_s3 + $0xf00] sm:$0xff] }
 0x2ef   :  { %4450 = vmatprep.subr.bf16.mxu0 %v6202_v52  ;;  %v6011_v52 = vld [vmem:[%s8795_s3 + $0xd80] sm:$0xff] }
 0x2f0   :  { %v6139_v5 = vcombine.low %v6011_v52, %v6015_v50  ;;  %v6071_v42 = vld [vmem:[%s8795_s3 + $0xf60] sm:$0xff] }
 0x2f1   :  { %3465 = vmatpush1.bf16.msra.mxu1 %v5943_v23  ;;  %v6140_v23 = vcombine.high %v6011_v52, %v6015_v50  ;;  %v6083_v50 = vld [vmem:[%s8795_s3 + $0xfc0] sm:$0xff] }
 0x2f2   :  { %4451 = vmatpush1.bf16.msra.mxu0 %v6201_v55  ;;  %3466 = vmatprep.subr.bf16.mxu1 %v5952_v56  ;;  %v6019_v56 = vld [vmem:[%s8795_s3 + $0xdc0] sm:$0xff] }
 0x2f3   :  { %4452 = vmatprep.subr.bf16.mxu0 %v6210_v57  ;;  %v6023_v57 = vld [vmem:[%s8795_s3 + $0xde0] sm:$0xff] }
 0x2f4   :  { %v6147_v12 = vcombine.low %v6019_v56, %v6023_v57 }
 0x2f5   :  { %3467 = vmatpush1.bf16.msra.mxu1 %v5951_v0 }
 0x2f6   :  { %4453 = vmatpush1.bf16.msra.mxu0 %v6209_v2  ;;  %3468 = vmatprep.subr.bf16.mxu1 %v5960_v3 }
 0x2f7   :  { %4454 = vmatprep.subr.bf16.mxu0 %v6218_v4 }
 0x2f9   :  { %3469 = vmatpush1.bf16.msra.mxu1 %v5959_v7 }
 0x2fa   :  { %4455 = vmatpush1.bf16.msra.mxu0 %v6217_v8  ;;  %4301 = vmatprep.subr.bf16.mxu1 %v6092_v10  ;;  %v6525_v10 = vld [vmem:[%s8797_s5 + $0xf0] sm:$0xff]  }
 0x2fb   :  { %6307 = vmatprep.subr.bf16.mxu0 %v6513_v14  ;;  %v6527_v14 = vld [vmem:[%s8797_s5 + $0xf8] sm:$0xff]  }
 0x2fc   :  { %3471 = vmatmul.mubr.bf16.vlgmr.msra.gmra.mrb[24].mxu1 %v7726_v34  ;;  %v5991_v34 = vld [vmem:[%s8795_s3 + $0xce0] sm:$0xff] }
 0x2fd   :  { %4457 = vmatmul.mubr.bf16.vlgmr.msra.gmra.mrb[32].mxu0 %v8136_v44  ;;  %4302 = vmatpush1.bf16.msra.mxu1 %v6091_v13  ;;  %v6116_v59 = vcombine.high %v5987_v24, %v5991_v34  ;;  %v6115_v39 = vcombine.low %v5987_v24, %v5991_v34  ;;  %v6529_v24 = vld [vmem:[%s8797_s5 + $0x1c0] sm:$0xff]  }
 0x2fe   :  { %4333 = vmatprep.mubr.bf16.mxu1 %v7947_v9  ;;  %4303 = vmatprep.subr.bf16.mxu1 %v6100_v15  ;;  %v6035_v15 = vld [vmem:[%s8795_s3 + $0xe40] sm:$0xff] }
 0x2ff   :  { %6308 = vmatpush3.bf16.msra.mxu0 %v6514_v17  ;;  %v6163_v34 = vcombine.low %v6035_v15, %v6039_v53 }
 0x300   :  { %6309 = vmatprep.subr.bf16.mxu0 %v6515_v20  ;;  %v6164_v20 = vcombine.high %v6035_v15, %v6039_v53 }
 0x301   :  { %4304 = vmatpush1.bf16.msra.mxu1 %v6099_v21  ;;  %v6043_v21 = vld [vmem:[%s8795_s3 + $0xe80] sm:$0xff] }
 0x302   :  { %4305 = vmatprep.subr.bf16.mxu1 %v6108_v58  ;;  %v6047_v58 = vld [vmem:[%s8795_s3 + $0xea0] sm:$0xff] }
 0x303   :  { %6310 = vmatpush3.bf16.msra.mxu0 %v6516_v25  ;;  %v6172_v25 = vcombine.high %v6043_v21, %v6047_v58 }
 0x304   :  { %6311 = vmatprep.subr.bf16.mxu0 %v6517_v26  ;;  %v6051_v26 = vld [vmem:[%s8795_s3 + $0xec0] sm:$0xff] }
 0x305   :  { %4306 = vmatpush1.bf16.msra.mxu1 %v6107_v28  ;;  %v6055_v28 = vld [vmem:[%s8795_s3 + $0xee0] sm:$0xff] }
 0x306   :  { %4307 = vmatprep.subr.bf16.mxu1 %v6116_v59  ;;  %v6171_v59 = vcombine.low %v6043_v21, %v6047_v58  ;;  %v6180_v31 = vcombine.high %v6051_v26, %v6055_v28 }
 0x307   :  { %6312 = vmatpush3.bf16.msra.mxu0 %v6518_v33  ;;  %v6063_v33 = vld [vmem:[%s8795_s3 + $0xf20] sm:$0xff] }
 0x308   :  { %6313 = vmatprep.subr.bf16.mxu0 %v6519_v36  ;;  %v6179_v36 = vcombine.low %v6051_v26, %v6055_v28  ;;  %v6187_v43 = vcombine.low %v6059_v32, %v6063_v33 }
 0x309   :  { %4308 = vmatpush1.bf16.msra.mxu1 %v6115_v39  ;;  %v6188_v39 = vcombine.high %v6059_v32, %v6063_v33 }
 0x30a   :  { %4309 = vmatprep.subr.bf16.mxu1 %v6124_v40  ;;  %v6067_v40 = vld [vmem:[%s8795_s3 + $0xf40] sm:$0xff] }
 0x30b   :  { %6314 = vmatpush3.bf16.msra.mxu0 %v6520_v45  ;;  %v6196_v45 = vcombine.high %v6067_v40, %v6071_v42 }
 0x30c   :  { %6315 = vmatprep.subr.bf16.mxu0 %v6521_v47  ;;  %v6075_v47 = vld [vmem:[%s8795_s3 + $0xf80] sm:$0xff] }
 0x30d   :  { %4310 = vmatpush1.bf16.msra.mxu1 %v6123_v48  ;;  %v6079_v48 = vld [vmem:[%s8795_s3 + $0xfa0] sm:$0xff] }
 0x30e   :  { %4311 = vmatprep.subr.bf16.mxu1 %v6132_v49  ;;  %v6195_v49 = vcombine.low %v6067_v40, %v6071_v42  ;;  %v6204_v52 = vcombine.high %v6075_v47, %v6079_v48 }
 0x30f   :  { %v2453_v55 = vpop.f32.mrb[12].mxu1  ;;  %6316 = vmatpush3.bf16.msra.mxu0 %v6522_v51  ;;  %v6087_v51 = vld [vmem:[%s8795_s3 + $0xfe0] sm:$0xff] }
 0x310   :  { %v8408_v61 = vadd.f32 %v2453_v55, %v7792_v18  ;;  %v3431_v62 = vpop.f32.mrb[20].mxu0  ;;  %v2455_v63 = vpop.f32.mrb[13].mxu1  ;;  %6317 = vmatprep.subr.bf16.mxu0 %v6523_v19  ;;  %v6148_v18 = vcombine.high %v6019_v56, %v6023_v57  ;;  %v6203_v19 = vcombine.low %v6075_v47, %v6079_v48  ;;  %v5969_v55 = vld [vmem:[%s8795_s3 + $0xc30] sm:$0xff]  ;;  %v6211_v56 = vcombine.low %v6083_v50, %v6087_v51 }
 0x311   :  { %v8411_v0 = vadd.f32 %v3431_v62, %v8005_v60  ;;  %v8414_v2 = vadd.f32 %v2455_v63, %v7802_v22  ;;  %v3433_v3 = vpop.f32.mrb[21].mxu0  ;;  %v2457_v4 = vpop.f32.mrb[14].mxu1  ;;  %4312 = vmatpush1.bf16.msra.mxu1 %v6131_v54  ;;  %v6027_v22 = vld [vmem:[%s8795_s3 + $0xe00] sm:$0xff]  ;;  %v6212_v54 = vcombine.high %v6083_v50, %v6087_v51  ;;  %v5977_v62 = vld [vmem:[%s8795_s3 + $0xc70] sm:$0xff] }
 0x312   :  { %v8417_v6 = vadd.f32 %v3433_v3, %v8013_v1  ;;  %v3435_v7 = vpop.f32.mrb[22].mxu0  ;;  %v2458_v8 = vpop.f32.mrb[15].mxu1  ;;  %4313 = vmatprep.subr.bf16.mxu1 %v6140_v23  ;;  %v6526_v1 = vld [vmem:[%s8797_s5 + $0xb0] sm:$0xff]   ;;  %v6156_v13 = vcombine.high %v6027_v22, %v6031_v11  ;;  %v6155_v17 = vcombine.low %v6027_v22, %v6031_v11 }
 0x313   :  { %v3436_v60 = vpop.f32.mrb[23].mxu0  ;;  %6318 = vmatpush3.bf16.msra.mxu0 %v6524_v27  ;;  %v5965_v23 = vld [vmem:[%s8795_s3 + $0xc10] sm:$0xff] }
 0x314   :  { %6319 = vmatprep.subr.bf16.mxu0 %v6525_v10  ;;  %v6096_v57 = vcombine.high %v5965_v23, %v5969_v55  ;;  %v5973_v27 = vld [vmem:[%s8795_s3 + $0xc50] sm:$0xff]  ;;  %v6095_v63 = vcombine.low %v5965_v23, %v5969_v55 }
 0x315   :  { %4314 = vmatpush1.bf16.msra.mxu1 %v6139_v5  ;;  %v6104_v3 = vcombine.high %v5973_v27, %v5977_v62  ;;  %v5981_v4 = vld [vmem:[%s8795_s3 + $0xc90] sm:$0xff]  ;;  %v6103_v7 = vcombine.low %v5973_v27, %v5977_v62 }
 0x316   :  { %4315 = vmatprep.subr.bf16.mxu1 %v6148_v18  ;;  %v5985_v5 = vld [vmem:[%s8795_s3 + $0xcb0] sm:$0xff] }
 0x317   :  { %6320 = vmatpush3.bf16.msra.mxu0 %v6526_v1  ;;  %v6112_v8 = vcombine.high %v5981_v4, %v5985_v5  ;;  %v5989_v18 = vld [vmem:[%s8795_s3 + $0xcd0] sm:$0xff]  ;;  %v6111_v60 = vcombine.low %v5981_v4, %v5985_v5 }
 0x318   :  { %6321 = vmatprep.subr.bf16.mxu0 %v6527_v14  ;;  %v5993_v10 = vld [vmem:[%s8795_s3 + $0xcf0] sm:$0xff] }
 0x319   :  { %4316 = vmatpush1.bf16.msra.mxu1 %v6147_v12  ;;  %v6120_v22 = vcombine.high %v5989_v18, %v5993_v10  ;;  %v5997_v11 = vld [vmem:[%s8795_s3 + $0xd10] sm:$0xff]  ;;  %v6119_v1 = vcombine.low %v5989_v18, %v5993_v10 }
 0x31a   :  { %4317 = vmatprep.subr.bf16.mxu1 %v6156_v13  ;;  %v6005_v13 = vld [vmem:[%s8795_s3 + $0xd50] sm:$0xff] }
 0x31b   :  { %6322 = vmatpush3.bf16.msra.mxu0 %v6528_v16  ;;  %v6009_v14 = vld [vmem:[%s8795_s3 + $0xd70] sm:$0xff] }
 0x31c   :  { %6351 = vmatprep.subr.bf16.mxu0 %v6529_v24  ;;  %v6136_v53 = vcombine.high %v6005_v13, %v6009_v14  ;;  %v6013_v16 = vld [vmem:[%s8795_s3 + $0xd90] sm:$0xff] }
 0x31d   :  { %4318 = vmatpush1.bf16.msra.mxu1 %v6155_v17  ;;  %v6017_v17 = vld [vmem:[%s8795_s3 + $0xdb0] sm:$0xff] }
 0x31e   :  { %4319 = vmatprep.subr.bf16.mxu1 %v6164_v20  ;;  %v6135_v20 = vcombine.low %v6005_v13, %v6009_v14  ;;  %v6144_v21 = vcombine.high %v6013_v16, %v6017_v17  ;;  %v6021_v24 = vld [vmem:[%s8795_s3 + $0xdd0] sm:$0xff]  ;;  %v6545_v14 = vld [vmem:[%s8797_s5 + $0x40] sm:$0xff]  }
 0x31f   :  { %v6041_v48 = vld [vmem:[%s8795_s3 + $0xe70] sm:$0xff] }
 0x320   :  { %v6045_v50 = vld [vmem:[%s8795_s3 + $0xe90] sm:$0xff] }
 0x321   :  { %4320 = vmatpush1.bf16.msra.mxu1 %v6163_v34  ;;  %v6025_v34 = vld [vmem:[%s8795_s3 + $0xdf0] sm:$0xff] }
 0x322   :  { %4321 = vmatprep.subr.bf16.mxu1 %v6172_v25  ;;  %v6049_v51 = vld [vmem:[%s8795_s3 + $0xeb0] sm:$0xff] }
 0x323   :  { %v6053_v23 = vld [vmem:[%s8795_s3 + $0xed0] sm:$0xff] }
 0x324   :  { %v6057_v55 = vld [vmem:[%s8795_s3 + $0xef0] sm:$0xff] }
 0x325   :  { %4322 = vmatpush1.bf16.msra.mxu1 %v6171_v59  ;;  %v6061_v27 = vld [vmem:[%s8795_s3 + $0xf10] sm:$0xff] }
 0x326   :  { %4323 = vmatprep.subr.bf16.mxu1 %v6180_v31  ;;  %v6065_v62 = vld [vmem:[%s8795_s3 + $0xf30] sm:$0xff] }
 0x327   :  { %v6069_v4 = vld [vmem:[%s8795_s3 + $0xf50] sm:$0xff] }
 0x328   :  { %v6073_v5 = vld [vmem:[%s8795_s3 + $0xf70] sm:$0xff] }
 0x329   :  { %4324 = vmatpush1.bf16.msra.mxu1 %v6179_v36  ;;  %v6143_v36 = vcombine.low %v6013_v16, %v6017_v17  ;;  %v6077_v18 = vld [vmem:[%s8795_s3 + $0xf90] sm:$0xff]  ;;  %v6548_v16 = vld [vmem:[%s8797_s5 + $0x8] sm:$0xff]  }
 0x32a   :  { %4325 = vmatprep.subr.bf16.mxu1 %v6188_v39  ;;  %v6081_v10 = vld [vmem:[%s8795_s3 + $0xfb0] sm:$0xff] }
 0x32b   :  { %v6549_v17 = vld [vmem:[%s8797_s5 + $0x50] sm:$0xff]  }
 0x32d   :  { %4326 = vmatpush1.bf16.msra.mxu1 %v6187_v43 }
 0x32e   :  { %4327 = vmatprep.subr.bf16.mxu1 %v6196_v45  ;;  %v6151_v45 = vcombine.low %v6021_v24, %v6025_v34 }
 0x331   :  { %4328 = vmatpush1.bf16.msra.mxu1 %v6195_v49 }
 0x332   :  { %4329 = vmatprep.subr.bf16.mxu1 %v6204_v52 }
 0x335   :  { %4330 = vmatpush1.bf16.msra.mxu1 %v6203_v19 }
 0x336   :  { %4331 = vmatprep.subr.bf16.mxu1 %v6212_v54  ;;  %v6176_v54 = vcombine.high %v6045_v50, %v6049_v51 }
 0x339   :  { %4332 = vmatpush1.bf16.msra.mxu1 %v6211_v56  ;;  %v6175_v56 = vcombine.low %v6045_v50, %v6049_v51 }
 0x33a   :  { %4383 = vmatprep.subr.bf16.mxu1 %v6096_v57  ;;  %v6184_v57 = vcombine.high %v6053_v23, %v6057_v55 }
 0x33c   :  { %4334 = vmatmul.mubr.bf16.vlgmr.msra.gmra.mrb[28].mxu1 %v8136_v44 }
 0x33d   :  { %4384 = vmatpush1.bf16.msra.mxu1 %v6095_v63  ;;  %4415 = vmatprep.mubr.bf16.mxu1 %v7947_v9  ;;  %v6001_v9 = vld [vmem:[%s8795_s3 + $0xd30] sm:$0xff]  ;;  %v6183_v63 = vcombine.low %v6053_v23, %v6057_v55  ;;  %v6560_v23 = vld [vmem:[%s8797_s5 + $0x38] sm:$0xff]  }
 0x33e   :  { %4385 = vmatprep.subr.bf16.mxu1 %v6104_v3  ;;  %v6128_v12 = vcombine.high %v5997_v11, %v6001_v9  ;;  %v6127_v15 = vcombine.low %v5997_v11, %v6001_v9  ;;  %v6192_v3 = vcombine.high %v6061_v27, %v6065_v62  ;;  %v6085_v11 = vld [vmem:[%s8795_s3 + $0xfd0] sm:$0xff] }
 0x33f   :  { %v6089_v9 = vld [vmem:[%s8795_s3 + $0xff0] sm:$0xff] }
 0x340   :  { %v6215_v13 = vcombine.low %v6085_v11, %v6089_v9 }
 0x341   :  { %4386 = vmatpush1.bf16.msra.mxu1 %v6103_v7  ;;  %v6191_v7 = vcombine.low %v6061_v27, %v6065_v62  ;;  %v6531_v27 = vld [vmem:[%s8797_s5 + $0x1c8] sm:$0xff]   ;;  %v6561_v62 = vld [vmem:[%s8797_s5 + $0x140] sm:$0xff]  }
 0x342   :  { %4387 = vmatprep.subr.bf16.mxu1 %v6112_v8  ;;  %v6200_v8 = vcombine.high %v6069_v4, %v6073_v5 }
 0x345   :  { %4388 = vmatpush1.bf16.msra.mxu1 %v6111_v60  ;;  %v6199_v60 = vcombine.low %v6069_v4, %v6073_v5  ;;  %v6534_v4 = vld [vmem:[%s8797_s5 + $0x190] sm:$0xff]   ;;  %v6535_v5 = vld [vmem:[%s8797_s5 + $0x1d8] sm:$0xff]  }
 0x346   :  { %4389 = vmatprep.subr.bf16.mxu1 %v6120_v22  ;;  %v6208_v22 = vcombine.high %v6077_v18, %v6081_v10 }
 0x349   :  { %4390 = vmatpush1.bf16.msra.mxu1 %v6119_v1  ;;  %v6207_v1 = vcombine.low %v6077_v18, %v6081_v10  ;;  %v6538_v18 = vld [vmem:[%s8797_s5 + $0x1a0] sm:$0xff]   ;;  %v6539_v10 = vld [vmem:[%s8797_s5 + $0x1e8] sm:$0xff]  }
 0x34a   :  { %4391 = vmatprep.subr.bf16.mxu1 %v6128_v12  ;;  %v6216_v12 = vcombine.high %v6085_v11, %v6089_v9  ;;  %v6542_v11 = vld [vmem:[%s8797_s5 + $0x1b0] sm:$0xff]   ;;  %v6543_v9 = vld [vmem:[%s8797_s5 + $0x1f8] sm:$0xff]  }
 0x34d   :  { %4392 = vmatpush1.bf16.msra.mxu1 %v6127_v15  ;;  %v6546_v15 = vld [vmem:[%s8797_s5] sm:$0xff]  }
 0x34e   :  { %4393 = vmatprep.subr.bf16.mxu1 %v6136_v53  ;;  %v6547_v53 = vld [vmem:[%s8797_s5 + $0x48] sm:$0xff]  }
 0x34f   :  { %v2535_v58 = vpop.f32.mrb[16].mxu1 }
 0x350   :  { %v8533_v25 = vadd.f32 %v2535_v58, %v8202_v29  ;;  %v3513_v26 = vpop.f32.mrb[24].mxu0  ;;  %v2537_v28 = vpop.f32.mrb[17].mxu1  ;;  %v6152_v29 = vcombine.high %v6021_v24, %v6025_v34  ;;  %v6553_v58 = vld [vmem:[%s8797_s5 + $0x60] sm:$0xff]   ;;  %v6555_v34 = vld [vmem:[%s8797_s5 + $0x68] sm:$0xff]  }
 0x351   :  { %v8536_v59 = vadd.f32 %v3513_v26, %v8219_v41  ;;  %v8539_v31 = vadd.f32 %v2537_v28, %v8210_v38  ;;  %v3515_v32 = vpop.f32.mrb[25].mxu0  ;;  %v2539_v33 = vpop.f32.mrb[18].mxu1  ;;  %4394 = vmatpush1.bf16.msra.mxu1 %v6135_v20  ;;  %v6029_v41 = vld [vmem:[%s8795_s3 + $0xe10] sm:$0xff]  ;;  %v6554_v24 = vld [vmem:[%s8797_s5 + $0x20] sm:$0xff]   ;;  %v4485_v26 = vsub.s32 2, %v7099_v30 }
 0x352   :  { %v8542_v39 = vadd.f32 %v3515_v32, %v8222_v46  ;;  %v3517_v40 = vpop.f32.mrb[26].mxu0  ;;  %v2540_v42 = vpop.f32.mrb[19].mxu1  ;;  %4395 = vmatprep.subr.bf16.mxu1 %v6144_v21  ;;  %v6033_v38 = vld [vmem:[%s8795_s3 + $0xe30] sm:$0xff]  ;;  %v6552_v21 = vld [vmem:[%s8797_s5 + $0x18] sm:$0xff]   ;;  %v8630_v28 = vld [vmem:[%s8796_s4] sm:$0xff]  ;;  %v4489_v32 = vsub.s32 3, %v7099_v30 }
 0x353   :  { %v3518_v43 = vpop.f32.mrb[27].mxu0  ;;  %v6160_v47 = vcombine.high %v6029_v41, %v6033_v38  ;;  %v6037_v46 = vld [vmem:[%s8795_s3 + $0xe50] sm:$0xff]  ;;  %v6159_v49 = vcombine.low %v6029_v41, %v6033_v38  ;;  %v6556_v40 = vld [vmem:[%s8797_s5 + $0x28] sm:$0xff]  }
 0x354   :  { %v6168_v52 = vcombine.high %v6037_v46, %v6041_v48  ;;  %v6167_v19 = vcombine.low %v6037_v46, %v6041_v48  ;;  %v6550_v20 = vld [vmem:[%s8797_s5 + $0x10] sm:$0xff]   ;;  %v4490_v41 = vrot.slane %v8630_v28, %v4489_v32 }
 0x355   :  { %4396 = vmatpush1.bf16.msra.mxu1 %v6143_v36  ;;  %v4486_v36 = vrot.slane %v8630_v28, %v4485_v26 }
 0x356   :  { %4397 = vmatprep.subr.bf16.mxu1 %v6152_v29 }
 0x359   :  { %4398 = vmatpush1.bf16.msra.mxu1 %v6151_v45 }
 0x35a   :  { %4399 = vmatprep.subr.bf16.mxu1 %v6160_v47 }
 0x35d   :  { %4400 = vmatpush1.bf16.msra.mxu1 %v6159_v49 }
 0x35e   :  { %4401 = vmatprep.subr.bf16.mxu1 %v6168_v52 }
 0x361   :  { %4402 = vmatpush1.bf16.msra.mxu1 %v6167_v19 }
 0x362   :  { %4403 = vmatprep.subr.bf16.mxu1 %v6176_v54 }
 0x365   :  { %4404 = vmatpush1.bf16.msra.mxu1 %v6175_v56  ;;  %v6530_v56 = vld [vmem:[%s8797_s5 + $0x180] sm:$0xff]  }
 0x366   :  { %4405 = vmatprep.subr.bf16.mxu1 %v6184_v57 }
 0x369   :  { %4406 = vmatpush1.bf16.msra.mxu1 %v6183_v63  ;;  %v6532_v63 = vld [vmem:[%s8797_s5 + $0x188] sm:$0xff]  }
 0x36a   :  { %4407 = vmatprep.subr.bf16.mxu1 %v6192_v3  ;;  %v6533_v3 = vld [vmem:[%s8797_s5 + $0x1d0] sm:$0xff]  }
 0x36d   :  { %4408 = vmatpush1.bf16.msra.mxu1 %v6191_v7  ;;  %v6536_v7 = vld [vmem:[%s8797_s5 + $0x198] sm:$0xff]  }
 0x36e   :  { %4409 = vmatprep.subr.bf16.mxu1 %v6200_v8  ;;  %v6537_v8 = vld [vmem:[%s8797_s5 + $0x1e0] sm:$0xff]  }
 0x371   :  { %4410 = vmatpush1.bf16.msra.mxu1 %v6199_v60  ;;  %v6540_v60 = vld [vmem:[%s8797_s5 + $0x1a8] sm:$0xff]  }
 0x372   :  { %4411 = vmatprep.subr.bf16.mxu1 %v6208_v22  ;;  %v6541_v22 = vld [vmem:[%s8797_s5 + $0x1f0] sm:$0xff]  }
 0x375   :  { %4412 = vmatpush1.bf16.msra.mxu1 %v6207_v1  ;;  %v6544_v1 = vld [vmem:[%s8797_s5 + $0x1b8] sm:$0xff]  }
 0x376   :  { %4413 = vmatprep.subr.bf16.mxu1 %v6216_v12  ;;  %v4501_v12 = vsub.s32 6, %v7099_v30 }
 0x379   :  { %4414 = vmatpush1.bf16.msra.mxu1 %v6215_v13  ;;  %v4505_v13 = vsub.s32 7, %v7099_v30 }
 0x37a   :  { %6285 = vmatprep.subr.bf16.mxu1 %v6545_v14 }
 0x37c   :  { %4416 = vmatmul.mubr.bf16.vlgmr.msra.gmra.mrb[32].mxu1 %v8136_v44  ;;  %v6551_v44 = vld [vmem:[%s8797_s5 + $0x58] sm:$0xff]  }
 0x37d   :  { %6286 = vmatpush3.bf16.msra.mxu1 %v6546_v15  ;;  %v4502_v15 = vrot.slane %v8630_v28, %v4501_v12 }
 0x37e   :  { %6287 = vmatprep.subr.bf16.mxu1 %v6547_v53 }
 0x381   :  { %6288 = vmatpush3.bf16.msra.mxu1 %v6548_v16 }
 0x382   :  { %6289 = vmatprep.subr.bf16.mxu1 %v6549_v17 }
 0x385   :  { %6290 = vmatpush3.bf16.msra.mxu1 %v6550_v20  ;;  %v4506_v20 = vrot.slane %v8630_v28, %v4505_v13 }
 0x386   :  { %6291 = vmatprep.subr.bf16.mxu1 %v6551_v44 }
 0x389   :  { %6292 = vmatpush3.bf16.msra.mxu1 %v6552_v21 }
 0x38a   :  { %6293 = vmatprep.subr.bf16.mxu1 %v6553_v58 }
 0x38d   :  { %6294 = vmatpush3.bf16.msra.mxu1 %v6554_v24 }
 0x38e   :  { %6295 = vmatprep.subr.bf16.mxu1 %v6555_v34 }
 0x38f   :  { %v3390_v33 = vpop.f32.mrb[20].mxu1 }
 0x390   :  { %v8638_v42 = vadd.f32 %v3390_v33, %v8408_v61  ;;  %v4376_v29 = vpop.f32.mrb[28].mxu0  ;;  %v3392_v43 = vpop.f32.mrb[21].mxu1  ;;  %v6557_v61 = vld [vmem:[%s8797_s5 + $0x70] sm:$0xff]  }
 0x391   :  { %v4467_v38 = vadd.f32 %v4376_v29, %v8411_v0  ;;  %v8643_v45 = vadd.f32 %v3392_v43, %v8414_v2  ;;  %v4378_v47 = vpop.f32.mrb[29].mxu0  ;;  %v3394_v46 = vpop.f32.mrb[22].mxu1  ;;  %6296 = vmatpush3.bf16.msra.mxu1 %v6556_v40  ;;  %v6558_v0 = vld [vmem:[%s8797_s5 + $0x30] sm:$0xff]  }
 0x392   :  { %v4468_v48 = vadd.f32 %v4378_v47, %v8417_v6  ;;  %v4380_v49 = vpop.f32.mrb[30].mxu0  ;;  %v3395_v52 = vpop.f32.mrb[23].mxu1  ;;  %6297 = vmatprep.subr.bf16.mxu1 %v6557_v61  ;;  %v6559_v6 = vld [vmem:[%s8797_s5 + $0x78] sm:$0xff]  }
 0x393   :  { %v4517_v50 = vadd.f32 %v4486_v36, %v4467_v38  ;;  %v4381_v51 = vpop.f32.mrb[31].mxu0 }
 0x394   :  { %v4518_v19 = vadd.f32 %v4490_v41, %v4468_v48 }
 0x395   :  { %v4525_v2 = vmax.f32 %v4517_v50, 0.0  ;;  %6298 = vmatpush3.bf16.msra.mxu1 %v6558_v0 }
 0x396   :  { %v4526_v54 = vmax.f32 %v4518_v19, 0.0  ;;  %6299 = vmatprep.subr.bf16.mxu1 %v6559_v6  ;;  %v6568_v6 = vld [vmem:[%s8797_s5 + $0x118] sm:$0xff]  }
 0x397   :  { %v4533_v57 = vpack.c.bf16 %v4525_v2, %v4525_v2  ;;  %v6566_v2 = vld [vmem:[%s8797_s5 + $0x110] sm:$0xff]  }
 0x398   :  { %v4534_v55 = vpack.c.bf16 %v4526_v54, %v4526_v54  ;;  %v6567_v54 = vld [vmem:[%s8797_s5 + $0x158] sm:$0xff]  }
 0x399   :  { %6300 = vmatpush3.bf16.msra.mxu1 %v6560_v23  ;;  %v6569_v23 = vld [vmem:[%s8797_s5 + $0x160] sm:$0xff]  }
 0x39a   :  { %5130 = vmatprep.mubr.bf16.mxu0 %v4534_v55  ;;  %6329 = vmatprep.subr.bf16.mxu1 %v6561_v62  ;;  %v6570_v55 = vld [vmem:[%s8797_s5 + $0x120] sm:$0xff]   ;;  %v6574_v62 = vld [vmem:[%s8797_s5 + $0x130] sm:$0xff]  }
 0x39b   :  { %5131 = vmatmul.mubr.bf16.vlgmr.msra.gmra.mrb[36].mxu0 %v4533_v57  ;;  %v6572_v57 = vld [vmem:[%s8797_s5 + $0x128] sm:$0xff]  }
 0x39c   :  { %6352 = vmatpush3.bf16.msra.mxu0 %v6530_v56  ;;  %v6571_v56 = vld [vmem:[%s8797_s5 + $0x168] sm:$0xff]  }
 0x39d   :  { %6353 = vmatprep.subr.bf16.mxu0 %v6531_v27  ;;  %v6573_v27 = vld [vmem:[%s8797_s5 + $0x170] sm:$0xff]  }
 0x3a0   :  { %6354 = vmatpush3.bf16.msra.mxu0 %v6532_v63  ;;  %v6575_v63 = vld [vmem:[%s8797_s5 + $0x178] sm:$0xff]  }
 0x3a1   :  { %6355 = vmatprep.subr.bf16.mxu0 %v6533_v3  ;;  %v6576_v3 = vld [vmem:[%s8797_s5 + $0x138] sm:$0xff]  }
 0x3a4   :  { %6356 = vmatpush3.bf16.msra.mxu0 %v6534_v4  ;;  %v4493_v4 = vsub.s32 4, %v7099_v30 }
 0x3a5   :  { %6357 = vmatprep.subr.bf16.mxu0 %v6535_v5  ;;  %v4497_v5 = vsub.s32 5, %v7099_v30 }
 0x3a8   :  { %6358 = vmatpush3.bf16.msra.mxu0 %v6536_v7  ;;  %v4494_v7 = vrot.slane %v8630_v28, %v4493_v4 }
 0x3a9   :  { %6359 = vmatprep.subr.bf16.mxu0 %v6537_v8 }
 0x3ac   :  { %6360 = vmatpush3.bf16.msra.mxu0 %v6538_v18  ;;  %v4498_v18 = vrot.slane %v8630_v28, %v4497_v5 }
 0x3ad   :  { %6361 = vmatprep.subr.bf16.mxu0 %v6539_v10 }
 0x3b0   :  { %6362 = vmatpush3.bf16.msra.mxu0 %v6540_v60 }
 0x3b1   :  { %6363 = vmatprep.subr.bf16.mxu0 %v6541_v22 }
 0x3b4   :  { %6364 = vmatpush3.bf16.msra.mxu0 %v6542_v11 }
 0x3b5   :  { %6365 = vmatprep.subr.bf16.mxu0 %v6543_v9 }
 0x3b8   :  { %6366 = vmatpush3.bf16.msra.mxu0 %v6544_v1 }
 0x3cf   :  { %v3472_v14 = vpop.f32.mrb[24].mxu1 }
 0x3d0   :  { %v8710_v53 = vadd.f32 %v3472_v14, %v8533_v25  ;;  %v4458_v16 = vpop.f32.mrb[32].mxu0  ;;  %v3474_v17 = vpop.f32.mrb[25].mxu1 }
 0x3d1   :  { %v4471_v44 = vadd.f32 %v4458_v16, %v8536_v59  ;;  %v8715_v21 = vadd.f32 %v3474_v17, %v8539_v31  ;;  %v4460_v58 = vpop.f32.mrb[33].mxu0  ;;  %v3476_v24 = vpop.f32.mrb[26].mxu1  ;;  %v4478_v59 = vrot.slane %v8630_v28, %v698_v35  ;;  %v6562_v35 = vld [vmem:[%s8797_s5 + $0x100] sm:$0xff]  }
 0x3d2   :  { %v4472_v34 = vadd.f32 %v4460_v58, %v8542_v39  ;;  %v4462_v26 = vpop.f32.mrb[34].mxu0  ;;  %v3477_v32 = vpop.f32.mrb[27].mxu1  ;;  %v4482_v39 = vrot.slane %v8630_v28, %v702_v37  ;;  %v6563_v37 = vld [vmem:[%s8797_s5 + $0x148] sm:$0xff]  }
 0x3d3   :  { %v4521_v33 = vadd.f32 %v4502_v15, %v4471_v44  ;;  %v4463_v36 = vpop.f32.mrb[35].mxu0  ;;  %v6219_v32 = vld [vmem:[%s8798_s6] ss:$0 sm:$0xff]  ;;  %s5231_s6 = sshll.u32 %s6606_s18, 4  ;;  %s5232_s6 = int_to_ptr.vmem [resolvable:$true] %s5231_s6 }
 0x3d4   :  { %v4522_v40 = vadd.f32 %v4506_v20, %v4472_v34  ;;  %s6581_s19 = scalar_lea.vmem %s5232_s6, 32  ;;  %p6586_p1 = scmp.lt.s32.totalorder %s5232_s6, %s5232_s6 }
 0x3d5   :  { %v4529_v25 = vmax.f32 %v4521_v33, 0.0  ;;  %p6582_p0 = scmp.ne.s32.totalorder %s5232_s6, %s6581_s19  ;;  %p6587_p2 = scmp.lt.s32.totalorder %s6581_s19, %s6581_s19 }
 0x3d6   :  { %v4530_v29 = vmax.f32 %v4522_v40, 0.0 }
 0x3d7   :  { %v4537_v41 = vpack.c.bf16 %v4529_v25, %v4529_v25  ;;  %p6588_p3 = por %p6587_p2, %p6586_p1 }
 0x3d8   :  { %v4538_v43 = vpack.c.bf16 %v4530_v29, %v4530_v29 }
 0x3d9   :  { %p6589_p4 = pnand %p6588_p3, %p6582_p0 }
 0x3da   :  { %5210 = vmatprep.mubr.bf16.mxu0 %v4538_v43 }
 0x3db   :  { %5211 = vmatmul.mubr.bf16.vlgmr.msra.gmra.mrb[40].mxu0 %v4537_v41 }
 0x40f   :  { %v4335_v31 = vpop.f32.mrb[28].mxu1 }
 0x410   :  { %v4465_v38 = vadd.f32 %v4335_v31, %v8638_v42  ;;  %v4337_v47 = vpop.f32.mrb[29].mxu1  ;;  %v6564_v42 = vld [vmem:[%s8797_s5 + $0x108] sm:$0xff]  }
 0x411   :  { %v4466_v46 = vadd.f32 %v4337_v47, %v8643_v45  ;;  %v4339_v48 = vpop.f32.mrb[30].mxu1  ;;  %v6565_v45 = vld [vmem:[%s8797_s5 + $0x150] sm:$0xff]  }
 0x412   :  { %v4515_v49 = vadd.f32 %v4478_v59, %v4465_v38  ;;  %v4340_v52 = vpop.f32.mrb[31].mxu1 }
 0x413   :  { %v4516_v61 = vadd.f32 %v4482_v39, %v4466_v46 }
 0x414   :  { %v4523_v50 = vmax.f32 %v4515_v49, 0.0 }
 0x415   :  { %v4524_v51 = vmax.f32 %v4516_v61, 0.0 }
 0x416   :  { %v4531_v19 = vpack.c.bf16 %v4523_v50, %v4523_v50 }
 0x417   :  { %v4532_v0 = vpack.c.bf16 %v4524_v51, %v4524_v51 }
 0x419   :  { %5090 = vmatprep.mubr.bf16.mxu1 %v4532_v0 }
 0x41a   :  { %5091 = vmatmul.mubr.bf16.vlgmr.msra.gmra.mrb[36].mxu1 %v4531_v19 }
 0x41b   :  { %6330 = vmatpush3.bf16.msra.mxu1 %v6562_v35 }
 0x41c   :  { %6331 = vmatprep.subr.bf16.mxu1 %v6563_v37 }
 0x41f   :  { %6332 = vmatpush3.bf16.msra.mxu1 %v6564_v42 }
 0x420   :  { %6333 = vmatprep.subr.bf16.mxu1 %v6565_v45 }
 0x423   :  { %6334 = vmatpush3.bf16.msra.mxu1 %v6566_v2 }
 0x424   :  { %6335 = vmatprep.subr.bf16.mxu1 %v6567_v54 }
 0x427   :  { %6336 = vmatpush3.bf16.msra.mxu1 %v6568_v6 }
 0x428   :  { %6337 = vmatprep.subr.bf16.mxu1 %v6569_v23 }
 0x42b   :  { %6338 = vmatpush3.bf16.msra.mxu1 %v6570_v55 }
 0x42c   :  { %6339 = vmatprep.subr.bf16.mxu1 %v6571_v56 }
 0x42f   :  { %6340 = vmatpush3.bf16.msra.mxu1 %v6572_v57 }
 0x430   :  { %6341 = vmatprep.subr.bf16.mxu1 %v6573_v27 }
 0x433   :  { %6342 = vmatpush3.bf16.msra.mxu1 %v6574_v62 }
 0x434   :  { %6343 = vmatprep.subr.bf16.mxu1 %v6575_v63 }
 0x437   :  { %6344 = vmatpush3.bf16.msra.mxu1 %v6576_v3 }
 0x44f   :  { %v4417_v8 = vpop.f32.mrb[32].mxu1 }
 0x450   :  { %v4469_v10 = vadd.f32 %v4417_v8, %v8710_v53  ;;  %v4419_v60 = vpop.f32.mrb[33].mxu1 }
 0x451   :  { %v4470_v22 = vadd.f32 %v4419_v60, %v8715_v21  ;;  %v4421_v11 = vpop.f32.mrb[34].mxu1 }
 0x452   :  { %v4519_v9 = vadd.f32 %v4494_v7, %v4469_v10  ;;  %v4422_v1 = vpop.f32.mrb[35].mxu1 }
 0x453   :  { %v4520_v12 = vadd.f32 %v4498_v18, %v4470_v22 }
 0x454   :  { %v4527_v13 = vmax.f32 %v4519_v9, 0.0 }
 0x455   :  { %v4528_v14 = vmax.f32 %v4520_v12, 0.0 }
 0x456   :  { %v4535_v16 = vpack.c.bf16 %v4527_v13, %v4527_v13 }
 0x457   :  { %v4536_v15 = vpack.c.bf16 %v4528_v14, %v4528_v14 }
 0x459   :  { %5170 = vmatprep.mubr.bf16.mxu1 %v4536_v15 }
 0x45a   :  { %5171 = vmatmul.mubr.bf16.vlgmr.msra.gmra.mrb[40].mxu1 %v4535_v16 }
 0x46e   :  { %v6323_v30 = vpop.f32.mrb[36].mxu0 }
 0x46f   :  { %v6324_v17 = vpop.f32.mrb[37].mxu0 }
 0x470   :  { %v6325_v20 = vadd.f32 %v6324_v17, %v6323_v30  ;;  %v6326_v44 = vpop.f32.mrb[38].mxu0 }
 0x471   :  { %v6327_v28 = vpop.f32.mrb[39].mxu0 }
 0x4ae   :  { %v6367_v58 = vpop.f32.mrb[40].mxu0 }
 0x4af   :  { %v6368_v53 = vpop.f32.mrb[41].mxu0 }
 0x4b0   :  { %v6369_v24 = vadd.f32 %v6368_v53, %v6367_v58  ;;  %v6370_v34 = vpop.f32.mrb[42].mxu0 }
 0x4b1   :  { %v6371_v21 = vpop.f32.mrb[43].mxu0 }
 0x4ed   :  { %v6301_v26 = vpop.f32.mrb[36].mxu1 }
 0x4ee   :  { %v6302_v33 = vpop.f32.mrb[37].mxu1 }
 0x4ef   :  { %v6303_v36 = vadd.f32 %v6302_v33, %v6301_v26  ;;  %v6304_v40 = vpop.f32.mrb[38].mxu1 }
 0x4f0   :  { %v6305_v25 = vpop.f32.mrb[39].mxu1 }
 0x4f1   :  { %v5093_v29 = vadd.f32 %v6303_v36, %v6219_v32 }
 0x4f3   :  { %v5133_v43 = vadd.f32 %v6325_v20, %v5093_v29 }
 0x52d   :  { %v6345_v41 = vpop.f32.mrb[40].mxu1 }
 0x52e   :  { %v6346_v59 = vpop.f32.mrb[41].mxu1 }
 0x52f   :  { %v6347_v31 = vadd.f32 %v6346_v59, %v6345_v41  ;;  %v6348_v39 = vpop.f32.mrb[42].mxu1 }
 0x530   :  { %v6349_v38 = vpop.f32.mrb[43].mxu1 }
 0x531   :  { %v5173_v47 = vadd.f32 %v6347_v31, %v5133_v43 }
 0x533   :  { %v5213_v46 = vadd.f32 %v6369_v24, %v5173_v47 }
 0x535   :  { %v6284_v48 = vmul.f32 -1.442695, %v5213_v46 }
 0x537   :  { %6577 = vpow2.f32 %v6284_v48 }
 0x541   :  { %v6578_v49 = vpop.eup %6577 }
 0x542   :  { %v5221_v52 = vadd.f32 1.0, %v6578_v49 }
 0x544   :  { %6579 = vrcp.f32 %v5221_v52 }
 0x54e   :  { %v6580_v61 = vpop.eup %6579 }
 0x54f   :  { %5224 = vst [vmem:[#allocation2] sm:$0x3] %v6580_v61 }
 0x550   :  { %6592 = shalt.err (!%p6589_p4)
}
 0x551   :  { %s6593_s21 = scalar_lea.hbm %s8799_s7, 32 }
 0x552   :  { %p6594_p5 = scmp.ne.s32.totalorder %s8799_s7, %s6593_s21  ;;  %p6597_p6 = scmp.lt.u32.totalorder %s6593_s21, %s8799_s7 }
 0x554   :  { %p6599_p7 = pnand %p6597_p6, %p6594_p5 }
 0x556   :  { %6602 = shalt.err (!%p6599_p7)
}
 0x557   :  { %5234 = dma.vmem_to_hbm [thread:$0]  %s5232_s6, 32, %s8799_s7, [#allocation3]  }
 0x558   :  { %6603 = dma.done.wait [#allocation3], 32  }
 0x559   :  { %6604 = vsyncadd [#allocation3], 4294967264 }
 0x55a   :  { %5238 = vsyncpa [#allocation3], 1 }

</bundles_post_ra>
